<compile_context>
chip_gen: v5e
topology: v5e:2x2
jax: 0.10.0
libtpu: 0.0.40
codegen_flags: <defaults>
</compile_context>

<pallas_src>
import functools

import jax
import jax.numpy as jnp
from jax import lax
from jax.experimental import pallas as pl
from jax.experimental.pallas import tpu as pltpu

LANE = 128            # TPU lane width (last dim)
SUBLANE = 8           # TPU sublane width (second-to-last dim, f32)
BN_EPS = 1e-5         # nn.BatchNorm2d default eps
LEAK = 0.2            # LeakyReLU negative slope

VMEM_LIMIT_BYTES = 32 * 1024 * 1024   # explicit scoped-VMEM limit (safe on v5e/v6e/v7x)
VMEM_TILE_BUDGET = 20 * 1024 * 1024   # per-kernel working-set target (headroom under limit)


def _ceil_to(x, m):
    return (x + m - 1) // m * m


# ---------------------------------------------------------------------------
# Kernel 1: (bf16 patches) @ (bf16 W) -> f32 + bias, optional LeakyReLU,
#           optional per-block partial BatchNorm statistics.
# ---------------------------------------------------------------------------
def _matmul_kernel(p_ref, w_ref, b_ref, y_ref, *stat_refs, use_act, emit_stats):
    y = jnp.dot(p_ref[...], w_ref[...], preferred_element_type=jnp.float32)
    y = y + b_ref[...]                                   # (1, Cp) broadcast (zeros when norm)
    if emit_stats:
        # Per-block partial sums for tiling-safe BatchNorm.  Padded rows are
        # exact zeros (zero patches, zero bias), so they contribute nothing.
        s1 = jnp.sum(y, axis=0, keepdims=True)           # (1, Cp)
        s2 = jnp.sum(y * y, axis=0, keepdims=True)       # (1, Cp)
        pad = jnp.zeros((SUBLANE - 2, y.shape[1]), jnp.float32)
        stat_refs[0][...] = jnp.concatenate([s1, s2, pad], axis=0)[None]
    if use_act:
        y = jnp.where(y > 0, y, LEAK * y)                # LeakyReLU(0.2), f32
    y_ref[...] = y.astype(y_ref.dtype)


# ---------------------------------------------------------------------------
# Kernel 2: BatchNorm apply (y*scale + shift) fused with LeakyReLU, f32 math.
# ---------------------------------------------------------------------------
def _bn_act_kernel(y_ref, scale_ref, shift_ref, o_ref, *, use_act):
    y = y_ref[...].astype(jnp.float32)
    y = y * scale_ref[...] + shift_ref[...]
    if use_act:
        y = jnp.where(y > 0, y, LEAK * y)
    o_ref[...] = y.astype(o_ref.dtype)


# ---------------------------------------------------------------------------
# Tiling: biggest TILE_M (<=512) whose double-buffered working set fits VMEM.
# ---------------------------------------------------------------------------
def _pick_tile_m(M, K, Cp):
    tile_m = min(512, _ceil_to(M, SUBLANE))

    def working_set(tm):
        return (2 * tm * K * 2            # double-buffered bf16 patch tile
                + 2 * tm * Cp * 4         # double-buffered f32 output tile
                + 2 * K * Cp * 2          # resident bf16 weights (counted x2, conservative)
                + 4 * SUBLANE * Cp * 4)   # bias / stats blocks

    while tile_m > SUBLANE and working_set(tile_m) > VMEM_TILE_BUDGET:
        tile_m = _ceil_to(tile_m // 2, SUBLANE)
    return tile_m


def _fused_matmul(patches, w2d, bias2d, *, tile_m, use_act, emit_stats, out_dtype):
    m_pad, K = patches.shape
    Cp = w2d.shape[1]
    gm = m_pad // tile_m

    out_shape = [jax.ShapeDtypeStruct((m_pad, Cp), out_dtype)]
    out_specs = [pl.BlockSpec((tile_m, Cp), lambda i: (i, 0))]
    if emit_stats:
        out_shape.append(jax.ShapeDtypeStruct((gm, SUBLANE, Cp), jnp.float32))
        out_specs.append(pl.BlockSpec((1, SUBLANE, Cp), lambda i: (i, 0, 0)))

    kernel = functools.partial(_matmul_kernel, use_act=use_act, emit_stats=emit_stats)
    cost = pl.CostEstimate(
        flops=2 * m_pad * K * Cp,
        transcendentals=0,
        bytes_accessed=(m_pad * K * 2 + K * Cp * 2
                        + m_pad * Cp * jnp.dtype(out_dtype).itemsize))

    outs = pl.pallas_call(
        kernel,
        grid=(gm,),
        in_specs=[
            pl.BlockSpec((tile_m, K), lambda i: (i, 0)),   # patch rows: streamed
            pl.BlockSpec((K, Cp), lambda i: (0, 0)),       # weights: resident
            pl.BlockSpec((1, Cp), lambda i: (0, 0)),       # bias: resident
        ],
        out_specs=tuple(out_specs),
        out_shape=tuple(out_shape),
        compiler_params=pltpu.CompilerParams(
            dimension_semantics=("parallel",),             # megacore sharding on v7x
            vmem_limit_bytes=VMEM_LIMIT_BYTES),
        cost_estimate=cost,
    )(patches, w2d, bias2d)

    if emit_stats:
        y, stats = outs
        return y, stats
    return outs[0] if isinstance(outs, (tuple, list)) else outs


def _bn_act_apply(y, scale2d, shift2d, *, tile_m, use_act, out_dtype):
    m_pad, Cp = y.shape
    gm = m_pad // tile_m
    kernel = functools.partial(_bn_act_kernel, use_act=use_act)
    return pl.pallas_call(
        kernel,
        grid=(gm,),
        in_specs=[
            pl.BlockSpec((tile_m, Cp), lambda i: (i, 0)),
            pl.BlockSpec((1, Cp), lambda i: (0, 0)),
            pl.BlockSpec((1, Cp), lambda i: (0, 0)),
        ],
        out_specs=pl.BlockSpec((tile_m, Cp), lambda i: (i, 0)),
        out_shape=jax.ShapeDtypeStruct((m_pad, Cp), out_dtype),
        compiler_params=pltpu.CompilerParams(
            dimension_semantics=("parallel",),
            vmem_limit_bytes=VMEM_LIMIT_BYTES),
        cost_estimate=pl.CostEstimate(
            flops=3 * m_pad * Cp, transcendentals=0,
            bytes_accessed=m_pad * Cp * (4 + jnp.dtype(out_dtype).itemsize)),
    )(y, scale2d, shift2d)


# ---------------------------------------------------------------------------
# One layer: Conv2d(k=4, s, p=1) [+ BatchNorm2d (batch stats)] [+ LeakyReLU]
# ---------------------------------------------------------------------------
def _conv_layer(x_nhwc, w, bias, gamma, beta, *, stride, use_norm, use_act, out_dtype):
    N, H, Wd, cin = x_nhwc.shape
    cin_w, kh, kw, cout = w.shape
    assert cin_w == cin

    # --- im2col as one fused XLA op, built directly in bf16 -----------------
    # Feature ordering is input-channel-major (cin, kh, kw), matching the
    # (cin, kh, kw, cout) weight layout produced by init_params.
    patches = lax.conv_general_dilated_patches(
        x_nhwc.astype(jnp.bfloat16),
        filter_shape=(kh, kw),
        window_strides=(stride, stride),
        padding=((1, 1), (1, 1)),
        dimension_numbers=('NHWC', 'HWIO', 'NHWC'))
    _, Ho, Wo, K = patches.shape
    M = N * Ho * Wo
    patches = patches.reshape(M, K)
    w2d = w.reshape(cin * kh * kw, cout)

    # --- lane/MXU alignment: pad K and Cout up to multiples of 128 ----------
    Kp = _ceil_to(K, LANE)
    Cp = _ceil_to(cout, LANE)
    if Kp != K:
        patches = jnp.pad(patches, ((0, 0), (0, Kp - K)))
        w2d = jnp.pad(w2d, ((0, Kp - K), (0, 0)))
    if Cp != cout:
        w2d = jnp.pad(w2d, ((0, 0), (0, Cp - cout)))
        bias = jnp.pad(bias, (0, Cp - cout))
        gamma = jnp.pad(gamma, (0, Cp - cout))
        beta = jnp.pad(beta, (0, Cp - cout))
    w2d = w2d.astype(jnp.bfloat16)
    bias2d = bias.reshape(1, Cp).astype(jnp.float32)

    # --- M tiling sized for the smallest VMEM (v7x) --------------------------
    tile_m = _pick_tile_m(M, Kp, Cp)
    m_pad = _ceil_to(M, tile_m)
    if m_pad != M:
        patches = jnp.pad(patches, ((0, m_pad - M), (0, 0)))

    if use_norm:
        # Pass 1: conv (bias=False when norm) + per-block partial BN stats.
        y, stats = _fused_matmul(patches, w2d, bias2d, tile_m=tile_m,
                                 use_act=False, emit_stats=True,
                                 out_dtype=jnp.float32)
        # Finalize batch statistics over the TRUE M rows (tiny, stays in XLA).
        mean = stats[:, 0, :].sum(axis=0) / M
        var = jnp.maximum(stats[:, 1, :].sum(axis=0) / M - mean * mean, 0.0)
        scale = gamma * lax.rsqrt(var + BN_EPS)
        shift = beta - mean * scale
        # Pass 2: normalize + LeakyReLU, fused, f32 math.
        act = _bn_act_apply(y,
                            scale.reshape(1, Cp).astype(jnp.float32),
                            shift.reshape(1, Cp).astype(jnp.float32),
                            tile_m=tile_m, use_act=use_act, out_dtype=out_dtype)
    else:
        act = _fused_matmul(patches, w2d, bias2d, tile_m=tile_m,
                            use_act=use_act, emit_stats=False,
                            out_dtype=out_dtype)

    return act[:M, :cout].reshape(N, Ho, Wo, cout)


# ---------------------------------------------------------------------------
# PatchDiscriminator: layer configs, deterministic params, forward
# ---------------------------------------------------------------------------
def build_configs(input_c, num_filters=64, n_down=3):
    cfgs = [dict(in_c=input_c, out_c=num_filters, s=2, norm=False, act=True)]
    for i in range(n_down):
        cfgs.append(dict(in_c=num_filters * 2 ** i,
                         out_c=num_filters * 2 ** (i + 1),
                         s=1 if i == n_down - 1 else 2, norm=True, act=True))
    cfgs.append(dict(in_c=num_filters * 2 ** n_down, out_c=1,
                     s=1, norm=False, act=False))
    return cfgs


def init_params(key, cfgs, k=4):
    """Deterministic params.  Conv weights stored as (Cin, kh, kw, Cout)."""
    params = []
    for cfg in cfgs:
        fan_in = cfg['in_c'] * k * k
        key, wk, bk = jax.random.split(key, 3)
        w = jax.random.normal(wk, (cfg['in_c'], k, k, cfg['out_c']),
                              jnp.float32) / jnp.sqrt(float(fan_in))
        if cfg['norm']:
            b = jnp.zeros((cfg['out_c'],), jnp.float32)    # Conv2d(bias=False) when norm
        else:
            b = 0.01 * jax.random.normal(bk, (cfg['out_c'],), jnp.float32)
        g = jnp.ones((cfg['out_c'],), jnp.float32)          # BN weight init
        beta = jnp.zeros((cfg['out_c'],), jnp.float32)      # BN bias init
        params.append((w, b, g, beta))
    return params


def patch_discriminator_forward(x_nchw, params, cfgs):
    x = jnp.transpose(x_nchw, (0, 2, 3, 1))                 # NCHW -> NHWC
    n_layers = len(cfgs)
    for li, ((w, b, g, beta), cfg) in enumerate(zip(params, cfgs)):
        last = li == n_layers - 1
        x = _conv_layer(x, w, b, g, beta,
                        stride=cfg['s'], use_norm=cfg['norm'], use_act=cfg['act'],
                        out_dtype=jnp.float32 if last else jnp.bfloat16)
    return jnp.transpose(x.astype(jnp.float32), (0, 3, 1, 2))   # NHWC -> NCHW


if __name__ == "__main__":
    key = jax.random.PRNGKey(0)
    input_c, num_filters, n_down = 4, 8, 3
    N, H, W = 2, 32, 32               # spatial 32 so all 5 convs produce valid sizes

    cfgs = build_configs(input_c, num_filters, n_down)
    key, pkey, xkey = jax.random.split(key, 3)
    params = init_params(pkey, cfgs)
    x = jax.random.normal(xkey, (N, input_c, H, W), jnp.float32)

    fwd = jax.jit(lambda xx: patch_discriminator_forward(xx, params, cfgs))
    out = fwd(x)
    jax.block_until_ready(out)
    assert out.shape == (N, 1, 2, 2), out.shape
    assert bool(jnp.all(jnp.isfinite(out))), "non-finite output"
    print("KERNEL_OK")
</pallas_src>

<mosaic_0001>
module attributes {stable_mosaic.version = 11 : i64} {
  func.func @_matmul_kernel(%arg0: i32, %arg1: memref<512x128xbf16, #tpu.memory_space<vmem>>, %arg2: memref<128x128xbf16, #tpu.memory_space<vmem>>, %arg3: memref<1x128xf32, #tpu.memory_space<vmem>>, %arg4: memref<512x128xbf16, #tpu.memory_space<vmem>>) attributes {dimension_semantics = [#tpu.dimension_semantics<parallel>], iteration_bounds = array<i64: 1>, scalar_prefetch = 0 : i64, scratch_operands = 0 : i64, tpu.core_type = #tpu.core_type<tc>, window_params = [{transform_indices = @transform_0, window_bounds = array<i64: 512, 128>}, {pipeline_mode = #tpu.pipeline_mode<synchronous>, transform_indices = @transform_1, window_bounds = array<i64: 128, 128>}, {pipeline_mode = #tpu.pipeline_mode<synchronous>, transform_indices = @transform_2, window_bounds = array<i64: 1, 128>}, {transform_indices = @transform_3, window_bounds = array<i64: 512, 128>}]} {
    %c0 = arith.constant 0 : index
    %c0_0 = arith.constant 0 : index
    %0 = vector.load %arg1[%c0, %c0_0] : memref<512x128xbf16, #tpu.memory_space<vmem>>, vector<512x128xbf16>
    %c0_1 = arith.constant 0 : index
    %c0_2 = arith.constant 0 : index
    %1 = vector.load %arg2[%c0_1, %c0_2] : memref<128x128xbf16, #tpu.memory_space<vmem>>, vector<128x128xbf16>
    %cst = arith.constant dense<0.000000e+00> : vector<512x128xf32>
    %2 = tpu.matmul %0, %1, %cst {dimension_numbers = #tpu.dot_dimension_numbers<[1], [0], [0], [1], [0, 0, 1, 1], [], []>} : vector<512x128xbf16>, vector<128x128xbf16>, vector<512x128xf32> -> vector<512x128xf32>
    %c0_3 = arith.constant 0 : index
    %c0_4 = arith.constant 0 : index
    %3 = vector.load %arg3[%c0_3, %c0_4] : memref<1x128xf32, #tpu.memory_space<vmem>>, vector<1x128xf32>
    %4 = vector.broadcast %3 : vector<1x128xf32> to vector<512x128xf32>
    %5 = arith.addf %2, %4 : vector<512x128xf32>
    %cst_5 = arith.constant 0.000000e+00 : f32
    %6 = vector.broadcast %cst_5 : f32 to vector<512x128xf32>
    %7 = arith.cmpf ogt, %5, %6 : vector<512x128xf32>
    %cst_6 = arith.constant 2.000000e-01 : f32
    %8 = vector.broadcast %cst_6 : f32 to vector<512x128xf32>
    %9 = arith.mulf %8, %5 : vector<512x128xf32>
    %10 = arith.select %7, %5, %9 : vector<512x128xi1>, vector<512x128xf32>
    %11 = arith.truncf %10 : vector<512x128xf32> to vector<512x128xbf16>
    %c0_7 = arith.constant 0 : index
    %c0_8 = arith.constant 0 : index
    %12 = vector.load %arg4[%c0_7, %c0_8] : memref<512x128xbf16, #tpu.memory_space<vmem>>, vector<512x128xbf16>
    tpu.vector_store %arg4[%c0_7, %c0_8], %11 {strides = array<i32>} : memref<512x128xbf16, #tpu.memory_space<vmem>>, vector<512x128xbf16>,
    return
  }
  func.func @transform_0(%arg0: i32) -> (i32, i32) {
    %c0_i32 = arith.constant 0 : i32
    %c0_i32_0 = arith.constant 0 : i32
    return %arg0, %c0_i32 : i32, i32
  }
  func.func @transform_1(%arg0: i32) -> (i32, i32) {
    %c0_i32 = arith.constant 0 : i32
    %c0_i32_0 = arith.constant 0 : i32
    %c0_i32_1 = arith.constant 0 : i32
    return %c0_i32, %c0_i32_0 : i32, i32
  }
  func.func @transform_2(%arg0: i32) -> (i32, i32) {
    %c0_i32 = arith.constant 0 : i32
    %c0_i32_0 = arith.constant 0 : i32
    %c0_i32_1 = arith.constant 0 : i32
    return %c0_i32, %c0_i32_0 : i32, i32
  }
  func.func @transform_3(%arg0: i32) -> (i32, i32) {
    %c0_i32 = arith.constant 0 : i32
    %c0_i32_0 = arith.constant 0 : i32
    return %arg0, %c0_i32 : i32, i32
  }
}

module attributes {stable_mosaic.version = 11 : i64} {
  func.func @_matmul_kernel(%arg0: i32, %arg1: memref<128x128xbf16, #tpu.memory_space<vmem>>, %arg2: memref<128x128xbf16, #tpu.memory_space<vmem>>, %arg3: memref<1x128xf32, #tpu.memory_space<vmem>>, %arg4: memref<128x128xf32, #tpu.memory_space<vmem>>, %arg5: memref<1x8x128xf32, #tpu.memory_space<vmem>>) attributes {dimension_semantics = [#tpu.dimension_semantics<parallel>], iteration_bounds = array<i64: 1>, scalar_prefetch = 0 : i64, scratch_operands = 0 : i64, tpu.core_type = #tpu.core_type<tc>, window_params = [{transform_indices = @transform_0, window_bounds = array<i64: 128, 128>}, {pipeline_mode = #tpu.pipeline_mode<synchronous>, transform_indices = @transform_1, window_bounds = array<i64: 128, 128>}, {pipeline_mode = #tpu.pipeline_mode<synchronous>, transform_indices = @transform_2, window_bounds = array<i64: 1, 128>}, {transform_indices = @transform_3, window_bounds = array<i64: 128, 128>}, {transform_indices = @transform_4, window_bounds = array<i64: 1, 8, 128>}]} {
    %c0 = arith.constant 0 : index
    %c0_0 = arith.constant 0 : index
    %0 = vector.load %arg1[%c0, %c0_0] : memref<128x128xbf16, #tpu.memory_space<vmem>>, vector<128x128xbf16>
    %c0_1 = arith.constant 0 : index
    %c0_2 = arith.constant 0 : index
    %1 = vector.load %arg2[%c0_1, %c0_2] : memref<128x128xbf16, #tpu.memory_space<vmem>>, vector<128x128xbf16>
    %cst = arith.constant dense<0.000000e+00> : vector<128x128xf32>
    %2 = tpu.matmul %0, %1, %cst {dimension_numbers = #tpu.dot_dimension_numbers<[1], [0], [0], [1], [0, 0, 1, 1], [], []>} : vector<128x128xbf16>, vector<128x128xbf16>, vector<128x128xf32> -> vector<128x128xf32>
    %c0_3 = arith.constant 0 : index
    %c0_4 = arith.constant 0 : index
    %3 = vector.load %arg3[%c0_3, %c0_4] : memref<1x128xf32, #tpu.memory_space<vmem>>, vector<1x128xf32>
    %4 = vector.broadcast %3 : vector<1x128xf32> to vector<128x128xf32>
    %5 = arith.addf %2, %4 : vector<128x128xf32>
    %cst_5 = arith.constant dense<0.000000e+00> : vector<128xf32>
    %6 = vector.multi_reduction <add>, %5, %cst_5 [0] : vector<128x128xf32> to vector<128xf32>
    %7 = vector.shape_cast %6 : vector<128xf32> to vector<1x128xf32>
    %8 = arith.mulf %5, %5 : vector<128x128xf32>
    %cst_6 = arith.constant dense<0.000000e+00> : vector<128xf32>
    %9 = vector.multi_reduction <add>, %8, %cst_6 [0] : vector<128x128xf32> to vector<128xf32>
    %10 = vector.shape_cast %9 : vector<128xf32> to vector<1x128xf32>
    %cst_7 = arith.constant 0.000000e+00 : f32
    %11 = vector.broadcast %cst_7 : f32 to vector<6x128xf32>
    %12 = tpu.concatenate %7, %10, %11 in 0 : vector<1x128xf32>, vector<1x128xf32>, vector<6x128xf32> -> vector<8x128xf32>
    %13 = vector.shape_cast %12 : vector<8x128xf32> to vector<1x8x128xf32>
    %c0_8 = arith.constant 0 : index
    %c0_9 = arith.constant 0 : index
    %c0_10 = arith.constant 0 : index
    %14 = vector.load %arg5[%c0_8, %c0_9, %c0_10] : memref<1x8x128xf32, #tpu.memory_space<vmem>>, vector<1x8x128xf32>
    tpu.vector_store %arg5[%c0_8, %c0_9, %c0_10], %13 {strides = array<i32>} : memref<1x8x128xf32, #tpu.memory_space<vmem>>, vector<1x8x128xf32>,
    %c0_11 = arith.constant 0 : index
    %c0_12 = arith.constant 0 : index
    %15 = vector.load %arg4[%c0_11, %c0_12] : memref<128x128xf32, #tpu.memory_space<vmem>>, vector<128x128xf32>
    tpu.vector_store %arg4[%c0_11, %c0_12], %5 {strides = array<i32>} : memref<128x128xf32, #tpu.memory_space<vmem>>, vector<128x128xf32>,
    return
  }
  func.func @transform_0(%arg0: i32) -> (i32, i32) {
    %c0_i32 = arith.constant 0 : i32
    %c0_i32_0 = arith.constant 0 : i32
    return %arg0, %c0_i32 : i32, i32
  }
  func.func @transform_1(%arg0: i32) -> (i32, i32) {
    %c0_i32 = arith.constant 0 : i32
    %c0_i32_0 = arith.constant 0 : i32
    %c0_i32_1 = arith.constant 0 : i32
    return %c0_i32, %c0_i32_0 : i32, i32
  }
  func.func @transform_2(%arg0: i32) -> (i32, i32) {
    %c0_i32 = arith.constant 0 : i32
    %c0_i32_0 = arith.constant 0 : i32
    %c0_i32_1 = arith.constant 0 : i32
    return %c0_i32, %c0_i32_0 : i32, i32
  }
  func.func @transform_3(%arg0: i32) -> (i32, i32) {
    %c0_i32 = arith.constant 0 : i32
    %c0_i32_0 = arith.constant 0 : i32
    return %arg0, %c0_i32 : i32, i32
  }
  func.func @transform_4(%arg0: i32) -> (i32, i32, i32) {
    %c0_i32 = arith.constant 0 : i32
    %c0_i32_0 = arith.constant 0 : i32
    %c0_i32_1 = arith.constant 0 : i32
    return %arg0, %c0_i32, %c0_i32_0 : i32, i32, i32
  }
}

module attributes {stable_mosaic.version = 11 : i64} {
  func.func @_bn_act_kernel(%arg0: i32, %arg1: memref<128x128xf32, #tpu.memory_space<vmem>>, %arg2: memref<1x128xf32, #tpu.memory_space<vmem>>, %arg3: memref<1x128xf32, #tpu.memory_space<vmem>>, %arg4: memref<128x128xbf16, #tpu.memory_space<vmem>>) attributes {dimension_semantics = [#tpu.dimension_semantics<parallel>], iteration_bounds = array<i64: 1>, scalar_prefetch = 0 : i64, scratch_operands = 0 : i64, tpu.core_type = #tpu.core_type<tc>, window_params = [{transform_indices = @transform_0, window_bounds = array<i64: 128, 128>}, {pipeline_mode = #tpu.pipeline_mode<synchronous>, transform_indices = @transform_1, window_bounds = array<i64: 1, 128>}, {pipeline_mode = #tpu.pipeline_mode<synchronous>, transform_indices = @transform_2, window_bounds = array<i64: 1, 128>}, {transform_indices = @transform_3, window_bounds = array<i64: 128, 128>}]} {
    %c0 = arith.constant 0 : index
    %c0_0 = arith.constant 0 : index
    %0 = vector.load %arg1[%c0, %c0_0] : memref<128x128xf32, #tpu.memory_space<vmem>>, vector<128x128xf32>
    %c0_1 = arith.constant 0 : index
    %c0_2 = arith.constant 0 : index
    %1 = vector.load %arg2[%c0_1, %c0_2] : memref<1x128xf32, #tpu.memory_space<vmem>>, vector<1x128xf32>
    %2 = vector.broadcast %1 : vector<1x128xf32> to vector<128x128xf32>
    %3 = arith.mulf %0, %2 : vector<128x128xf32>
    %c0_3 = arith.constant 0 : index
    %c0_4 = arith.constant 0 : index
    %4 = vector.load %arg3[%c0_3, %c0_4] : memref<1x128xf32, #tpu.memory_space<vmem>>, vector<1x128xf32>
    %5 = vector.broadcast %4 : vector<1x128xf32> to vector<128x128xf32>
    %6 = arith.addf %3, %5 : vector<128x128xf32>
    %cst = arith.constant 0.000000e+00 : f32
    %7 = vector.broadcast %cst : f32 to vector<128x128xf32>
    %8 = arith.cmpf ogt, %6, %7 : vector<128x128xf32>
    %cst_5 = arith.constant 2.000000e-01 : f32
    %9 = vector.broadcast %cst_5 : f32 to vector<128x128xf32>
    %10 = arith.mulf %9, %6 : vector<128x128xf32>
    %11 = arith.select %8, %6, %10 : vector<128x128xi1>, vector<128x128xf32>
    %12 = arith.truncf %11 : vector<128x128xf32> to vector<128x128xbf16>
    %c0_6 = arith.constant 0 : index
    %c0_7 = arith.constant 0 : index
    %13 = vector.load %arg4[%c0_6, %c0_7] : memref<128x128xbf16, #tpu.memory_space<vmem>>, vector<128x128xbf16>
    tpu.vector_store %arg4[%c0_6, %c0_7], %12 {strides = array<i32>} : memref<128x128xbf16, #tpu.memory_space<vmem>>, vector<128x128xbf16>,
    return
  }
  func.func @transform_0(%arg0: i32) -> (i32, i32) {
    %c0_i32 = arith.constant 0 : i32
    %c0_i32_0 = arith.constant 0 : i32
    return %arg0, %c0_i32 : i32, i32
  }
  func.func @transform_1(%arg0: i32) -> (i32, i32) {
    %c0_i32 = arith.constant 0 : i32
    %c0_i32_0 = arith.constant 0 : i32
    %c0_i32_1 = arith.constant 0 : i32
    return %c0_i32, %c0_i32_0 : i32, i32
  }
  func.func @transform_2(%arg0: i32) -> (i32, i32) {
    %c0_i32 = arith.constant 0 : i32
    %c0_i32_0 = arith.constant 0 : i32
    %c0_i32_1 = arith.constant 0 : i32
    return %c0_i32, %c0_i32_0 : i32, i32
  }
  func.func @transform_3(%arg0: i32) -> (i32, i32) {
    %c0_i32 = arith.constant 0 : i32
    %c0_i32_0 = arith.constant 0 : i32
    return %arg0, %c0_i32 : i32, i32
  }
}

module attributes {stable_mosaic.version = 11 : i64} {
  func.func @_matmul_kernel(%arg0: i32, %arg1: memref<32x256xbf16, #tpu.memory_space<vmem>>, %arg2: memref<256x128xbf16, #tpu.memory_space<vmem>>, %arg3: memref<1x128xf32, #tpu.memory_space<vmem>>, %arg4: memref<32x128xf32, #tpu.memory_space<vmem>>, %arg5: memref<1x8x128xf32, #tpu.memory_space<vmem>>) attributes {dimension_semantics = [#tpu.dimension_semantics<parallel>], iteration_bounds = array<i64: 1>, scalar_prefetch = 0 : i64, scratch_operands = 0 : i64, tpu.core_type = #tpu.core_type<tc>, window_params = [{transform_indices = @transform_0, window_bounds = array<i64: 32, 256>}, {pipeline_mode = #tpu.pipeline_mode<synchronous>, transform_indices = @transform_1, window_bounds = array<i64: 256, 128>}, {pipeline_mode = #tpu.pipeline_mode<synchronous>, transform_indices = @transform_2, window_bounds = array<i64: 1, 128>}, {transform_indices = @transform_3, window_bounds = array<i64: 32, 128>}, {transform_indices = @transform_4, window_bounds = array<i64: 1, 8, 128>}]} {
    %c0 = arith.constant 0 : index
    %c0_0 = arith.constant 0 : index
    %0 = vector.load %arg1[%c0, %c0_0] : memref<32x256xbf16, #tpu.memory_space<vmem>>, vector<32x256xbf16>
    %c0_1 = arith.constant 0 : index
    %c0_2 = arith.constant 0 : index
    %1 = vector.load %arg2[%c0_1, %c0_2] : memref<256x128xbf16, #tpu.memory_space<vmem>>, vector<256x128xbf16>
    %cst = arith.constant dense<0.000000e+00> : vector<32x128xf32>
    %2 = tpu.matmul %0, %1, %cst {dimension_numbers = #tpu.dot_dimension_numbers<[1], [0], [0], [1], [0, 0, 1, 1], [], []>} : vector<32x256xbf16>, vector<256x128xbf16>, vector<32x128xf32> -> vector<32x128xf32>
    %c0_3 = arith.constant 0 : index
    %c0_4 = arith.constant 0 : index
    %3 = vector.load %arg3[%c0_3, %c0_4] : memref<1x128xf32, #tpu.memory_space<vmem>>, vector<1x128xf32>
    %4 = vector.broadcast %3 : vector<1x128xf32> to vector<32x128xf32>
    %5 = arith.addf %2, %4 : vector<32x128xf32>
    %cst_5 = arith.constant dense<0.000000e+00> : vector<128xf32>
    %6 = vector.multi_reduction <add>, %5, %cst_5 [0] : vector<32x128xf32> to vector<128xf32>
    %7 = vector.shape_cast %6 : vector<128xf32> to vector<1x128xf32>
    %8 = arith.mulf %5, %5 : vector<32x128xf32>
    %cst_6 = arith.constant dense<0.000000e+00> : vector<128xf32>
    %9 = vector.multi_reduction <add>, %8, %cst_6 [0] : vector<32x128xf32> to vector<128xf32>
    %10 = vector.shape_cast %9 : vector<128xf32> to vector<1x128xf32>
    %cst_7 = arith.constant 0.000000e+00 : f32
    %11 = vector.broadcast %cst_7 : f32 to vector<6x128xf32>
    %12 = tpu.concatenate %7, %10, %11 in 0 : vector<1x128xf32>, vector<1x128xf32>, vector<6x128xf32> -> vector<8x128xf32>
    %13 = vector.shape_cast %12 : vector<8x128xf32> to vector<1x8x128xf32>
    %c0_8 = arith.constant 0 : index
    %c0_9 = arith.constant 0 : index
    %c0_10 = arith.constant 0 : index
    %14 = vector.load %arg5[%c0_8, %c0_9, %c0_10] : memref<1x8x128xf32, #tpu.memory_space<vmem>>, vector<1x8x128xf32>
    tpu.vector_store %arg5[%c0_8, %c0_9, %c0_10], %13 {strides = array<i32>} : memref<1x8x128xf32, #tpu.memory_space<vmem>>, vector<1x8x128xf32>,
    %c0_11 = arith.constant 0 : index
    %c0_12 = arith.constant 0 : index
    %15 = vector.load %arg4[%c0_11, %c0_12] : memref<32x128xf32, #tpu.memory_space<vmem>>, vector<32x128xf32>
    tpu.vector_store %arg4[%c0_11, %c0_12], %5 {strides = array<i32>} : memref<32x128xf32, #tpu.memory_space<vmem>>, vector<32x128xf32>,
    return
  }
  func.func @transform_0(%arg0: i32) -> (i32, i32) {
    %c0_i32 = arith.constant 0 : i32
    %c0_i32_0 = arith.constant 0 : i32
    return %arg0, %c0_i32 : i32, i32
  }
  func.func @transform_1(%arg0: i32) -> (i32, i32) {
    %c0_i32 = arith.constant 0 : i32
    %c0_i32_0 = arith.constant 0 : i32
    %c0_i32_1 = arith.constant 0 : i32
    return %c0_i32, %c0_i32_0 : i32, i32
  }
  func.func @transform_2(%arg0: i32) -> (i32, i32) {
    %c0_i32 = arith.constant 0 : i32
    %c0_i32_0 = arith.constant 0 : i32
    %c0_i32_1 = arith.constant 0 : i32
    return %c0_i32, %c0_i32_0 : i32, i32
  }
  func.func @transform_3(%arg0: i32) -> (i32, i32) {
    %c0_i32 = arith.constant 0 : i32
    %c0_i32_0 = arith.constant 0 : i32
    return %arg0, %c0_i32 : i32, i32
  }
  func.func @transform_4(%arg0: i32) -> (i32, i32, i32) {
    %c0_i32 = arith.constant 0 : i32
    %c0_i32_0 = arith.constant 0 : i32
    %c0_i32_1 = arith.constant 0 : i32
    return %arg0, %c0_i32, %c0_i32_0 : i32, i32, i32
  }
}

module attributes {stable_mosaic.version = 11 : i64} {
  func.func @_bn_act_kernel(%arg0: i32, %arg1: memref<32x128xf32, #tpu.memory_space<vmem>>, %arg2: memref<1x128xf32, #tpu.memory_space<vmem>>, %arg3: memref<1x128xf32, #tpu.memory_space<vmem>>, %arg4: memref<32x128xbf16, #tpu.memory_space<vmem>>) attributes {dimension_semantics = [#tpu.dimension_semantics<parallel>], iteration_bounds = array<i64: 1>, scalar_prefetch = 0 : i64, scratch_operands = 0 : i64, tpu.core_type = #tpu.core_type<tc>, window_params = [{transform_indices = @transform_0, window_bounds = array<i64: 32, 128>}, {pipeline_mode = #tpu.pipeline_mode<synchronous>, transform_indices = @transform_1, window_bounds = array<i64: 1, 128>}, {pipeline_mode = #tpu.pipeline_mode<synchronous>, transform_indices = @transform_2, window_bounds = array<i64: 1, 128>}, {transform_indices = @transform_3, window_bounds = array<i64: 32, 128>}]} {
    %c0 = arith.constant 0 : index
    %c0_0 = arith.constant 0 : index
    %0 = vector.load %arg1[%c0, %c0_0] : memref<32x128xf32, #tpu.memory_space<vmem>>, vector<32x128xf32>
    %c0_1 = arith.constant 0 : index
    %c0_2 = arith.constant 0 : index
    %1 = vector.load %arg2[%c0_1, %c0_2] : memref<1x128xf32, #tpu.memory_space<vmem>>, vector<1x128xf32>
    %2 = vector.broadcast %1 : vector<1x128xf32> to vector<32x128xf32>
    %3 = arith.mulf %0, %2 : vector<32x128xf32>
    %c0_3 = arith.constant 0 : index
    %c0_4 = arith.constant 0 : index
    %4 = vector.load %arg3[%c0_3, %c0_4] : memref<1x128xf32, #tpu.memory_space<vmem>>, vector<1x128xf32>
    %5 = vector.broadcast %4 : vector<1x128xf32> to vector<32x128xf32>
    %6 = arith.addf %3, %5 : vector<32x128xf32>
    %cst = arith.constant 0.000000e+00 : f32
    %7 = vector.broadcast %cst : f32 to vector<32x128xf32>
    %8 = arith.cmpf ogt, %6, %7 : vector<32x128xf32>
    %cst_5 = arith.constant 2.000000e-01 : f32
    %9 = vector.broadcast %cst_5 : f32 to vector<32x128xf32>
    %10 = arith.mulf %9, %6 : vector<32x128xf32>
    %11 = arith.select %8, %6, %10 : vector<32x128xi1>, vector<32x128xf32>
    %12 = arith.truncf %11 : vector<32x128xf32> to vector<32x128xbf16>
    %c0_6 = arith.constant 0 : index
    %c0_7 = arith.constant 0 : index
    %13 = vector.load %arg4[%c0_6, %c0_7] : memref<32x128xbf16, #tpu.memory_space<vmem>>, vector<32x128xbf16>
    tpu.vector_store %arg4[%c0_6, %c0_7], %12 {strides = array<i32>} : memref<32x128xbf16, #tpu.memory_space<vmem>>, vector<32x128xbf16>,
    return
  }
  func.func @transform_0(%arg0: i32) -> (i32, i32) {
    %c0_i32 = arith.constant 0 : i32
    %c0_i32_0 = arith.constant 0 : i32
    return %arg0, %c0_i32 : i32, i32
  }
  func.func @transform_1(%arg0: i32) -> (i32, i32) {
    %c0_i32 = arith.constant 0 : i32
    %c0_i32_0 = arith.constant 0 : i32
    %c0_i32_1 = arith.constant 0 : i32
    return %c0_i32, %c0_i32_0 : i32, i32
  }
  func.func @transform_2(%arg0: i32) -> (i32, i32) {
    %c0_i32 = arith.constant 0 : i32
    %c0_i32_0 = arith.constant 0 : i32
    %c0_i32_1 = arith.constant 0 : i32
    return %c0_i32, %c0_i32_0 : i32, i32
  }
  func.func @transform_3(%arg0: i32) -> (i32, i32) {
    %c0_i32 = arith.constant 0 : i32
    %c0_i32_0 = arith.constant 0 : i32
    return %arg0, %c0_i32 : i32, i32
  }
}

module attributes {stable_mosaic.version = 11 : i64} {
  func.func @_matmul_kernel(%arg0: i32, %arg1: memref<24x512xbf16, #tpu.memory_space<vmem>>, %arg2: memref<512x128xbf16, #tpu.memory_space<vmem>>, %arg3: memref<1x128xf32, #tpu.memory_space<vmem>>, %arg4: memref<24x128xf32, #tpu.memory_space<vmem>>, %arg5: memref<1x8x128xf32, #tpu.memory_space<vmem>>) attributes {dimension_semantics = [#tpu.dimension_semantics<parallel>], iteration_bounds = array<i64: 1>, scalar_prefetch = 0 : i64, scratch_operands = 0 : i64, tpu.core_type = #tpu.core_type<tc>, window_params = [{transform_indices = @transform_0, window_bounds = array<i64: 24, 512>}, {pipeline_mode = #tpu.pipeline_mode<synchronous>, transform_indices = @transform_1, window_bounds = array<i64: 512, 128>}, {pipeline_mode = #tpu.pipeline_mode<synchronous>, transform_indices = @transform_2, window_bounds = array<i64: 1, 128>}, {transform_indices = @transform_3, window_bounds = array<i64: 24, 128>}, {transform_indices = @transform_4, window_bounds = array<i64: 1, 8, 128>}]} {
    %c0 = arith.constant 0 : index
    %c0_0 = arith.constant 0 : index
    %0 = vector.load %arg1[%c0, %c0_0] : memref<24x512xbf16, #tpu.memory_space<vmem>>, vector<24x512xbf16>
    %c0_1 = arith.constant 0 : index
    %c0_2 = arith.constant 0 : index
    %1 = vector.load %arg2[%c0_1, %c0_2] : memref<512x128xbf16, #tpu.memory_space<vmem>>, vector<512x128xbf16>
    %cst = arith.constant dense<0.000000e+00> : vector<24x128xf32>
    %2 = tpu.matmul %0, %1, %cst {dimension_numbers = #tpu.dot_dimension_numbers<[1], [0], [0], [1], [0, 0, 1, 1], [], []>} : vector<24x512xbf16>, vector<512x128xbf16>, vector<24x128xf32> -> vector<24x128xf32>
    %c0_3 = arith.constant 0 : index
    %c0_4 = arith.constant 0 : index
    %3 = vector.load %arg3[%c0_3, %c0_4] : memref<1x128xf32, #tpu.memory_space<vmem>>, vector<1x128xf32>
    %4 = vector.broadcast %3 : vector<1x128xf32> to vector<24x128xf32>
    %5 = arith.addf %2, %4 : vector<24x128xf32>
    %cst_5 = arith.constant dense<0.000000e+00> : vector<128xf32>
    %6 = vector.multi_reduction <add>, %5, %cst_5 [0] : vector<24x128xf32> to vector<128xf32>
    %7 = vector.shape_cast %6 : vector<128xf32> to vector<1x128xf32>
    %8 = arith.mulf %5, %5 : vector<24x128xf32>
    %cst_6 = arith.constant dense<0.000000e+00> : vector<128xf32>
    %9 = vector.multi_reduction <add>, %8, %cst_6 [0] : vector<24x128xf32> to vector<128xf32>
    %10 = vector.shape_cast %9 : vector<128xf32> to vector<1x128xf32>
    %cst_7 = arith.constant 0.000000e+00 : f32
    %11 = vector.broadcast %cst_7 : f32 to vector<6x128xf32>
    %12 = tpu.concatenate %7, %10, %11 in 0 : vector<1x128xf32>, vector<1x128xf32>, vector<6x128xf32> -> vector<8x128xf32>
    %13 = vector.shape_cast %12 : vector<8x128xf32> to vector<1x8x128xf32>
    %c0_8 = arith.constant 0 : index
    %c0_9 = arith.constant 0 : index
    %c0_10 = arith.constant 0 : index
    %14 = vector.load %arg5[%c0_8, %c0_9, %c0_10] : memref<1x8x128xf32, #tpu.memory_space<vmem>>, vector<1x8x128xf32>
    tpu.vector_store %arg5[%c0_8, %c0_9, %c0_10], %13 {strides = array<i32>} : memref<1x8x128xf32, #tpu.memory_space<vmem>>, vector<1x8x128xf32>,
    %c0_11 = arith.constant 0 : index
    %c0_12 = arith.constant 0 : index
    %15 = vector.load %arg4[%c0_11, %c0_12] : memref<24x128xf32, #tpu.memory_space<vmem>>, vector<24x128xf32>
    tpu.vector_store %arg4[%c0_11, %c0_12], %5 {strides = array<i32>} : memref<24x128xf32, #tpu.memory_space<vmem>>, vector<24x128xf32>,
    return
  }
  func.func @transform_0(%arg0: i32) -> (i32, i32) {
    %c0_i32 = arith.constant 0 : i32
    %c0_i32_0 = arith.constant 0 : i32
    return %arg0, %c0_i32 : i32, i32
  }
  func.func @transform_1(%arg0: i32) -> (i32, i32) {
    %c0_i32 = arith.constant 0 : i32
    %c0_i32_0 = arith.constant 0 : i32
    %c0_i32_1 = arith.constant 0 : i32
    return %c0_i32, %c0_i32_0 : i32, i32
  }
  func.func @transform_2(%arg0: i32) -> (i32, i32) {
    %c0_i32 = arith.constant 0 : i32
    %c0_i32_0 = arith.constant 0 : i32
    %c0_i32_1 = arith.constant 0 : i32
    return %c0_i32, %c0_i32_0 : i32, i32
  }
  func.func @transform_3(%arg0: i32) -> (i32, i32) {
    %c0_i32 = arith.constant 0 : i32
    %c0_i32_0 = arith.constant 0 : i32
    return %arg0, %c0_i32 : i32, i32
  }
  func.func @transform_4(%arg0: i32) -> (i32, i32, i32) {
    %c0_i32 = arith.constant 0 : i32
    %c0_i32_0 = arith.constant 0 : i32
    %c0_i32_1 = arith.constant 0 : i32
    return %arg0, %c0_i32, %c0_i32_0 : i32, i32, i32
  }
}

module attributes {stable_mosaic.version = 11 : i64} {
  func.func @_bn_act_kernel(%arg0: i32, %arg1: memref<24x128xf32, #tpu.memory_space<vmem>>, %arg2: memref<1x128xf32, #tpu.memory_space<vmem>>, %arg3: memref<1x128xf32, #tpu.memory_space<vmem>>, %arg4: memref<24x128xbf16, #tpu.memory_space<vmem>>) attributes {dimension_semantics = [#tpu.dimension_semantics<parallel>], iteration_bounds = array<i64: 1>, scalar_prefetch = 0 : i64, scratch_operands = 0 : i64, tpu.core_type = #tpu.core_type<tc>, window_params = [{transform_indices = @transform_0, window_bounds = array<i64: 24, 128>}, {pipeline_mode = #tpu.pipeline_mode<synchronous>, transform_indices = @transform_1, window_bounds = array<i64: 1, 128>}, {pipeline_mode = #tpu.pipeline_mode<synchronous>, transform_indices = @transform_2, window_bounds = array<i64: 1, 128>}, {transform_indices = @transform_3, window_bounds = array<i64: 24, 128>}]} {
    %c0 = arith.constant 0 : index
    %c0_0 = arith.constant 0 : index
    %0 = vector.load %arg1[%c0, %c0_0] : memref<24x128xf32, #tpu.memory_space<vmem>>, vector<24x128xf32>
    %c0_1 = arith.constant 0 : index
    %c0_2 = arith.constant 0 : index
    %1 = vector.load %arg2[%c0_1, %c0_2] : memref<1x128xf32, #tpu.memory_space<vmem>>, vector<1x128xf32>
    %2 = vector.broadcast %1 : vector<1x128xf32> to vector<24x128xf32>
    %3 = arith.mulf %0, %2 : vector<24x128xf32>
    %c0_3 = arith.constant 0 : index
    %c0_4 = arith.constant 0 : index
    %4 = vector.load %arg3[%c0_3, %c0_4] : memref<1x128xf32, #tpu.memory_space<vmem>>, vector<1x128xf32>
    %5 = vector.broadcast %4 : vector<1x128xf32> to vector<24x128xf32>
    %6 = arith.addf %3, %5 : vector<24x128xf32>
    %cst = arith.constant 0.000000e+00 : f32
    %7 = vector.broadcast %cst : f32 to vector<24x128xf32>
    %8 = arith.cmpf ogt, %6, %7 : vector<24x128xf32>
    %cst_5 = arith.constant 2.000000e-01 : f32
    %9 = vector.broadcast %cst_5 : f32 to vector<24x128xf32>
    %10 = arith.mulf %9, %6 : vector<24x128xf32>
    %11 = arith.select %8, %6, %10 : vector<24x128xi1>, vector<24x128xf32>
    %12 = arith.truncf %11 : vector<24x128xf32> to vector<24x128xbf16>
    %c0_6 = arith.constant 0 : index
    %c0_7 = arith.constant 0 : index
    %13 = vector.load %arg4[%c0_6, %c0_7] : memref<24x128xbf16, #tpu.memory_space<vmem>>, vector<24x128xbf16>
    tpu.vector_store %arg4[%c0_6, %c0_7], %12 {strides = array<i32>} : memref<24x128xbf16, #tpu.memory_space<vmem>>, vector<24x128xbf16>,
    return
  }
  func.func @transform_0(%arg0: i32) -> (i32, i32) {
    %c0_i32 = arith.constant 0 : i32
    %c0_i32_0 = arith.constant 0 : i32
    return %arg0, %c0_i32 : i32, i32
  }
  func.func @transform_1(%arg0: i32) -> (i32, i32) {
    %c0_i32 = arith.constant 0 : i32
    %c0_i32_0 = arith.constant 0 : i32
    %c0_i32_1 = arith.constant 0 : i32
    return %c0_i32, %c0_i32_0 : i32, i32
  }
  func.func @transform_2(%arg0: i32) -> (i32, i32) {
    %c0_i32 = arith.constant 0 : i32
    %c0_i32_0 = arith.constant 0 : i32
    %c0_i32_1 = arith.constant 0 : i32
    return %c0_i32, %c0_i32_0 : i32, i32
  }
  func.func @transform_3(%arg0: i32) -> (i32, i32) {
    %c0_i32 = arith.constant 0 : i32
    %c0_i32_0 = arith.constant 0 : i32
    return %arg0, %c0_i32 : i32, i32
  }
}

module attributes {stable_mosaic.version = 11 : i64} {
  func.func @_matmul_kernel(%arg0: i32, %arg1: memref<8x1024xbf16, #tpu.memory_space<vmem>>, %arg2: memref<1024x128xbf16, #tpu.memory_space<vmem>>, %arg3: memref<1x128xf32, #tpu.memory_space<vmem>>, %arg4: memref<8x128xf32, #tpu.memory_space<vmem>>) attributes {dimension_semantics = [#tpu.dimension_semantics<parallel>], iteration_bounds = array<i64: 1>, scalar_prefetch = 0 : i64, scratch_operands = 0 : i64, tpu.core_type = #tpu.core_type<tc>, window_params = [{transform_indices = @transform_0, window_bounds = array<i64: 8, 1024>}, {pipeline_mode = #tpu.pipeline_mode<synchronous>, transform_indices = @transform_1, window_bounds = array<i64: 1024, 128>}, {pipeline_mode = #tpu.pipeline_mode<synchronous>, transform_indices = @transform_2, window_bounds = array<i64: 1, 128>}, {transform_indices = @transform_3, window_bounds = array<i64: 8, 128>}]} {
    %c0 = arith.constant 0 : index
    %c0_0 = arith.constant 0 : index
    %0 = vector.load %arg1[%c0, %c0_0] : memref<8x1024xbf16, #tpu.memory_space<vmem>>, vector<8x1024xbf16>
    %c0_1 = arith.constant 0 : index
    %c0_2 = arith.constant 0 : index
    %1 = vector.load %arg2[%c0_1, %c0_2] : memref<1024x128xbf16, #tpu.memory_space<vmem>>, vector<1024x128xbf16>
    %cst = arith.constant dense<0.000000e+00> : vector<8x128xf32>
    %2 = tpu.matmul %0, %1, %cst {dimension_numbers = #tpu.dot_dimension_numbers<[1], [0], [0], [1], [0, 0, 1, 1], [], []>} : vector<8x1024xbf16>, vector<1024x128xbf16>, vector<8x128xf32> -> vector<8x128xf32>
    %c0_3 = arith.constant 0 : index
    %c0_4 = arith.constant 0 : index
    %3 = vector.load %arg3[%c0_3, %c0_4] : memref<1x128xf32, #tpu.memory_space<vmem>>, vector<1x128xf32>
    %4 = vector.broadcast %3 : vector<1x128xf32> to vector<8x128xf32>
    %5 = arith.addf %2, %4 : vector<8x128xf32>
    %c0_5 = arith.constant 0 : index
    %c0_6 = arith.constant 0 : index
    %6 = vector.load %arg4[%c0_5, %c0_6] : memref<8x128xf32, #tpu.memory_space<vmem>>, vector<8x128xf32>
    tpu.vector_store %arg4[%c0_5, %c0_6], %5 {strides = array<i32>} : memref<8x128xf32, #tpu.memory_space<vmem>>, vector<8x128xf32>,
    return
  }
  func.func @transform_0(%arg0: i32) -> (i32, i32) {
    %c0_i32 = arith.constant 0 : i32
    %c0_i32_0 = arith.constant 0 : i32
    return %arg0, %c0_i32 : i32, i32
  }
  func.func @transform_1(%arg0: i32) -> (i32, i32) {
    %c0_i32 = arith.constant 0 : i32
    %c0_i32_0 = arith.constant 0 : i32
    %c0_i32_1 = arith.constant 0 : i32
    return %c0_i32, %c0_i32_0 : i32, i32
  }
  func.func @transform_2(%arg0: i32) -> (i32, i32) {
    %c0_i32 = arith.constant 0 : i32
    %c0_i32_0 = arith.constant 0 : i32
    %c0_i32_1 = arith.constant 0 : i32
    return %c0_i32, %c0_i32_0 : i32, i32
  }
  func.func @transform_3(%arg0: i32) -> (i32, i32) {
    %c0_i32 = arith.constant 0 : i32
    %c0_i32_0 = arith.constant 0 : i32
    return %arg0, %c0_i32 : i32, i32
  }
}

</mosaic_0001>

<bundles_post_ra>
// kernel: reverse
= control target key start
LH: loop header
LB: loop body
LE: loop exit
PB: predicated region body
PF: predicated region fallthrough
CT: control target
= control target key end

     0   :  { %s14345_s0 = inlined_call_operand.vmem [shape: bf16[4,4,64,1024], index: 0, kind: input, shape index: {}]   ;;  %s14346_s1 = inlined_call_operand.vmem [shape: bf16[4,4,64,1024], index: 1, kind: output, shape index: {}]  }
   0x1   :  { %v10751_v0 = vld [vmem:[%s14345_s0 + $0xf00] sm:$0xff] }
   0x2   :  { %v10752_v1 = vld [vmem:[%s14345_s0 + $0xb00] sm:$0xff]  ;;  %7300 = vst [vmem:[%s14346_s1] sm:$0xff] %v10751_v0 }
   0x3   :  { %v10753_v2 = vld [vmem:[%s14345_s0 + $0x700] sm:$0xff]  ;;  %7306 = vst [vmem:[%s14346_s1 + $0x400] sm:$0xff] %v10752_v1 }
   0x4   :  { %v10754_v3 = vld [vmem:[%s14345_s0 + $0x300] sm:$0xff]  ;;  %7312 = vst [vmem:[%s14346_s1 + $0x800] sm:$0xff] %v10753_v2 }
   0x5   :  { %v10755_v4 = vld [vmem:[%s14345_s0 + $0xe00] sm:$0xff]  ;;  %7318 = vst [vmem:[%s14346_s1 + $0xc00] sm:$0xff] %v10754_v3 }
   0x6   :  { %v10756_v5 = vld [vmem:[%s14345_s0 + $0xa00] sm:$0xff]  ;;  %7324 = vst [vmem:[%s14346_s1 + $0x100] sm:$0xff] %v10755_v4 }
   0x7   :  { %v10757_v6 = vld [vmem:[%s14345_s0 + $0x600] sm:$0xff]  ;;  %7330 = vst [vmem:[%s14346_s1 + $0x500] sm:$0xff] %v10756_v5 }
   0x8   :  { %v10758_v7 = vld [vmem:[%s14345_s0 + $0x200] sm:$0xff]  ;;  %7336 = vst [vmem:[%s14346_s1 + $0x900] sm:$0xff] %v10757_v6 }
   0x9   :  { %v10759_v8 = vld [vmem:[%s14345_s0 + $0xd00] sm:$0xff]  ;;  %7342 = vst [vmem:[%s14346_s1 + $0xd00] sm:$0xff] %v10758_v7 }
   0xa   :  { %v10760_v9 = vld [vmem:[%s14345_s0 + $0x900] sm:$0xff]  ;;  %7348 = vst [vmem:[%s14346_s1 + $0x200] sm:$0xff] %v10759_v8 }
   0xb   :  { %v10761_v10 = vld [vmem:[%s14345_s0 + $0x500] sm:$0xff]  ;;  %7354 = vst [vmem:[%s14346_s1 + $0x600] sm:$0xff] %v10760_v9 }
   0xc   :  { %v10762_v11 = vld [vmem:[%s14345_s0 + $0x100] sm:$0xff]  ;;  %7360 = vst [vmem:[%s14346_s1 + $0xa00] sm:$0xff] %v10761_v10 }
   0xd   :  { %v10763_v12 = vld [vmem:[%s14345_s0 + $0xc00] sm:$0xff]  ;;  %7366 = vst [vmem:[%s14346_s1 + $0xe00] sm:$0xff] %v10762_v11 }
   0xe   :  { %v10764_v13 = vld [vmem:[%s14345_s0 + $0x800] sm:$0xff]  ;;  %7372 = vst [vmem:[%s14346_s1 + $0x300] sm:$0xff] %v10763_v12 }
   0xf   :  { %v10765_v14 = vld [vmem:[%s14345_s0 + $0x400] sm:$0xff]  ;;  %7378 = vst [vmem:[%s14346_s1 + $0x700] sm:$0xff] %v10764_v13 }
  0x10   :  { %v10766_v15 = vld [vmem:[%s14345_s0] sm:$0xff]  ;;  %7384 = vst [vmem:[%s14346_s1 + $0xb00] sm:$0xff] %v10765_v14 }
  0x11   :  { %v10767_v16 = vld [vmem:[%s14345_s0 + $0xf20] sm:$0xff]  ;;  %7390 = vst [vmem:[%s14346_s1 + $0xf00] sm:$0xff] %v10766_v15 }
  0x12   :  { %v10768_v17 = vld [vmem:[%s14345_s0 + $0xb20] sm:$0xff]  ;;  %7396 = vst [vmem:[%s14346_s1 + $0x20] sm:$0xff] %v10767_v16 }
  0x13   :  { %v10769_v18 = vld [vmem:[%s14345_s0 + $0x720] sm:$0xff]  ;;  %7402 = vst [vmem:[%s14346_s1 + $0x420] sm:$0xff] %v10768_v17 }
  0x14   :  { %v10770_v19 = vld [vmem:[%s14345_s0 + $0x320] sm:$0xff]  ;;  %7408 = vst [vmem:[%s14346_s1 + $0x820] sm:$0xff] %v10769_v18 }
  0x15   :  { %v10771_v20 = vld [vmem:[%s14345_s0 + $0xe20] sm:$0xff]  ;;  %7414 = vst [vmem:[%s14346_s1 + $0xc20] sm:$0xff] %v10770_v19 }
  0x16   :  { %v10772_v21 = vld [vmem:[%s14345_s0 + $0xa20] sm:$0xff]  ;;  %7420 = vst [vmem:[%s14346_s1 + $0x120] sm:$0xff] %v10771_v20 }
  0x17   :  { %v10773_v22 = vld [vmem:[%s14345_s0 + $0x620] sm:$0xff]  ;;  %7426 = vst [vmem:[%s14346_s1 + $0x520] sm:$0xff] %v10772_v21 }
  0x18   :  { %v10774_v23 = vld [vmem:[%s14345_s0 + $0x220] sm:$0xff]  ;;  %7432 = vst [vmem:[%s14346_s1 + $0x920] sm:$0xff] %v10773_v22 }
  0x19   :  { %v10775_v24 = vld [vmem:[%s14345_s0 + $0xd20] sm:$0xff]  ;;  %7438 = vst [vmem:[%s14346_s1 + $0xd20] sm:$0xff] %v10774_v23 }
  0x1a   :  { %v10776_v25 = vld [vmem:[%s14345_s0 + $0x920] sm:$0xff]  ;;  %7444 = vst [vmem:[%s14346_s1 + $0x220] sm:$0xff] %v10775_v24 }
  0x1b   :  { %v10777_v26 = vld [vmem:[%s14345_s0 + $0x520] sm:$0xff]  ;;  %7450 = vst [vmem:[%s14346_s1 + $0x620] sm:$0xff] %v10776_v25 }
  0x1c   :  { %v10778_v27 = vld [vmem:[%s14345_s0 + $0x120] sm:$0xff]  ;;  %7456 = vst [vmem:[%s14346_s1 + $0xa20] sm:$0xff] %v10777_v26 }
  0x1d   :  { %v10779_v28 = vld [vmem:[%s14345_s0 + $0xc20] sm:$0xff]  ;;  %7462 = vst [vmem:[%s14346_s1 + $0xe20] sm:$0xff] %v10778_v27 }
  0x1e   :  { %v10780_v29 = vld [vmem:[%s14345_s0 + $0x820] sm:$0xff]  ;;  %7468 = vst [vmem:[%s14346_s1 + $0x320] sm:$0xff] %v10779_v28 }
  0x1f   :  { %v10781_v30 = vld [vmem:[%s14345_s0 + $0x420] sm:$0xff]  ;;  %7474 = vst [vmem:[%s14346_s1 + $0x720] sm:$0xff] %v10780_v29 }
  0x20   :  { %v10782_v31 = vld [vmem:[%s14345_s0 + $0x20] sm:$0xff]  ;;  %7480 = vst [vmem:[%s14346_s1 + $0xb20] sm:$0xff] %v10781_v30 }
  0x21   :  { %v10783_v32 = vld [vmem:[%s14345_s0 + $0xf40] sm:$0xff]  ;;  %7486 = vst [vmem:[%s14346_s1 + $0xf20] sm:$0xff] %v10782_v31 }
  0x22   :  { %v10784_v33 = vld [vmem:[%s14345_s0 + $0xb40] sm:$0xff]  ;;  %7492 = vst [vmem:[%s14346_s1 + $0x40] sm:$0xff] %v10783_v32 }
  0x23   :  { %v10785_v34 = vld [vmem:[%s14345_s0 + $0x740] sm:$0xff]  ;;  %7498 = vst [vmem:[%s14346_s1 + $0x440] sm:$0xff] %v10784_v33 }
  0x24   :  { %v10786_v35 = vld [vmem:[%s14345_s0 + $0x340] sm:$0xff]  ;;  %7504 = vst [vmem:[%s14346_s1 + $0x840] sm:$0xff] %v10785_v34 }
  0x25   :  { %v10787_v36 = vld [vmem:[%s14345_s0 + $0xe40] sm:$0xff]  ;;  %7510 = vst [vmem:[%s14346_s1 + $0xc40] sm:$0xff] %v10786_v35 }
  0x26   :  { %v10788_v37 = vld [vmem:[%s14345_s0 + $0xa40] sm:$0xff]  ;;  %7516 = vst [vmem:[%s14346_s1 + $0x140] sm:$0xff] %v10787_v36 }
  0x27   :  { %v10789_v38 = vld [vmem:[%s14345_s0 + $0x640] sm:$0xff]  ;;  %7522 = vst [vmem:[%s14346_s1 + $0x540] sm:$0xff] %v10788_v37 }
  0x28   :  { %v10790_v39 = vld [vmem:[%s14345_s0 + $0x240] sm:$0xff]  ;;  %7528 = vst [vmem:[%s14346_s1 + $0x940] sm:$0xff] %v10789_v38 }
  0x29   :  { %v10791_v40 = vld [vmem:[%s14345_s0 + $0xd40] sm:$0xff]  ;;  %7534 = vst [vmem:[%s14346_s1 + $0xd40] sm:$0xff] %v10790_v39 }
  0x2a   :  { %v10792_v41 = vld [vmem:[%s14345_s0 + $0x940] sm:$0xff]  ;;  %7540 = vst [vmem:[%s14346_s1 + $0x240] sm:$0xff] %v10791_v40 }
  0x2b   :  { %v10793_v42 = vld [vmem:[%s14345_s0 + $0x540] sm:$0xff]  ;;  %7546 = vst [vmem:[%s14346_s1 + $0x640] sm:$0xff] %v10792_v41 }
  0x2c   :  { %v10794_v43 = vld [vmem:[%s14345_s0 + $0x140] sm:$0xff]  ;;  %7552 = vst [vmem:[%s14346_s1 + $0xa40] sm:$0xff] %v10793_v42 }
  0x2d   :  { %v10795_v44 = vld [vmem:[%s14345_s0 + $0xc40] sm:$0xff]  ;;  %7558 = vst [vmem:[%s14346_s1 + $0xe40] sm:$0xff] %v10794_v43 }
  0x2e   :  { %v10796_v45 = vld [vmem:[%s14345_s0 + $0x840] sm:$0xff]  ;;  %7564 = vst [vmem:[%s14346_s1 + $0x340] sm:$0xff] %v10795_v44 }
  0x2f   :  { %v10797_v46 = vld [vmem:[%s14345_s0 + $0x440] sm:$0xff]  ;;  %7570 = vst [vmem:[%s14346_s1 + $0x740] sm:$0xff] %v10796_v45 }
  0x30   :  { %v10798_v47 = vld [vmem:[%s14345_s0 + $0x40] sm:$0xff]  ;;  %7576 = vst [vmem:[%s14346_s1 + $0xb40] sm:$0xff] %v10797_v46 }
  0x31   :  { %v10799_v48 = vld [vmem:[%s14345_s0 + $0xf60] sm:$0xff]  ;;  %7582 = vst [vmem:[%s14346_s1 + $0xf40] sm:$0xff] %v10798_v47 }
  0x32   :  { %v10800_v49 = vld [vmem:[%s14345_s0 + $0xb60] sm:$0xff]  ;;  %7588 = vst [vmem:[%s14346_s1 + $0x60] sm:$0xff] %v10799_v48 }
  0x33   :  { %v10801_v50 = vld [vmem:[%s14345_s0 + $0x760] sm:$0xff]  ;;  %7594 = vst [vmem:[%s14346_s1 + $0x460] sm:$0xff] %v10800_v49 }
  0x34   :  { %v10802_v51 = vld [vmem:[%s14345_s0 + $0x360] sm:$0xff]  ;;  %7600 = vst [vmem:[%s14346_s1 + $0x860] sm:$0xff] %v10801_v50 }
  0x35   :  { %v10803_v52 = vld [vmem:[%s14345_s0 + $0xe60] sm:$0xff]  ;;  %7606 = vst [vmem:[%s14346_s1 + $0xc60] sm:$0xff] %v10802_v51 }
  0x36   :  { %v10804_v53 = vld [vmem:[%s14345_s0 + $0xa60] sm:$0xff]  ;;  %7612 = vst [vmem:[%s14346_s1 + $0x160] sm:$0xff] %v10803_v52 }
  0x37   :  { %v10805_v54 = vld [vmem:[%s14345_s0 + $0x660] sm:$0xff]  ;;  %7618 = vst [vmem:[%s14346_s1 + $0x560] sm:$0xff] %v10804_v53 }
  0x38   :  { %v10806_v55 = vld [vmem:[%s14345_s0 + $0x260] sm:$0xff]  ;;  %7624 = vst [vmem:[%s14346_s1 + $0x960] sm:$0xff] %v10805_v54 }
  0x39   :  { %v10807_v56 = vld [vmem:[%s14345_s0 + $0xd60] sm:$0xff]  ;;  %7630 = vst [vmem:[%s14346_s1 + $0xd60] sm:$0xff] %v10806_v55 }
  0x3a   :  { %v10808_v57 = vld [vmem:[%s14345_s0 + $0x960] sm:$0xff]  ;;  %7636 = vst [vmem:[%s14346_s1 + $0x260] sm:$0xff] %v10807_v56 }
  0x3b   :  { %v10809_v58 = vld [vmem:[%s14345_s0 + $0x560] sm:$0xff]  ;;  %7642 = vst [vmem:[%s14346_s1 + $0x660] sm:$0xff] %v10808_v57 }
  0x3c   :  { %v10810_v59 = vld [vmem:[%s14345_s0 + $0x160] sm:$0xff]  ;;  %7648 = vst [vmem:[%s14346_s1 + $0xa60] sm:$0xff] %v10809_v58 }
  0x3d   :  { %v10811_v60 = vld [vmem:[%s14345_s0 + $0xc60] sm:$0xff]  ;;  %7654 = vst [vmem:[%s14346_s1 + $0xe60] sm:$0xff] %v10810_v59 }
  0x3e   :  { %v10812_v61 = vld [vmem:[%s14345_s0 + $0x860] sm:$0xff]  ;;  %7660 = vst [vmem:[%s14346_s1 + $0x360] sm:$0xff] %v10811_v60 }
  0x3f   :  { %v10813_v62 = vld [vmem:[%s14345_s0 + $0x460] sm:$0xff]  ;;  %7666 = vst [vmem:[%s14346_s1 + $0x760] sm:$0xff] %v10812_v61 }
  0x40   :  { %v10814_v63 = vld [vmem:[%s14345_s0 + $0x60] sm:$0xff]  ;;  %7672 = vst [vmem:[%s14346_s1 + $0xb60] sm:$0xff] %v10813_v62 }
  0x41   :  { %v10815_v0 = vld [vmem:[%s14345_s0 + $0xf80] sm:$0xff]  ;;  %7678 = vst [vmem:[%s14346_s1 + $0xf60] sm:$0xff] %v10814_v63 }
  0x42   :  { %v10816_v1 = vld [vmem:[%s14345_s0 + $0xb80] sm:$0xff]  ;;  %7684 = vst [vmem:[%s14346_s1 + $0x80] sm:$0xff] %v10815_v0  ;;  %v10879_v0 = vld [vmem:[%s14345_s0 + $0xf08] sm:$0xff] }
  0x43   :  { %v10817_v2 = vld [vmem:[%s14345_s0 + $0x780] sm:$0xff]  ;;  %7690 = vst [vmem:[%s14346_s1 + $0x480] sm:$0xff] %v10816_v1  ;;  %v10880_v1 = vld [vmem:[%s14345_s0 + $0xb08] sm:$0xff] }
  0x44   :  { %v10818_v3 = vld [vmem:[%s14345_s0 + $0x380] sm:$0xff]  ;;  %7696 = vst [vmem:[%s14346_s1 + $0x880] sm:$0xff] %v10817_v2  ;;  %v10881_v2 = vld [vmem:[%s14345_s0 + $0x708] sm:$0xff] }
  0x45   :  { %v10819_v4 = vld [vmem:[%s14345_s0 + $0xe80] sm:$0xff]  ;;  %7702 = vst [vmem:[%s14346_s1 + $0xc80] sm:$0xff] %v10818_v3  ;;  %v10882_v3 = vld [vmem:[%s14345_s0 + $0x308] sm:$0xff] }
  0x46   :  { %v10820_v5 = vld [vmem:[%s14345_s0 + $0xa80] sm:$0xff]  ;;  %7708 = vst [vmem:[%s14346_s1 + $0x180] sm:$0xff] %v10819_v4  ;;  %v10883_v4 = vld [vmem:[%s14345_s0 + $0xe08] sm:$0xff] }
  0x47   :  { %v10821_v6 = vld [vmem:[%s14345_s0 + $0x680] sm:$0xff]  ;;  %7714 = vst [vmem:[%s14346_s1 + $0x580] sm:$0xff] %v10820_v5  ;;  %v10884_v5 = vld [vmem:[%s14345_s0 + $0xa08] sm:$0xff] }
  0x48   :  { %v10822_v7 = vld [vmem:[%s14345_s0 + $0x280] sm:$0xff]  ;;  %7720 = vst [vmem:[%s14346_s1 + $0x980] sm:$0xff] %v10821_v6  ;;  %v10885_v6 = vld [vmem:[%s14345_s0 + $0x608] sm:$0xff] }
  0x49   :  { %v10823_v8 = vld [vmem:[%s14345_s0 + $0xd80] sm:$0xff]  ;;  %7726 = vst [vmem:[%s14346_s1 + $0xd80] sm:$0xff] %v10822_v7  ;;  %v10886_v7 = vld [vmem:[%s14345_s0 + $0x208] sm:$0xff] }
  0x4a   :  { %v10824_v9 = vld [vmem:[%s14345_s0 + $0x980] sm:$0xff]  ;;  %7732 = vst [vmem:[%s14346_s1 + $0x280] sm:$0xff] %v10823_v8  ;;  %v10887_v8 = vld [vmem:[%s14345_s0 + $0xd08] sm:$0xff] }
  0x4b   :  { %v10825_v10 = vld [vmem:[%s14345_s0 + $0x580] sm:$0xff]  ;;  %7738 = vst [vmem:[%s14346_s1 + $0x680] sm:$0xff] %v10824_v9  ;;  %v10888_v9 = vld [vmem:[%s14345_s0 + $0x908] sm:$0xff] }
  0x4c   :  { %v10826_v11 = vld [vmem:[%s14345_s0 + $0x180] sm:$0xff]  ;;  %7744 = vst [vmem:[%s14346_s1 + $0xa80] sm:$0xff] %v10825_v10  ;;  %v10889_v10 = vld [vmem:[%s14345_s0 + $0x508] sm:$0xff] }
  0x4d   :  { %v10827_v12 = vld [vmem:[%s14345_s0 + $0xc80] sm:$0xff]  ;;  %7750 = vst [vmem:[%s14346_s1 + $0xe80] sm:$0xff] %v10826_v11  ;;  %v10890_v11 = vld [vmem:[%s14345_s0 + $0x108] sm:$0xff] }
  0x4e   :  { %v10828_v13 = vld [vmem:[%s14345_s0 + $0x880] sm:$0xff]  ;;  %7756 = vst [vmem:[%s14346_s1 + $0x380] sm:$0xff] %v10827_v12  ;;  %v10891_v12 = vld [vmem:[%s14345_s0 + $0xc08] sm:$0xff] }
  0x4f   :  { %v10829_v14 = vld [vmem:[%s14345_s0 + $0x480] sm:$0xff]  ;;  %7762 = vst [vmem:[%s14346_s1 + $0x780] sm:$0xff] %v10828_v13  ;;  %v10892_v13 = vld [vmem:[%s14345_s0 + $0x808] sm:$0xff] }
  0x50   :  { %v10830_v15 = vld [vmem:[%s14345_s0 + $0x80] sm:$0xff]  ;;  %7768 = vst [vmem:[%s14346_s1 + $0xb80] sm:$0xff] %v10829_v14  ;;  %v10893_v14 = vld [vmem:[%s14345_s0 + $0x408] sm:$0xff] }
  0x51   :  { %v10831_v16 = vld [vmem:[%s14345_s0 + $0xfa0] sm:$0xff]  ;;  %7774 = vst [vmem:[%s14346_s1 + $0xf80] sm:$0xff] %v10830_v15  ;;  %v10894_v15 = vld [vmem:[%s14345_s0 + $0x8] sm:$0xff] }
  0x52   :  { %v10832_v17 = vld [vmem:[%s14345_s0 + $0xba0] sm:$0xff]  ;;  %7780 = vst [vmem:[%s14346_s1 + $0xa0] sm:$0xff] %v10831_v16  ;;  %v10895_v16 = vld [vmem:[%s14345_s0 + $0xf28] sm:$0xff] }
  0x53   :  { %v10833_v18 = vld [vmem:[%s14345_s0 + $0x7a0] sm:$0xff]  ;;  %7786 = vst [vmem:[%s14346_s1 + $0x4a0] sm:$0xff] %v10832_v17  ;;  %v10896_v17 = vld [vmem:[%s14345_s0 + $0xb28] sm:$0xff] }
  0x54   :  { %v10834_v19 = vld [vmem:[%s14345_s0 + $0x3a0] sm:$0xff]  ;;  %7792 = vst [vmem:[%s14346_s1 + $0x8a0] sm:$0xff] %v10833_v18  ;;  %v10897_v18 = vld [vmem:[%s14345_s0 + $0x728] sm:$0xff] }
  0x55   :  { %v10835_v20 = vld [vmem:[%s14345_s0 + $0xea0] sm:$0xff]  ;;  %7798 = vst [vmem:[%s14346_s1 + $0xca0] sm:$0xff] %v10834_v19  ;;  %v10898_v19 = vld [vmem:[%s14345_s0 + $0x328] sm:$0xff] }
  0x56   :  { %v10836_v21 = vld [vmem:[%s14345_s0 + $0xaa0] sm:$0xff]  ;;  %7804 = vst [vmem:[%s14346_s1 + $0x1a0] sm:$0xff] %v10835_v20  ;;  %v10899_v20 = vld [vmem:[%s14345_s0 + $0xe28] sm:$0xff] }
  0x57   :  { %v10837_v22 = vld [vmem:[%s14345_s0 + $0x6a0] sm:$0xff]  ;;  %7810 = vst [vmem:[%s14346_s1 + $0x5a0] sm:$0xff] %v10836_v21  ;;  %v10900_v21 = vld [vmem:[%s14345_s0 + $0xa28] sm:$0xff] }
  0x58   :  { %v10838_v23 = vld [vmem:[%s14345_s0 + $0x2a0] sm:$0xff]  ;;  %7816 = vst [vmem:[%s14346_s1 + $0x9a0] sm:$0xff] %v10837_v22  ;;  %v10901_v22 = vld [vmem:[%s14345_s0 + $0x628] sm:$0xff] }
  0x59   :  { %v10839_v24 = vld [vmem:[%s14345_s0 + $0xda0] sm:$0xff]  ;;  %7822 = vst [vmem:[%s14346_s1 + $0xda0] sm:$0xff] %v10838_v23  ;;  %v10902_v23 = vld [vmem:[%s14345_s0 + $0x228] sm:$0xff] }
  0x5a   :  { %v10840_v25 = vld [vmem:[%s14345_s0 + $0x9a0] sm:$0xff]  ;;  %7828 = vst [vmem:[%s14346_s1 + $0x2a0] sm:$0xff] %v10839_v24  ;;  %v10903_v24 = vld [vmem:[%s14345_s0 + $0xd28] sm:$0xff] }
  0x5b   :  { %v10841_v26 = vld [vmem:[%s14345_s0 + $0x5a0] sm:$0xff]  ;;  %7834 = vst [vmem:[%s14346_s1 + $0x6a0] sm:$0xff] %v10840_v25  ;;  %v10904_v25 = vld [vmem:[%s14345_s0 + $0x928] sm:$0xff] }
  0x5c   :  { %v10842_v27 = vld [vmem:[%s14345_s0 + $0x1a0] sm:$0xff]  ;;  %7840 = vst [vmem:[%s14346_s1 + $0xaa0] sm:$0xff] %v10841_v26  ;;  %v10905_v26 = vld [vmem:[%s14345_s0 + $0x528] sm:$0xff] }
  0x5d   :  { %v10843_v28 = vld [vmem:[%s14345_s0 + $0xca0] sm:$0xff]  ;;  %7846 = vst [vmem:[%s14346_s1 + $0xea0] sm:$0xff] %v10842_v27  ;;  %v10906_v27 = vld [vmem:[%s14345_s0 + $0x128] sm:$0xff] }
  0x5e   :  { %v10844_v29 = vld [vmem:[%s14345_s0 + $0x8a0] sm:$0xff]  ;;  %7852 = vst [vmem:[%s14346_s1 + $0x3a0] sm:$0xff] %v10843_v28  ;;  %v10907_v28 = vld [vmem:[%s14345_s0 + $0xc28] sm:$0xff] }
  0x5f   :  { %v10845_v30 = vld [vmem:[%s14345_s0 + $0x4a0] sm:$0xff]  ;;  %7858 = vst [vmem:[%s14346_s1 + $0x7a0] sm:$0xff] %v10844_v29  ;;  %v10908_v29 = vld [vmem:[%s14345_s0 + $0x828] sm:$0xff] }
  0x60   :  { %v10846_v31 = vld [vmem:[%s14345_s0 + $0xa0] sm:$0xff]  ;;  %7864 = vst [vmem:[%s14346_s1 + $0xba0] sm:$0xff] %v10845_v30  ;;  %v10909_v30 = vld [vmem:[%s14345_s0 + $0x428] sm:$0xff] }
  0x61   :  { %v10847_v32 = vld [vmem:[%s14345_s0 + $0xfc0] sm:$0xff]  ;;  %7870 = vst [vmem:[%s14346_s1 + $0xfa0] sm:$0xff] %v10846_v31  ;;  %v10910_v31 = vld [vmem:[%s14345_s0 + $0x28] sm:$0xff] }
  0x62   :  { %v10848_v33 = vld [vmem:[%s14345_s0 + $0xbc0] sm:$0xff]  ;;  %7876 = vst [vmem:[%s14346_s1 + $0xc0] sm:$0xff] %v10847_v32  ;;  %v10911_v32 = vld [vmem:[%s14345_s0 + $0xf48] sm:$0xff] }
  0x63   :  { %v10849_v34 = vld [vmem:[%s14345_s0 + $0x7c0] sm:$0xff]  ;;  %7882 = vst [vmem:[%s14346_s1 + $0x4c0] sm:$0xff] %v10848_v33  ;;  %v10912_v33 = vld [vmem:[%s14345_s0 + $0xb48] sm:$0xff] }
  0x64   :  { %v10850_v35 = vld [vmem:[%s14345_s0 + $0x3c0] sm:$0xff]  ;;  %7888 = vst [vmem:[%s14346_s1 + $0x8c0] sm:$0xff] %v10849_v34  ;;  %v10913_v34 = vld [vmem:[%s14345_s0 + $0x748] sm:$0xff] }
  0x65   :  { %v10851_v36 = vld [vmem:[%s14345_s0 + $0xec0] sm:$0xff]  ;;  %7894 = vst [vmem:[%s14346_s1 + $0xcc0] sm:$0xff] %v10850_v35  ;;  %v10914_v35 = vld [vmem:[%s14345_s0 + $0x348] sm:$0xff] }
  0x66   :  { %v10852_v37 = vld [vmem:[%s14345_s0 + $0xac0] sm:$0xff]  ;;  %7900 = vst [vmem:[%s14346_s1 + $0x1c0] sm:$0xff] %v10851_v36  ;;  %v10915_v36 = vld [vmem:[%s14345_s0 + $0xe48] sm:$0xff] }
  0x67   :  { %v10853_v38 = vld [vmem:[%s14345_s0 + $0x6c0] sm:$0xff]  ;;  %7906 = vst [vmem:[%s14346_s1 + $0x5c0] sm:$0xff] %v10852_v37  ;;  %v10916_v37 = vld [vmem:[%s14345_s0 + $0xa48] sm:$0xff] }
  0x68   :  { %v10854_v39 = vld [vmem:[%s14345_s0 + $0x2c0] sm:$0xff]  ;;  %7912 = vst [vmem:[%s14346_s1 + $0x9c0] sm:$0xff] %v10853_v38  ;;  %v10917_v38 = vld [vmem:[%s14345_s0 + $0x648] sm:$0xff] }
  0x69   :  { %v10855_v40 = vld [vmem:[%s14345_s0 + $0xdc0] sm:$0xff]  ;;  %7918 = vst [vmem:[%s14346_s1 + $0xdc0] sm:$0xff] %v10854_v39  ;;  %v10918_v39 = vld [vmem:[%s14345_s0 + $0x248] sm:$0xff] }
  0x6a   :  { %v10856_v41 = vld [vmem:[%s14345_s0 + $0x9c0] sm:$0xff]  ;;  %7924 = vst [vmem:[%s14346_s1 + $0x2c0] sm:$0xff] %v10855_v40  ;;  %v10919_v40 = vld [vmem:[%s14345_s0 + $0xd48] sm:$0xff] }
  0x6b   :  { %v10857_v42 = vld [vmem:[%s14345_s0 + $0x5c0] sm:$0xff]  ;;  %7930 = vst [vmem:[%s14346_s1 + $0x6c0] sm:$0xff] %v10856_v41  ;;  %v10920_v41 = vld [vmem:[%s14345_s0 + $0x948] sm:$0xff] }
  0x6c   :  { %v10858_v43 = vld [vmem:[%s14345_s0 + $0x1c0] sm:$0xff]  ;;  %7936 = vst [vmem:[%s14346_s1 + $0xac0] sm:$0xff] %v10857_v42  ;;  %v10921_v42 = vld [vmem:[%s14345_s0 + $0x548] sm:$0xff] }
  0x6d   :  { %v10859_v44 = vld [vmem:[%s14345_s0 + $0xcc0] sm:$0xff]  ;;  %7942 = vst [vmem:[%s14346_s1 + $0xec0] sm:$0xff] %v10858_v43  ;;  %v10922_v43 = vld [vmem:[%s14345_s0 + $0x148] sm:$0xff] }
  0x6e   :  { %v10860_v45 = vld [vmem:[%s14345_s0 + $0x8c0] sm:$0xff]  ;;  %7948 = vst [vmem:[%s14346_s1 + $0x3c0] sm:$0xff] %v10859_v44  ;;  %v10923_v44 = vld [vmem:[%s14345_s0 + $0xc48] sm:$0xff] }
  0x6f   :  { %v10861_v46 = vld [vmem:[%s14345_s0 + $0x4c0] sm:$0xff]  ;;  %7954 = vst [vmem:[%s14346_s1 + $0x7c0] sm:$0xff] %v10860_v45  ;;  %v10924_v45 = vld [vmem:[%s14345_s0 + $0x848] sm:$0xff] }
  0x70   :  { %v10862_v47 = vld [vmem:[%s14345_s0 + $0xc0] sm:$0xff]  ;;  %7960 = vst [vmem:[%s14346_s1 + $0xbc0] sm:$0xff] %v10861_v46  ;;  %v10925_v46 = vld [vmem:[%s14345_s0 + $0x448] sm:$0xff] }
  0x71   :  { %v10863_v48 = vld [vmem:[%s14345_s0 + $0xfe0] sm:$0xff]  ;;  %7966 = vst [vmem:[%s14346_s1 + $0xfc0] sm:$0xff] %v10862_v47  ;;  %v10926_v47 = vld [vmem:[%s14345_s0 + $0x48] sm:$0xff] }
  0x72   :  { %v10864_v49 = vld [vmem:[%s14345_s0 + $0xbe0] sm:$0xff]  ;;  %7972 = vst [vmem:[%s14346_s1 + $0xe0] sm:$0xff] %v10863_v48  ;;  %v10927_v48 = vld [vmem:[%s14345_s0 + $0xf68] sm:$0xff] }
  0x73   :  { %v10865_v50 = vld [vmem:[%s14345_s0 + $0x7e0] sm:$0xff]  ;;  %7978 = vst [vmem:[%s14346_s1 + $0x4e0] sm:$0xff] %v10864_v49  ;;  %v10928_v49 = vld [vmem:[%s14345_s0 + $0xb68] sm:$0xff] }
  0x74   :  { %v10866_v51 = vld [vmem:[%s14345_s0 + $0x3e0] sm:$0xff]  ;;  %7984 = vst [vmem:[%s14346_s1 + $0x8e0] sm:$0xff] %v10865_v50  ;;  %v10929_v50 = vld [vmem:[%s14345_s0 + $0x768] sm:$0xff] }
  0x75   :  { %v10867_v52 = vld [vmem:[%s14345_s0 + $0xee0] sm:$0xff]  ;;  %7990 = vst [vmem:[%s14346_s1 + $0xce0] sm:$0xff] %v10866_v51  ;;  %v10930_v51 = vld [vmem:[%s14345_s0 + $0x368] sm:$0xff] }
  0x76   :  { %v10868_v53 = vld [vmem:[%s14345_s0 + $0xae0] sm:$0xff]  ;;  %7996 = vst [vmem:[%s14346_s1 + $0x1e0] sm:$0xff] %v10867_v52  ;;  %v10931_v52 = vld [vmem:[%s14345_s0 + $0xe68] sm:$0xff] }
  0x77   :  { %v10869_v54 = vld [vmem:[%s14345_s0 + $0x6e0] sm:$0xff]  ;;  %8002 = vst [vmem:[%s14346_s1 + $0x5e0] sm:$0xff] %v10868_v53  ;;  %v10932_v53 = vld [vmem:[%s14345_s0 + $0xa68] sm:$0xff] }
  0x78   :  { %v10870_v55 = vld [vmem:[%s14345_s0 + $0x2e0] sm:$0xff]  ;;  %8008 = vst [vmem:[%s14346_s1 + $0x9e0] sm:$0xff] %v10869_v54  ;;  %v10933_v54 = vld [vmem:[%s14345_s0 + $0x668] sm:$0xff] }
  0x79   :  { %v10871_v56 = vld [vmem:[%s14345_s0 + $0xde0] sm:$0xff]  ;;  %8014 = vst [vmem:[%s14346_s1 + $0xde0] sm:$0xff] %v10870_v55  ;;  %v10934_v55 = vld [vmem:[%s14345_s0 + $0x268] sm:$0xff] }
  0x7a   :  { %v10872_v57 = vld [vmem:[%s14345_s0 + $0x9e0] sm:$0xff]  ;;  %8020 = vst [vmem:[%s14346_s1 + $0x2e0] sm:$0xff] %v10871_v56  ;;  %v10935_v56 = vld [vmem:[%s14345_s0 + $0xd68] sm:$0xff] }
  0x7b   :  { %v10873_v58 = vld [vmem:[%s14345_s0 + $0x5e0] sm:$0xff]  ;;  %8026 = vst [vmem:[%s14346_s1 + $0x6e0] sm:$0xff] %v10872_v57  ;;  %v10936_v57 = vld [vmem:[%s14345_s0 + $0x968] sm:$0xff] }
  0x7c   :  { %v10874_v59 = vld [vmem:[%s14345_s0 + $0x1e0] sm:$0xff]  ;;  %8032 = vst [vmem:[%s14346_s1 + $0xae0] sm:$0xff] %v10873_v58  ;;  %v10937_v58 = vld [vmem:[%s14345_s0 + $0x568] sm:$0xff] }
  0x7d   :  { %v10875_v60 = vld [vmem:[%s14345_s0 + $0xce0] sm:$0xff]  ;;  %8038 = vst [vmem:[%s14346_s1 + $0xee0] sm:$0xff] %v10874_v59  ;;  %v10938_v59 = vld [vmem:[%s14345_s0 + $0x168] sm:$0xff] }
  0x7e   :  { %v10876_v61 = vld [vmem:[%s14345_s0 + $0x8e0] sm:$0xff]  ;;  %8044 = vst [vmem:[%s14346_s1 + $0x3e0] sm:$0xff] %v10875_v60  ;;  %v10939_v60 = vld [vmem:[%s14345_s0 + $0xc68] sm:$0xff] }
  0x7f   :  { %v10877_v62 = vld [vmem:[%s14345_s0 + $0x4e0] sm:$0xff]  ;;  %8050 = vst [vmem:[%s14346_s1 + $0x7e0] sm:$0xff] %v10876_v61  ;;  %v10940_v61 = vld [vmem:[%s14345_s0 + $0x868] sm:$0xff] }
  0x80   :  { %v10878_v63 = vld [vmem:[%s14345_s0 + $0xe0] sm:$0xff]  ;;  %8056 = vst [vmem:[%s14346_s1 + $0xbe0] sm:$0xff] %v10877_v62  ;;  %v10941_v62 = vld [vmem:[%s14345_s0 + $0x468] sm:$0xff] }
  0x81   :  { %8062 = vst [vmem:[%s14346_s1 + $0xfe0] sm:$0xff] %v10878_v63  ;;  %v10942_v63 = vld [vmem:[%s14345_s0 + $0x68] sm:$0xff] }
  0x82   :  { %8196 = vst [vmem:[%s14346_s1 + $0x8] sm:$0xff] %v10879_v0  ;;  %v10943_v0 = vld [vmem:[%s14345_s0 + $0xf88] sm:$0xff] }
  0x83   :  { %8202 = vst [vmem:[%s14346_s1 + $0x408] sm:$0xff] %v10880_v1  ;;  %v10944_v1 = vld [vmem:[%s14345_s0 + $0xb88] sm:$0xff] }
  0x84   :  { %8208 = vst [vmem:[%s14346_s1 + $0x808] sm:$0xff] %v10881_v2  ;;  %v10945_v2 = vld [vmem:[%s14345_s0 + $0x788] sm:$0xff] }
  0x85   :  { %8214 = vst [vmem:[%s14346_s1 + $0xc08] sm:$0xff] %v10882_v3  ;;  %v10946_v3 = vld [vmem:[%s14345_s0 + $0x388] sm:$0xff] }
  0x86   :  { %8220 = vst [vmem:[%s14346_s1 + $0x108] sm:$0xff] %v10883_v4  ;;  %v10947_v4 = vld [vmem:[%s14345_s0 + $0xe88] sm:$0xff] }
  0x87   :  { %8226 = vst [vmem:[%s14346_s1 + $0x508] sm:$0xff] %v10884_v5  ;;  %v10948_v5 = vld [vmem:[%s14345_s0 + $0xa88] sm:$0xff] }
  0x88   :  { %8232 = vst [vmem:[%s14346_s1 + $0x908] sm:$0xff] %v10885_v6  ;;  %v10949_v6 = vld [vmem:[%s14345_s0 + $0x688] sm:$0xff] }
  0x89   :  { %8238 = vst [vmem:[%s14346_s1 + $0xd08] sm:$0xff] %v10886_v7  ;;  %v10950_v7 = vld [vmem:[%s14345_s0 + $0x288] sm:$0xff] }
  0x8a   :  { %8244 = vst [vmem:[%s14346_s1 + $0x208] sm:$0xff] %v10887_v8  ;;  %v10951_v8 = vld [vmem:[%s14345_s0 + $0xd88] sm:$0xff] }
  0x8b   :  { %8250 = vst [vmem:[%s14346_s1 + $0x608] sm:$0xff] %v10888_v9  ;;  %v10952_v9 = vld [vmem:[%s14345_s0 + $0x988] sm:$0xff] }
  0x8c   :  { %8256 = vst [vmem:[%s14346_s1 + $0xa08] sm:$0xff] %v10889_v10  ;;  %v10953_v10 = vld [vmem:[%s14345_s0 + $0x588] sm:$0xff] }
  0x8d   :  { %8262 = vst [vmem:[%s14346_s1 + $0xe08] sm:$0xff] %v10890_v11  ;;  %v10954_v11 = vld [vmem:[%s14345_s0 + $0x188] sm:$0xff] }
  0x8e   :  { %8268 = vst [vmem:[%s14346_s1 + $0x308] sm:$0xff] %v10891_v12  ;;  %v10955_v12 = vld [vmem:[%s14345_s0 + $0xc88] sm:$0xff] }
  0x8f   :  { %8274 = vst [vmem:[%s14346_s1 + $0x708] sm:$0xff] %v10892_v13  ;;  %v10956_v13 = vld [vmem:[%s14345_s0 + $0x888] sm:$0xff] }
  0x90   :  { %8280 = vst [vmem:[%s14346_s1 + $0xb08] sm:$0xff] %v10893_v14  ;;  %v10957_v14 = vld [vmem:[%s14345_s0 + $0x488] sm:$0xff] }
  0x91   :  { %8286 = vst [vmem:[%s14346_s1 + $0xf08] sm:$0xff] %v10894_v15  ;;  %v10958_v15 = vld [vmem:[%s14345_s0 + $0x88] sm:$0xff] }
  0x92   :  { %8292 = vst [vmem:[%s14346_s1 + $0x28] sm:$0xff] %v10895_v16  ;;  %v10959_v16 = vld [vmem:[%s14345_s0 + $0xfa8] sm:$0xff] }
  0x93   :  { %8298 = vst [vmem:[%s14346_s1 + $0x428] sm:$0xff] %v10896_v17  ;;  %v10960_v17 = vld [vmem:[%s14345_s0 + $0xba8] sm:$0xff] }
  0x94   :  { %8304 = vst [vmem:[%s14346_s1 + $0x828] sm:$0xff] %v10897_v18  ;;  %v10961_v18 = vld [vmem:[%s14345_s0 + $0x7a8] sm:$0xff] }
  0x95   :  { %8310 = vst [vmem:[%s14346_s1 + $0xc28] sm:$0xff] %v10898_v19  ;;  %v10962_v19 = vld [vmem:[%s14345_s0 + $0x3a8] sm:$0xff] }
  0x96   :  { %8316 = vst [vmem:[%s14346_s1 + $0x128] sm:$0xff] %v10899_v20  ;;  %v10963_v20 = vld [vmem:[%s14345_s0 + $0xea8] sm:$0xff] }
  0x97   :  { %8322 = vst [vmem:[%s14346_s1 + $0x528] sm:$0xff] %v10900_v21  ;;  %v10964_v21 = vld [vmem:[%s14345_s0 + $0xaa8] sm:$0xff] }
  0x98   :  { %8328 = vst [vmem:[%s14346_s1 + $0x928] sm:$0xff] %v10901_v22  ;;  %v10965_v22 = vld [vmem:[%s14345_s0 + $0x6a8] sm:$0xff] }
  0x99   :  { %8334 = vst [vmem:[%s14346_s1 + $0xd28] sm:$0xff] %v10902_v23  ;;  %v10966_v23 = vld [vmem:[%s14345_s0 + $0x2a8] sm:$0xff] }
  0x9a   :  { %8340 = vst [vmem:[%s14346_s1 + $0x228] sm:$0xff] %v10903_v24  ;;  %v10967_v24 = vld [vmem:[%s14345_s0 + $0xda8] sm:$0xff] }
  0x9b   :  { %8346 = vst [vmem:[%s14346_s1 + $0x628] sm:$0xff] %v10904_v25  ;;  %v10968_v25 = vld [vmem:[%s14345_s0 + $0x9a8] sm:$0xff] }
  0x9c   :  { %8352 = vst [vmem:[%s14346_s1 + $0xa28] sm:$0xff] %v10905_v26  ;;  %v10969_v26 = vld [vmem:[%s14345_s0 + $0x5a8] sm:$0xff] }
  0x9d   :  { %8358 = vst [vmem:[%s14346_s1 + $0xe28] sm:$0xff] %v10906_v27  ;;  %v10970_v27 = vld [vmem:[%s14345_s0 + $0x1a8] sm:$0xff] }
  0x9e   :  { %8364 = vst [vmem:[%s14346_s1 + $0x328] sm:$0xff] %v10907_v28  ;;  %v10971_v28 = vld [vmem:[%s14345_s0 + $0xca8] sm:$0xff] }
  0x9f   :  { %8370 = vst [vmem:[%s14346_s1 + $0x728] sm:$0xff] %v10908_v29  ;;  %v10972_v29 = vld [vmem:[%s14345_s0 + $0x8a8] sm:$0xff] }
  0xa0   :  { %8376 = vst [vmem:[%s14346_s1 + $0xb28] sm:$0xff] %v10909_v30  ;;  %v10973_v30 = vld [vmem:[%s14345_s0 + $0x4a8] sm:$0xff] }
  0xa1   :  { %8382 = vst [vmem:[%s14346_s1 + $0xf28] sm:$0xff] %v10910_v31  ;;  %v10974_v31 = vld [vmem:[%s14345_s0 + $0xa8] sm:$0xff] }
  0xa2   :  { %8388 = vst [vmem:[%s14346_s1 + $0x48] sm:$0xff] %v10911_v32  ;;  %v10975_v32 = vld [vmem:[%s14345_s0 + $0xfc8] sm:$0xff] }
  0xa3   :  { %8394 = vst [vmem:[%s14346_s1 + $0x448] sm:$0xff] %v10912_v33  ;;  %v10976_v33 = vld [vmem:[%s14345_s0 + $0xbc8] sm:$0xff] }
  0xa4   :  { %8400 = vst [vmem:[%s14346_s1 + $0x848] sm:$0xff] %v10913_v34  ;;  %v10977_v34 = vld [vmem:[%s14345_s0 + $0x7c8] sm:$0xff] }
  0xa5   :  { %8406 = vst [vmem:[%s14346_s1 + $0xc48] sm:$0xff] %v10914_v35  ;;  %v10978_v35 = vld [vmem:[%s14345_s0 + $0x3c8] sm:$0xff] }
  0xa6   :  { %8412 = vst [vmem:[%s14346_s1 + $0x148] sm:$0xff] %v10915_v36  ;;  %v10979_v36 = vld [vmem:[%s14345_s0 + $0xec8] sm:$0xff] }
  0xa7   :  { %8418 = vst [vmem:[%s14346_s1 + $0x548] sm:$0xff] %v10916_v37  ;;  %v10980_v37 = vld [vmem:[%s14345_s0 + $0xac8] sm:$0xff] }
  0xa8   :  { %8424 = vst [vmem:[%s14346_s1 + $0x948] sm:$0xff] %v10917_v38  ;;  %v10981_v38 = vld [vmem:[%s14345_s0 + $0x6c8] sm:$0xff] }
  0xa9   :  { %8430 = vst [vmem:[%s14346_s1 + $0xd48] sm:$0xff] %v10918_v39  ;;  %v10982_v39 = vld [vmem:[%s14345_s0 + $0x2c8] sm:$0xff] }
  0xaa   :  { %8436 = vst [vmem:[%s14346_s1 + $0x248] sm:$0xff] %v10919_v40  ;;  %v10983_v40 = vld [vmem:[%s14345_s0 + $0xdc8] sm:$0xff] }
  0xab   :  { %8442 = vst [vmem:[%s14346_s1 + $0x648] sm:$0xff] %v10920_v41  ;;  %v10984_v41 = vld [vmem:[%s14345_s0 + $0x9c8] sm:$0xff] }
  0xac   :  { %8448 = vst [vmem:[%s14346_s1 + $0xa48] sm:$0xff] %v10921_v42  ;;  %v10985_v42 = vld [vmem:[%s14345_s0 + $0x5c8] sm:$0xff] }
  0xad   :  { %8454 = vst [vmem:[%s14346_s1 + $0xe48] sm:$0xff] %v10922_v43  ;;  %v10986_v43 = vld [vmem:[%s14345_s0 + $0x1c8] sm:$0xff] }
  0xae   :  { %8460 = vst [vmem:[%s14346_s1 + $0x348] sm:$0xff] %v10923_v44  ;;  %v10987_v44 = vld [vmem:[%s14345_s0 + $0xcc8] sm:$0xff] }
  0xaf   :  { %8466 = vst [vmem:[%s14346_s1 + $0x748] sm:$0xff] %v10924_v45  ;;  %v10988_v45 = vld [vmem:[%s14345_s0 + $0x8c8] sm:$0xff] }
  0xb0   :  { %8472 = vst [vmem:[%s14346_s1 + $0xb48] sm:$0xff] %v10925_v46  ;;  %v10989_v46 = vld [vmem:[%s14345_s0 + $0x4c8] sm:$0xff] }
  0xb1   :  { %8478 = vst [vmem:[%s14346_s1 + $0xf48] sm:$0xff] %v10926_v47  ;;  %v10990_v47 = vld [vmem:[%s14345_s0 + $0xc8] sm:$0xff] }
  0xb2   :  { %8484 = vst [vmem:[%s14346_s1 + $0x68] sm:$0xff] %v10927_v48  ;;  %v10991_v48 = vld [vmem:[%s14345_s0 + $0xfe8] sm:$0xff] }
  0xb3   :  { %8490 = vst [vmem:[%s14346_s1 + $0x468] sm:$0xff] %v10928_v49  ;;  %v10992_v49 = vld [vmem:[%s14345_s0 + $0xbe8] sm:$0xff] }
  0xb4   :  { %8496 = vst [vmem:[%s14346_s1 + $0x868] sm:$0xff] %v10929_v50  ;;  %v10993_v50 = vld [vmem:[%s14345_s0 + $0x7e8] sm:$0xff] }
  0xb5   :  { %8502 = vst [vmem:[%s14346_s1 + $0xc68] sm:$0xff] %v10930_v51  ;;  %v10994_v51 = vld [vmem:[%s14345_s0 + $0x3e8] sm:$0xff] }
  0xb6   :  { %8508 = vst [vmem:[%s14346_s1 + $0x168] sm:$0xff] %v10931_v52  ;;  %v10995_v52 = vld [vmem:[%s14345_s0 + $0xee8] sm:$0xff] }
  0xb7   :  { %8514 = vst [vmem:[%s14346_s1 + $0x568] sm:$0xff] %v10932_v53  ;;  %v10996_v53 = vld [vmem:[%s14345_s0 + $0xae8] sm:$0xff] }
  0xb8   :  { %8520 = vst [vmem:[%s14346_s1 + $0x968] sm:$0xff] %v10933_v54  ;;  %v10997_v54 = vld [vmem:[%s14345_s0 + $0x6e8] sm:$0xff] }
  0xb9   :  { %8526 = vst [vmem:[%s14346_s1 + $0xd68] sm:$0xff] %v10934_v55  ;;  %v10998_v55 = vld [vmem:[%s14345_s0 + $0x2e8] sm:$0xff] }
  0xba   :  { %8532 = vst [vmem:[%s14346_s1 + $0x268] sm:$0xff] %v10935_v56  ;;  %v10999_v56 = vld [vmem:[%s14345_s0 + $0xde8] sm:$0xff] }
  0xbb   :  { %8538 = vst [vmem:[%s14346_s1 + $0x668] sm:$0xff] %v10936_v57  ;;  %v11000_v57 = vld [vmem:[%s14345_s0 + $0x9e8] sm:$0xff] }
  0xbc   :  { %8544 = vst [vmem:[%s14346_s1 + $0xa68] sm:$0xff] %v10937_v58  ;;  %v11001_v58 = vld [vmem:[%s14345_s0 + $0x5e8] sm:$0xff] }
  0xbd   :  { %8550 = vst [vmem:[%s14346_s1 + $0xe68] sm:$0xff] %v10938_v59  ;;  %v11002_v59 = vld [vmem:[%s14345_s0 + $0x1e8] sm:$0xff] }
  0xbe   :  { %8556 = vst [vmem:[%s14346_s1 + $0x368] sm:$0xff] %v10939_v60  ;;  %v11003_v60 = vld [vmem:[%s14345_s0 + $0xce8] sm:$0xff] }
  0xbf   :  { %8562 = vst [vmem:[%s14346_s1 + $0x768] sm:$0xff] %v10940_v61  ;;  %v11004_v61 = vld [vmem:[%s14345_s0 + $0x8e8] sm:$0xff] }
  0xc0   :  { %8568 = vst [vmem:[%s14346_s1 + $0xb68] sm:$0xff] %v10941_v62  ;;  %v11005_v62 = vld [vmem:[%s14345_s0 + $0x4e8] sm:$0xff] }
  0xc1   :  { %8574 = vst [vmem:[%s14346_s1 + $0xf68] sm:$0xff] %v10942_v63  ;;  %v11006_v63 = vld [vmem:[%s14345_s0 + $0xe8] sm:$0xff] }
  0xc2   :  { %8580 = vst [vmem:[%s14346_s1 + $0x88] sm:$0xff] %v10943_v0  ;;  %v11007_v0 = vld [vmem:[%s14345_s0 + $0xf10] sm:$0xff] }
  0xc3   :  { %8586 = vst [vmem:[%s14346_s1 + $0x488] sm:$0xff] %v10944_v1  ;;  %v11008_v1 = vld [vmem:[%s14345_s0 + $0xb10] sm:$0xff] }
  0xc4   :  { %8592 = vst [vmem:[%s14346_s1 + $0x888] sm:$0xff] %v10945_v2  ;;  %v11009_v2 = vld [vmem:[%s14345_s0 + $0x710] sm:$0xff] }
  0xc5   :  { %8598 = vst [vmem:[%s14346_s1 + $0xc88] sm:$0xff] %v10946_v3  ;;  %v11010_v3 = vld [vmem:[%s14345_s0 + $0x310] sm:$0xff] }
  0xc6   :  { %8604 = vst [vmem:[%s14346_s1 + $0x188] sm:$0xff] %v10947_v4  ;;  %v11011_v4 = vld [vmem:[%s14345_s0 + $0xe10] sm:$0xff] }
  0xc7   :  { %8610 = vst [vmem:[%s14346_s1 + $0x588] sm:$0xff] %v10948_v5  ;;  %v11012_v5 = vld [vmem:[%s14345_s0 + $0xa10] sm:$0xff] }
  0xc8   :  { %8616 = vst [vmem:[%s14346_s1 + $0x988] sm:$0xff] %v10949_v6  ;;  %v11013_v6 = vld [vmem:[%s14345_s0 + $0x610] sm:$0xff] }
  0xc9   :  { %8622 = vst [vmem:[%s14346_s1 + $0xd88] sm:$0xff] %v10950_v7  ;;  %v11014_v7 = vld [vmem:[%s14345_s0 + $0x210] sm:$0xff] }
  0xca   :  { %8628 = vst [vmem:[%s14346_s1 + $0x288] sm:$0xff] %v10951_v8  ;;  %v11015_v8 = vld [vmem:[%s14345_s0 + $0xd10] sm:$0xff] }
  0xcb   :  { %8634 = vst [vmem:[%s14346_s1 + $0x688] sm:$0xff] %v10952_v9  ;;  %v11016_v9 = vld [vmem:[%s14345_s0 + $0x910] sm:$0xff] }
  0xcc   :  { %8640 = vst [vmem:[%s14346_s1 + $0xa88] sm:$0xff] %v10953_v10  ;;  %v11017_v10 = vld [vmem:[%s14345_s0 + $0x510] sm:$0xff] }
  0xcd   :  { %8646 = vst [vmem:[%s14346_s1 + $0xe88] sm:$0xff] %v10954_v11  ;;  %v11018_v11 = vld [vmem:[%s14345_s0 + $0x110] sm:$0xff] }
  0xce   :  { %8652 = vst [vmem:[%s14346_s1 + $0x388] sm:$0xff] %v10955_v12  ;;  %v11019_v12 = vld [vmem:[%s14345_s0 + $0xc10] sm:$0xff] }
  0xcf   :  { %8658 = vst [vmem:[%s14346_s1 + $0x788] sm:$0xff] %v10956_v13  ;;  %v11020_v13 = vld [vmem:[%s14345_s0 + $0x810] sm:$0xff] }
  0xd0   :  { %8664 = vst [vmem:[%s14346_s1 + $0xb88] sm:$0xff] %v10957_v14  ;;  %v11021_v14 = vld [vmem:[%s14345_s0 + $0x410] sm:$0xff] }
  0xd1   :  { %8670 = vst [vmem:[%s14346_s1 + $0xf88] sm:$0xff] %v10958_v15  ;;  %v11022_v15 = vld [vmem:[%s14345_s0 + $0x10] sm:$0xff] }
  0xd2   :  { %8676 = vst [vmem:[%s14346_s1 + $0xa8] sm:$0xff] %v10959_v16  ;;  %v11023_v16 = vld [vmem:[%s14345_s0 + $0xf30] sm:$0xff] }
  0xd3   :  { %8682 = vst [vmem:[%s14346_s1 + $0x4a8] sm:$0xff] %v10960_v17  ;;  %v11024_v17 = vld [vmem:[%s14345_s0 + $0xb30] sm:$0xff] }
  0xd4   :  { %8688 = vst [vmem:[%s14346_s1 + $0x8a8] sm:$0xff] %v10961_v18  ;;  %v11025_v18 = vld [vmem:[%s14345_s0 + $0x730] sm:$0xff] }
  0xd5   :  { %8694 = vst [vmem:[%s14346_s1 + $0xca8] sm:$0xff] %v10962_v19  ;;  %v11026_v19 = vld [vmem:[%s14345_s0 + $0x330] sm:$0xff] }
  0xd6   :  { %8700 = vst [vmem:[%s14346_s1 + $0x1a8] sm:$0xff] %v10963_v20  ;;  %v11027_v20 = vld [vmem:[%s14345_s0 + $0xe30] sm:$0xff] }
  0xd7   :  { %8706 = vst [vmem:[%s14346_s1 + $0x5a8] sm:$0xff] %v10964_v21  ;;  %v11028_v21 = vld [vmem:[%s14345_s0 + $0xa30] sm:$0xff] }
  0xd8   :  { %8712 = vst [vmem:[%s14346_s1 + $0x9a8] sm:$0xff] %v10965_v22  ;;  %v11029_v22 = vld [vmem:[%s14345_s0 + $0x630] sm:$0xff] }
  0xd9   :  { %8718 = vst [vmem:[%s14346_s1 + $0xda8] sm:$0xff] %v10966_v23  ;;  %v11030_v23 = vld [vmem:[%s14345_s0 + $0x230] sm:$0xff] }
  0xda   :  { %8724 = vst [vmem:[%s14346_s1 + $0x2a8] sm:$0xff] %v10967_v24  ;;  %v11031_v24 = vld [vmem:[%s14345_s0 + $0xd30] sm:$0xff] }
  0xdb   :  { %8730 = vst [vmem:[%s14346_s1 + $0x6a8] sm:$0xff] %v10968_v25  ;;  %v11032_v25 = vld [vmem:[%s14345_s0 + $0x930] sm:$0xff] }
  0xdc   :  { %8736 = vst [vmem:[%s14346_s1 + $0xaa8] sm:$0xff] %v10969_v26  ;;  %v11033_v26 = vld [vmem:[%s14345_s0 + $0x530] sm:$0xff] }
  0xdd   :  { %8742 = vst [vmem:[%s14346_s1 + $0xea8] sm:$0xff] %v10970_v27  ;;  %v11034_v27 = vld [vmem:[%s14345_s0 + $0x130] sm:$0xff] }
  0xde   :  { %8748 = vst [vmem:[%s14346_s1 + $0x3a8] sm:$0xff] %v10971_v28  ;;  %v11035_v28 = vld [vmem:[%s14345_s0 + $0xc30] sm:$0xff] }
  0xdf   :  { %8754 = vst [vmem:[%s14346_s1 + $0x7a8] sm:$0xff] %v10972_v29  ;;  %v11036_v29 = vld [vmem:[%s14345_s0 + $0x830] sm:$0xff] }
  0xe0   :  { %8760 = vst [vmem:[%s14346_s1 + $0xba8] sm:$0xff] %v10973_v30  ;;  %v11037_v30 = vld [vmem:[%s14345_s0 + $0x430] sm:$0xff] }
  0xe1   :  { %8766 = vst [vmem:[%s14346_s1 + $0xfa8] sm:$0xff] %v10974_v31  ;;  %v11038_v31 = vld [vmem:[%s14345_s0 + $0x30] sm:$0xff] }
  0xe2   :  { %8772 = vst [vmem:[%s14346_s1 + $0xc8] sm:$0xff] %v10975_v32  ;;  %v11039_v32 = vld [vmem:[%s14345_s0 + $0xf50] sm:$0xff] }
  0xe3   :  { %8778 = vst [vmem:[%s14346_s1 + $0x4c8] sm:$0xff] %v10976_v33  ;;  %v11040_v33 = vld [vmem:[%s14345_s0 + $0xb50] sm:$0xff] }
  0xe4   :  { %8784 = vst [vmem:[%s14346_s1 + $0x8c8] sm:$0xff] %v10977_v34  ;;  %v11041_v34 = vld [vmem:[%s14345_s0 + $0x750] sm:$0xff] }
  0xe5   :  { %8790 = vst [vmem:[%s14346_s1 + $0xcc8] sm:$0xff] %v10978_v35  ;;  %v11042_v35 = vld [vmem:[%s14345_s0 + $0x350] sm:$0xff] }
  0xe6   :  { %8796 = vst [vmem:[%s14346_s1 + $0x1c8] sm:$0xff] %v10979_v36  ;;  %v11043_v36 = vld [vmem:[%s14345_s0 + $0xe50] sm:$0xff] }
  0xe7   :  { %8802 = vst [vmem:[%s14346_s1 + $0x5c8] sm:$0xff] %v10980_v37  ;;  %v11044_v37 = vld [vmem:[%s14345_s0 + $0xa50] sm:$0xff] }
  0xe8   :  { %8808 = vst [vmem:[%s14346_s1 + $0x9c8] sm:$0xff] %v10981_v38  ;;  %v11045_v38 = vld [vmem:[%s14345_s0 + $0x650] sm:$0xff] }
  0xe9   :  { %8814 = vst [vmem:[%s14346_s1 + $0xdc8] sm:$0xff] %v10982_v39  ;;  %v11046_v39 = vld [vmem:[%s14345_s0 + $0x250] sm:$0xff] }
  0xea   :  { %8820 = vst [vmem:[%s14346_s1 + $0x2c8] sm:$0xff] %v10983_v40  ;;  %v11047_v40 = vld [vmem:[%s14345_s0 + $0xd50] sm:$0xff] }
  0xeb   :  { %8826 = vst [vmem:[%s14346_s1 + $0x6c8] sm:$0xff] %v10984_v41  ;;  %v11048_v41 = vld [vmem:[%s14345_s0 + $0x950] sm:$0xff] }
  0xec   :  { %8832 = vst [vmem:[%s14346_s1 + $0xac8] sm:$0xff] %v10985_v42  ;;  %v11049_v42 = vld [vmem:[%s14345_s0 + $0x550] sm:$0xff] }
  0xed   :  { %8838 = vst [vmem:[%s14346_s1 + $0xec8] sm:$0xff] %v10986_v43  ;;  %v11050_v43 = vld [vmem:[%s14345_s0 + $0x150] sm:$0xff] }
  0xee   :  { %8844 = vst [vmem:[%s14346_s1 + $0x3c8] sm:$0xff] %v10987_v44  ;;  %v11051_v44 = vld [vmem:[%s14345_s0 + $0xc50] sm:$0xff] }
  0xef   :  { %8850 = vst [vmem:[%s14346_s1 + $0x7c8] sm:$0xff] %v10988_v45  ;;  %v11052_v45 = vld [vmem:[%s14345_s0 + $0x850] sm:$0xff] }
  0xf0   :  { %8856 = vst [vmem:[%s14346_s1 + $0xbc8] sm:$0xff] %v10989_v46  ;;  %v11053_v46 = vld [vmem:[%s14345_s0 + $0x450] sm:$0xff] }
  0xf1   :  { %8862 = vst [vmem:[%s14346_s1 + $0xfc8] sm:$0xff] %v10990_v47  ;;  %v11054_v47 = vld [vmem:[%s14345_s0 + $0x50] sm:$0xff] }
  0xf2   :  { %8868 = vst [vmem:[%s14346_s1 + $0xe8] sm:$0xff] %v10991_v48  ;;  %v11055_v48 = vld [vmem:[%s14345_s0 + $0xf70] sm:$0xff] }
  0xf3   :  { %8874 = vst [vmem:[%s14346_s1 + $0x4e8] sm:$0xff] %v10992_v49  ;;  %v11056_v49 = vld [vmem:[%s14345_s0 + $0xb70] sm:$0xff] }
  0xf4   :  { %8880 = vst [vmem:[%s14346_s1 + $0x8e8] sm:$0xff] %v10993_v50  ;;  %v11057_v50 = vld [vmem:[%s14345_s0 + $0x770] sm:$0xff] }
  0xf5   :  { %8886 = vst [vmem:[%s14346_s1 + $0xce8] sm:$0xff] %v10994_v51  ;;  %v11058_v51 = vld [vmem:[%s14345_s0 + $0x370] sm:$0xff] }
  0xf6   :  { %8892 = vst [vmem:[%s14346_s1 + $0x1e8] sm:$0xff] %v10995_v52  ;;  %v11059_v52 = vld [vmem:[%s14345_s0 + $0xe70] sm:$0xff] }
  0xf7   :  { %8898 = vst [vmem:[%s14346_s1 + $0x5e8] sm:$0xff] %v10996_v53  ;;  %v11060_v53 = vld [vmem:[%s14345_s0 + $0xa70] sm:$0xff] }
  0xf8   :  { %8904 = vst [vmem:[%s14346_s1 + $0x9e8] sm:$0xff] %v10997_v54  ;;  %v11061_v54 = vld [vmem:[%s14345_s0 + $0x670] sm:$0xff] }
  0xf9   :  { %8910 = vst [vmem:[%s14346_s1 + $0xde8] sm:$0xff] %v10998_v55  ;;  %v11062_v55 = vld [vmem:[%s14345_s0 + $0x270] sm:$0xff] }
  0xfa   :  { %8916 = vst [vmem:[%s14346_s1 + $0x2e8] sm:$0xff] %v10999_v56  ;;  %v11063_v56 = vld [vmem:[%s14345_s0 + $0xd70] sm:$0xff] }
  0xfb   :  { %8922 = vst [vmem:[%s14346_s1 + $0x6e8] sm:$0xff] %v11000_v57  ;;  %v11064_v57 = vld [vmem:[%s14345_s0 + $0x970] sm:$0xff] }
  0xfc   :  { %8928 = vst [vmem:[%s14346_s1 + $0xae8] sm:$0xff] %v11001_v58  ;;  %v11065_v58 = vld [vmem:[%s14345_s0 + $0x570] sm:$0xff] }
  0xfd   :  { %8934 = vst [vmem:[%s14346_s1 + $0xee8] sm:$0xff] %v11002_v59  ;;  %v11066_v59 = vld [vmem:[%s14345_s0 + $0x170] sm:$0xff] }
  0xfe   :  { %8940 = vst [vmem:[%s14346_s1 + $0x3e8] sm:$0xff] %v11003_v60  ;;  %v11067_v60 = vld [vmem:[%s14345_s0 + $0xc70] sm:$0xff] }
  0xff   :  { %8946 = vst [vmem:[%s14346_s1 + $0x7e8] sm:$0xff] %v11004_v61  ;;  %v11068_v61 = vld [vmem:[%s14345_s0 + $0x870] sm:$0xff] }
 0x100   :  { %8952 = vst [vmem:[%s14346_s1 + $0xbe8] sm:$0xff] %v11005_v62  ;;  %v11069_v62 = vld [vmem:[%s14345_s0 + $0x470] sm:$0xff] }
 0x101   :  { %8958 = vst [vmem:[%s14346_s1 + $0xfe8] sm:$0xff] %v11006_v63  ;;  %v11070_v63 = vld [vmem:[%s14345_s0 + $0x70] sm:$0xff] }
 0x102   :  { %9092 = vst [vmem:[%s14346_s1 + $0x10] sm:$0xff] %v11007_v0  ;;  %v11071_v0 = vld [vmem:[%s14345_s0 + $0xf90] sm:$0xff] }
 0x103   :  { %9098 = vst [vmem:[%s14346_s1 + $0x410] sm:$0xff] %v11008_v1  ;;  %v11072_v1 = vld [vmem:[%s14345_s0 + $0xb90] sm:$0xff] }
 0x104   :  { %9104 = vst [vmem:[%s14346_s1 + $0x810] sm:$0xff] %v11009_v2  ;;  %v11073_v2 = vld [vmem:[%s14345_s0 + $0x790] sm:$0xff] }
 0x105   :  { %9110 = vst [vmem:[%s14346_s1 + $0xc10] sm:$0xff] %v11010_v3  ;;  %v11074_v3 = vld [vmem:[%s14345_s0 + $0x390] sm:$0xff] }
 0x106   :  { %9116 = vst [vmem:[%s14346_s1 + $0x110] sm:$0xff] %v11011_v4  ;;  %v11075_v4 = vld [vmem:[%s14345_s0 + $0xe90] sm:$0xff] }
 0x107   :  { %9122 = vst [vmem:[%s14346_s1 + $0x510] sm:$0xff] %v11012_v5  ;;  %v11076_v5 = vld [vmem:[%s14345_s0 + $0xa90] sm:$0xff] }
 0x108   :  { %9128 = vst [vmem:[%s14346_s1 + $0x910] sm:$0xff] %v11013_v6  ;;  %v11077_v6 = vld [vmem:[%s14345_s0 + $0x690] sm:$0xff] }
 0x109   :  { %9134 = vst [vmem:[%s14346_s1 + $0xd10] sm:$0xff] %v11014_v7  ;;  %v11078_v7 = vld [vmem:[%s14345_s0 + $0x290] sm:$0xff] }
 0x10a   :  { %9140 = vst [vmem:[%s14346_s1 + $0x210] sm:$0xff] %v11015_v8  ;;  %v11079_v8 = vld [vmem:[%s14345_s0 + $0xd90] sm:$0xff] }
 0x10b   :  { %9146 = vst [vmem:[%s14346_s1 + $0x610] sm:$0xff] %v11016_v9  ;;  %v11080_v9 = vld [vmem:[%s14345_s0 + $0x990] sm:$0xff] }
 0x10c   :  { %9152 = vst [vmem:[%s14346_s1 + $0xa10] sm:$0xff] %v11017_v10  ;;  %v11081_v10 = vld [vmem:[%s14345_s0 + $0x590] sm:$0xff] }
 0x10d   :  { %9158 = vst [vmem:[%s14346_s1 + $0xe10] sm:$0xff] %v11018_v11  ;;  %v11082_v11 = vld [vmem:[%s14345_s0 + $0x190] sm:$0xff] }
 0x10e   :  { %9164 = vst [vmem:[%s14346_s1 + $0x310] sm:$0xff] %v11019_v12  ;;  %v11083_v12 = vld [vmem:[%s14345_s0 + $0xc90] sm:$0xff] }
 0x10f   :  { %9170 = vst [vmem:[%s14346_s1 + $0x710] sm:$0xff] %v11020_v13  ;;  %v11084_v13 = vld [vmem:[%s14345_s0 + $0x890] sm:$0xff] }
 0x110   :  { %9176 = vst [vmem:[%s14346_s1 + $0xb10] sm:$0xff] %v11021_v14  ;;  %v11085_v14 = vld [vmem:[%s14345_s0 + $0x490] sm:$0xff] }
 0x111   :  { %9182 = vst [vmem:[%s14346_s1 + $0xf10] sm:$0xff] %v11022_v15  ;;  %v11086_v15 = vld [vmem:[%s14345_s0 + $0x90] sm:$0xff] }
 0x112   :  { %9188 = vst [vmem:[%s14346_s1 + $0x30] sm:$0xff] %v11023_v16  ;;  %v11087_v16 = vld [vmem:[%s14345_s0 + $0xfb0] sm:$0xff] }
 0x113   :  { %9194 = vst [vmem:[%s14346_s1 + $0x430] sm:$0xff] %v11024_v17  ;;  %v11088_v17 = vld [vmem:[%s14345_s0 + $0xbb0] sm:$0xff] }
 0x114   :  { %9200 = vst [vmem:[%s14346_s1 + $0x830] sm:$0xff] %v11025_v18  ;;  %v11089_v18 = vld [vmem:[%s14345_s0 + $0x7b0] sm:$0xff] }
 0x115   :  { %9206 = vst [vmem:[%s14346_s1 + $0xc30] sm:$0xff] %v11026_v19  ;;  %v11090_v19 = vld [vmem:[%s14345_s0 + $0x3b0] sm:$0xff] }
 0x116   :  { %9212 = vst [vmem:[%s14346_s1 + $0x130] sm:$0xff] %v11027_v20  ;;  %v11091_v20 = vld [vmem:[%s14345_s0 + $0xeb0] sm:$0xff] }
 0x117   :  { %9218 = vst [vmem:[%s14346_s1 + $0x530] sm:$0xff] %v11028_v21  ;;  %v11092_v21 = vld [vmem:[%s14345_s0 + $0xab0] sm:$0xff] }
 0x118   :  { %9224 = vst [vmem:[%s14346_s1 + $0x930] sm:$0xff] %v11029_v22  ;;  %v11093_v22 = vld [vmem:[%s14345_s0 + $0x6b0] sm:$0xff] }
 0x119   :  { %9230 = vst [vmem:[%s14346_s1 + $0xd30] sm:$0xff] %v11030_v23  ;;  %v11094_v23 = vld [vmem:[%s14345_s0 + $0x2b0] sm:$0xff] }
 0x11a   :  { %9236 = vst [vmem:[%s14346_s1 + $0x230] sm:$0xff] %v11031_v24  ;;  %v11095_v24 = vld [vmem:[%s14345_s0 + $0xdb0] sm:$0xff] }
 0x11b   :  { %9242 = vst [vmem:[%s14346_s1 + $0x630] sm:$0xff] %v11032_v25  ;;  %v11096_v25 = vld [vmem:[%s14345_s0 + $0x9b0] sm:$0xff] }
 0x11c   :  { %9248 = vst [vmem:[%s14346_s1 + $0xa30] sm:$0xff] %v11033_v26  ;;  %v11097_v26 = vld [vmem:[%s14345_s0 + $0x5b0] sm:$0xff] }
 0x11d   :  { %9254 = vst [vmem:[%s14346_s1 + $0xe30] sm:$0xff] %v11034_v27  ;;  %v11098_v27 = vld [vmem:[%s14345_s0 + $0x1b0] sm:$0xff] }
 0x11e   :  { %9260 = vst [vmem:[%s14346_s1 + $0x330] sm:$0xff] %v11035_v28  ;;  %v11099_v28 = vld [vmem:[%s14345_s0 + $0xcb0] sm:$0xff] }
 0x11f   :  { %9266 = vst [vmem:[%s14346_s1 + $0x730] sm:$0xff] %v11036_v29  ;;  %v11100_v29 = vld [vmem:[%s14345_s0 + $0x8b0] sm:$0xff] }
 0x120   :  { %9272 = vst [vmem:[%s14346_s1 + $0xb30] sm:$0xff] %v11037_v30  ;;  %v11101_v30 = vld [vmem:[%s14345_s0 + $0x4b0] sm:$0xff] }
 0x121   :  { %9278 = vst [vmem:[%s14346_s1 + $0xf30] sm:$0xff] %v11038_v31  ;;  %v11102_v31 = vld [vmem:[%s14345_s0 + $0xb0] sm:$0xff] }
 0x122   :  { %9284 = vst [vmem:[%s14346_s1 + $0x50] sm:$0xff] %v11039_v32  ;;  %v11103_v32 = vld [vmem:[%s14345_s0 + $0xfd0] sm:$0xff] }
 0x123   :  { %9290 = vst [vmem:[%s14346_s1 + $0x450] sm:$0xff] %v11040_v33  ;;  %v11104_v33 = vld [vmem:[%s14345_s0 + $0xbd0] sm:$0xff] }
 0x124   :  { %9296 = vst [vmem:[%s14346_s1 + $0x850] sm:$0xff] %v11041_v34  ;;  %v11105_v34 = vld [vmem:[%s14345_s0 + $0x7d0] sm:$0xff] }
 0x125   :  { %9302 = vst [vmem:[%s14346_s1 + $0xc50] sm:$0xff] %v11042_v35  ;;  %v11106_v35 = vld [vmem:[%s14345_s0 + $0x3d0] sm:$0xff] }
 0x126   :  { %9308 = vst [vmem:[%s14346_s1 + $0x150] sm:$0xff] %v11043_v36  ;;  %v11107_v36 = vld [vmem:[%s14345_s0 + $0xed0] sm:$0xff] }
 0x127   :  { %9314 = vst [vmem:[%s14346_s1 + $0x550] sm:$0xff] %v11044_v37  ;;  %v11108_v37 = vld [vmem:[%s14345_s0 + $0xad0] sm:$0xff] }
 0x128   :  { %9320 = vst [vmem:[%s14346_s1 + $0x950] sm:$0xff] %v11045_v38  ;;  %v11109_v38 = vld [vmem:[%s14345_s0 + $0x6d0] sm:$0xff] }
 0x129   :  { %9326 = vst [vmem:[%s14346_s1 + $0xd50] sm:$0xff] %v11046_v39  ;;  %v11110_v39 = vld [vmem:[%s14345_s0 + $0x2d0] sm:$0xff] }
 0x12a   :  { %9332 = vst [vmem:[%s14346_s1 + $0x250] sm:$0xff] %v11047_v40  ;;  %v11111_v40 = vld [vmem:[%s14345_s0 + $0xdd0] sm:$0xff] }
 0x12b   :  { %9338 = vst [vmem:[%s14346_s1 + $0x650] sm:$0xff] %v11048_v41  ;;  %v11112_v41 = vld [vmem:[%s14345_s0 + $0x9d0] sm:$0xff] }
 0x12c   :  { %9344 = vst [vmem:[%s14346_s1 + $0xa50] sm:$0xff] %v11049_v42  ;;  %v11113_v42 = vld [vmem:[%s14345_s0 + $0x5d0] sm:$0xff] }
 0x12d   :  { %9350 = vst [vmem:[%s14346_s1 + $0xe50] sm:$0xff] %v11050_v43  ;;  %v11114_v43 = vld [vmem:[%s14345_s0 + $0x1d0] sm:$0xff] }
 0x12e   :  { %9356 = vst [vmem:[%s14346_s1 + $0x350] sm:$0xff] %v11051_v44  ;;  %v11115_v44 = vld [vmem:[%s14345_s0 + $0xcd0] sm:$0xff] }
 0x12f   :  { %9362 = vst [vmem:[%s14346_s1 + $0x750] sm:$0xff] %v11052_v45  ;;  %v11116_v45 = vld [vmem:[%s14345_s0 + $0x8d0] sm:$0xff] }
 0x130   :  { %9368 = vst [vmem:[%s14346_s1 + $0xb50] sm:$0xff] %v11053_v46  ;;  %v11117_v46 = vld [vmem:[%s14345_s0 + $0x4d0] sm:$0xff] }
 0x131   :  { %9374 = vst [vmem:[%s14346_s1 + $0xf50] sm:$0xff] %v11054_v47  ;;  %v11118_v47 = vld [vmem:[%s14345_s0 + $0xd0] sm:$0xff] }
 0x132   :  { %9380 = vst [vmem:[%s14346_s1 + $0x70] sm:$0xff] %v11055_v48  ;;  %v11119_v48 = vld [vmem:[%s14345_s0 + $0xff0] sm:$0xff] }
 0x133   :  { %9386 = vst [vmem:[%s14346_s1 + $0x470] sm:$0xff] %v11056_v49  ;;  %v11120_v49 = vld [vmem:[%s14345_s0 + $0xbf0] sm:$0xff] }
 0x134   :  { %9392 = vst [vmem:[%s14346_s1 + $0x870] sm:$0xff] %v11057_v50  ;;  %v11121_v50 = vld [vmem:[%s14345_s0 + $0x7f0] sm:$0xff] }
 0x135   :  { %9398 = vst [vmem:[%s14346_s1 + $0xc70] sm:$0xff] %v11058_v51  ;;  %v11122_v51 = vld [vmem:[%s14345_s0 + $0x3f0] sm:$0xff] }
 0x136   :  { %9404 = vst [vmem:[%s14346_s1 + $0x170] sm:$0xff] %v11059_v52  ;;  %v11123_v52 = vld [vmem:[%s14345_s0 + $0xef0] sm:$0xff] }
 0x137   :  { %9410 = vst [vmem:[%s14346_s1 + $0x570] sm:$0xff] %v11060_v53  ;;  %v11124_v53 = vld [vmem:[%s14345_s0 + $0xaf0] sm:$0xff] }
 0x138   :  { %9416 = vst [vmem:[%s14346_s1 + $0x970] sm:$0xff] %v11061_v54  ;;  %v11125_v54 = vld [vmem:[%s14345_s0 + $0x6f0] sm:$0xff] }
 0x139   :  { %9422 = vst [vmem:[%s14346_s1 + $0xd70] sm:$0xff] %v11062_v55  ;;  %v11126_v55 = vld [vmem:[%s14345_s0 + $0x2f0] sm:$0xff] }
 0x13a   :  { %9428 = vst [vmem:[%s14346_s1 + $0x270] sm:$0xff] %v11063_v56  ;;  %v11127_v56 = vld [vmem:[%s14345_s0 + $0xdf0] sm:$0xff] }
 0x13b   :  { %9434 = vst [vmem:[%s14346_s1 + $0x670] sm:$0xff] %v11064_v57  ;;  %v11128_v57 = vld [vmem:[%s14345_s0 + $0x9f0] sm:$0xff] }
 0x13c   :  { %9440 = vst [vmem:[%s14346_s1 + $0xa70] sm:$0xff] %v11065_v58  ;;  %v11129_v58 = vld [vmem:[%s14345_s0 + $0x5f0] sm:$0xff] }
 0x13d   :  { %9446 = vst [vmem:[%s14346_s1 + $0xe70] sm:$0xff] %v11066_v59  ;;  %v11130_v59 = vld [vmem:[%s14345_s0 + $0x1f0] sm:$0xff] }
 0x13e   :  { %9452 = vst [vmem:[%s14346_s1 + $0x370] sm:$0xff] %v11067_v60  ;;  %v11131_v60 = vld [vmem:[%s14345_s0 + $0xcf0] sm:$0xff] }
 0x13f   :  { %9458 = vst [vmem:[%s14346_s1 + $0x770] sm:$0xff] %v11068_v61  ;;  %v11132_v61 = vld [vmem:[%s14345_s0 + $0x8f0] sm:$0xff] }
 0x140   :  { %9464 = vst [vmem:[%s14346_s1 + $0xb70] sm:$0xff] %v11069_v62  ;;  %v11133_v62 = vld [vmem:[%s14345_s0 + $0x4f0] sm:$0xff] }
 0x141   :  { %9470 = vst [vmem:[%s14346_s1 + $0xf70] sm:$0xff] %v11070_v63  ;;  %v11134_v63 = vld [vmem:[%s14345_s0 + $0xf0] sm:$0xff] }
 0x142   :  { %9476 = vst [vmem:[%s14346_s1 + $0x90] sm:$0xff] %v11071_v0  ;;  %v11135_v0 = vld [vmem:[%s14345_s0 + $0xf18] sm:$0xff] }
 0x143   :  { %9482 = vst [vmem:[%s14346_s1 + $0x490] sm:$0xff] %v11072_v1  ;;  %v11136_v1 = vld [vmem:[%s14345_s0 + $0xb18] sm:$0xff] }
 0x144   :  { %9488 = vst [vmem:[%s14346_s1 + $0x890] sm:$0xff] %v11073_v2  ;;  %v11137_v2 = vld [vmem:[%s14345_s0 + $0x718] sm:$0xff] }
 0x145   :  { %9494 = vst [vmem:[%s14346_s1 + $0xc90] sm:$0xff] %v11074_v3  ;;  %v11138_v3 = vld [vmem:[%s14345_s0 + $0x318] sm:$0xff] }
 0x146   :  { %9500 = vst [vmem:[%s14346_s1 + $0x190] sm:$0xff] %v11075_v4  ;;  %v11139_v4 = vld [vmem:[%s14345_s0 + $0xe18] sm:$0xff] }
 0x147   :  { %9506 = vst [vmem:[%s14346_s1 + $0x590] sm:$0xff] %v11076_v5  ;;  %v11140_v5 = vld [vmem:[%s14345_s0 + $0xa18] sm:$0xff] }
 0x148   :  { %9512 = vst [vmem:[%s14346_s1 + $0x990] sm:$0xff] %v11077_v6  ;;  %v11141_v6 = vld [vmem:[%s14345_s0 + $0x618] sm:$0xff] }
 0x149   :  { %9518 = vst [vmem:[%s14346_s1 + $0xd90] sm:$0xff] %v11078_v7  ;;  %v11142_v7 = vld [vmem:[%s14345_s0 + $0x218] sm:$0xff] }
 0x14a   :  { %9524 = vst [vmem:[%s14346_s1 + $0x290] sm:$0xff] %v11079_v8  ;;  %v11143_v8 = vld [vmem:[%s14345_s0 + $0xd18] sm:$0xff] }
 0x14b   :  { %9530 = vst [vmem:[%s14346_s1 + $0x690] sm:$0xff] %v11080_v9  ;;  %v11144_v9 = vld [vmem:[%s14345_s0 + $0x918] sm:$0xff] }
 0x14c   :  { %9536 = vst [vmem:[%s14346_s1 + $0xa90] sm:$0xff] %v11081_v10  ;;  %v11145_v10 = vld [vmem:[%s14345_s0 + $0x518] sm:$0xff] }
 0x14d   :  { %9542 = vst [vmem:[%s14346_s1 + $0xe90] sm:$0xff] %v11082_v11  ;;  %v11146_v11 = vld [vmem:[%s14345_s0 + $0x118] sm:$0xff] }
 0x14e   :  { %9548 = vst [vmem:[%s14346_s1 + $0x390] sm:$0xff] %v11083_v12  ;;  %v11147_v12 = vld [vmem:[%s14345_s0 + $0xc18] sm:$0xff] }
 0x14f   :  { %9554 = vst [vmem:[%s14346_s1 + $0x790] sm:$0xff] %v11084_v13  ;;  %v11148_v13 = vld [vmem:[%s14345_s0 + $0x818] sm:$0xff] }
 0x150   :  { %9560 = vst [vmem:[%s14346_s1 + $0xb90] sm:$0xff] %v11085_v14  ;;  %v11149_v14 = vld [vmem:[%s14345_s0 + $0x418] sm:$0xff] }
 0x151   :  { %9566 = vst [vmem:[%s14346_s1 + $0xf90] sm:$0xff] %v11086_v15  ;;  %v11150_v15 = vld [vmem:[%s14345_s0 + $0x18] sm:$0xff] }
 0x152   :  { %9572 = vst [vmem:[%s14346_s1 + $0xb0] sm:$0xff] %v11087_v16  ;;  %v11151_v16 = vld [vmem:[%s14345_s0 + $0xf38] sm:$0xff] }
 0x153   :  { %9578 = vst [vmem:[%s14346_s1 + $0x4b0] sm:$0xff] %v11088_v17  ;;  %v11152_v17 = vld [vmem:[%s14345_s0 + $0xb38] sm:$0xff] }
 0x154   :  { %9584 = vst [vmem:[%s14346_s1 + $0x8b0] sm:$0xff] %v11089_v18  ;;  %v11153_v18 = vld [vmem:[%s14345_s0 + $0x738] sm:$0xff] }
 0x155   :  { %9590 = vst [vmem:[%s14346_s1 + $0xcb0] sm:$0xff] %v11090_v19  ;;  %v11154_v19 = vld [vmem:[%s14345_s0 + $0x338] sm:$0xff] }
 0x156   :  { %9596 = vst [vmem:[%s14346_s1 + $0x1b0] sm:$0xff] %v11091_v20  ;;  %v11155_v20 = vld [vmem:[%s14345_s0 + $0xe38] sm:$0xff] }
 0x157   :  { %9602 = vst [vmem:[%s14346_s1 + $0x5b0] sm:$0xff] %v11092_v21  ;;  %v11156_v21 = vld [vmem:[%s14345_s0 + $0xa38] sm:$0xff] }
 0x158   :  { %9608 = vst [vmem:[%s14346_s1 + $0x9b0] sm:$0xff] %v11093_v22  ;;  %v11157_v22 = vld [vmem:[%s14345_s0 + $0x638] sm:$0xff] }
 0x159   :  { %9614 = vst [vmem:[%s14346_s1 + $0xdb0] sm:$0xff] %v11094_v23  ;;  %v11158_v23 = vld [vmem:[%s14345_s0 + $0x238] sm:$0xff] }
 0x15a   :  { %9620 = vst [vmem:[%s14346_s1 + $0x2b0] sm:$0xff] %v11095_v24  ;;  %v11159_v24 = vld [vmem:[%s14345_s0 + $0xd38] sm:$0xff] }
 0x15b   :  { %9626 = vst [vmem:[%s14346_s1 + $0x6b0] sm:$0xff] %v11096_v25  ;;  %v11160_v25 = vld [vmem:[%s14345_s0 + $0x938] sm:$0xff] }
 0x15c   :  { %9632 = vst [vmem:[%s14346_s1 + $0xab0] sm:$0xff] %v11097_v26  ;;  %v11161_v26 = vld [vmem:[%s14345_s0 + $0x538] sm:$0xff] }
 0x15d   :  { %9638 = vst [vmem:[%s14346_s1 + $0xeb0] sm:$0xff] %v11098_v27  ;;  %v11162_v27 = vld [vmem:[%s14345_s0 + $0x138] sm:$0xff] }
 0x15e   :  { %9644 = vst [vmem:[%s14346_s1 + $0x3b0] sm:$0xff] %v11099_v28  ;;  %v11163_v28 = vld [vmem:[%s14345_s0 + $0xc38] sm:$0xff] }
 0x15f   :  { %9650 = vst [vmem:[%s14346_s1 + $0x7b0] sm:$0xff] %v11100_v29  ;;  %v11164_v29 = vld [vmem:[%s14345_s0 + $0x838] sm:$0xff] }
 0x160   :  { %9656 = vst [vmem:[%s14346_s1 + $0xbb0] sm:$0xff] %v11101_v30  ;;  %v11165_v30 = vld [vmem:[%s14345_s0 + $0x438] sm:$0xff] }
 0x161   :  { %9662 = vst [vmem:[%s14346_s1 + $0xfb0] sm:$0xff] %v11102_v31  ;;  %v11166_v31 = vld [vmem:[%s14345_s0 + $0x38] sm:$0xff] }
 0x162   :  { %9668 = vst [vmem:[%s14346_s1 + $0xd0] sm:$0xff] %v11103_v32  ;;  %v11167_v32 = vld [vmem:[%s14345_s0 + $0xf58] sm:$0xff] }
 0x163   :  { %9674 = vst [vmem:[%s14346_s1 + $0x4d0] sm:$0xff] %v11104_v33  ;;  %v11168_v33 = vld [vmem:[%s14345_s0 + $0xb58] sm:$0xff] }
 0x164   :  { %9680 = vst [vmem:[%s14346_s1 + $0x8d0] sm:$0xff] %v11105_v34  ;;  %v11169_v34 = vld [vmem:[%s14345_s0 + $0x758] sm:$0xff] }
 0x165   :  { %9686 = vst [vmem:[%s14346_s1 + $0xcd0] sm:$0xff] %v11106_v35  ;;  %v11170_v35 = vld [vmem:[%s14345_s0 + $0x358] sm:$0xff] }
 0x166   :  { %9692 = vst [vmem:[%s14346_s1 + $0x1d0] sm:$0xff] %v11107_v36  ;;  %v11171_v36 = vld [vmem:[%s14345_s0 + $0xe58] sm:$0xff] }
 0x167   :  { %9698 = vst [vmem:[%s14346_s1 + $0x5d0] sm:$0xff] %v11108_v37  ;;  %v11172_v37 = vld [vmem:[%s14345_s0 + $0xa58] sm:$0xff] }
 0x168   :  { %9704 = vst [vmem:[%s14346_s1 + $0x9d0] sm:$0xff] %v11109_v38  ;;  %v11173_v38 = vld [vmem:[%s14345_s0 + $0x658] sm:$0xff] }
 0x169   :  { %9710 = vst [vmem:[%s14346_s1 + $0xdd0] sm:$0xff] %v11110_v39  ;;  %v11174_v39 = vld [vmem:[%s14345_s0 + $0x258] sm:$0xff] }
 0x16a   :  { %9716 = vst [vmem:[%s14346_s1 + $0x2d0] sm:$0xff] %v11111_v40  ;;  %v11175_v40 = vld [vmem:[%s14345_s0 + $0xd58] sm:$0xff] }
 0x16b   :  { %9722 = vst [vmem:[%s14346_s1 + $0x6d0] sm:$0xff] %v11112_v41  ;;  %v11176_v41 = vld [vmem:[%s14345_s0 + $0x958] sm:$0xff] }
 0x16c   :  { %9728 = vst [vmem:[%s14346_s1 + $0xad0] sm:$0xff] %v11113_v42  ;;  %v11177_v42 = vld [vmem:[%s14345_s0 + $0x558] sm:$0xff] }
 0x16d   :  { %9734 = vst [vmem:[%s14346_s1 + $0xed0] sm:$0xff] %v11114_v43  ;;  %v11178_v43 = vld [vmem:[%s14345_s0 + $0x158] sm:$0xff] }
 0x16e   :  { %9740 = vst [vmem:[%s14346_s1 + $0x3d0] sm:$0xff] %v11115_v44  ;;  %v11179_v44 = vld [vmem:[%s14345_s0 + $0xc58] sm:$0xff] }
 0x16f   :  { %9746 = vst [vmem:[%s14346_s1 + $0x7d0] sm:$0xff] %v11116_v45  ;;  %v11180_v45 = vld [vmem:[%s14345_s0 + $0x858] sm:$0xff] }
 0x170   :  { %9752 = vst [vmem:[%s14346_s1 + $0xbd0] sm:$0xff] %v11117_v46  ;;  %v11181_v46 = vld [vmem:[%s14345_s0 + $0x458] sm:$0xff] }
 0x171   :  { %9758 = vst [vmem:[%s14346_s1 + $0xfd0] sm:$0xff] %v11118_v47  ;;  %v11182_v47 = vld [vmem:[%s14345_s0 + $0x58] sm:$0xff] }
 0x172   :  { %9764 = vst [vmem:[%s14346_s1 + $0xf0] sm:$0xff] %v11119_v48  ;;  %v11183_v48 = vld [vmem:[%s14345_s0 + $0xf78] sm:$0xff] }
 0x173   :  { %9770 = vst [vmem:[%s14346_s1 + $0x4f0] sm:$0xff] %v11120_v49  ;;  %v11184_v49 = vld [vmem:[%s14345_s0 + $0xb78] sm:$0xff] }
 0x174   :  { %9776 = vst [vmem:[%s14346_s1 + $0x8f0] sm:$0xff] %v11121_v50  ;;  %v11185_v50 = vld [vmem:[%s14345_s0 + $0x778] sm:$0xff] }
 0x175   :  { %9782 = vst [vmem:[%s14346_s1 + $0xcf0] sm:$0xff] %v11122_v51  ;;  %v11186_v51 = vld [vmem:[%s14345_s0 + $0x378] sm:$0xff] }
 0x176   :  { %9788 = vst [vmem:[%s14346_s1 + $0x1f0] sm:$0xff] %v11123_v52  ;;  %v11187_v52 = vld [vmem:[%s14345_s0 + $0xe78] sm:$0xff] }
 0x177   :  { %9794 = vst [vmem:[%s14346_s1 + $0x5f0] sm:$0xff] %v11124_v53  ;;  %v11188_v53 = vld [vmem:[%s14345_s0 + $0xa78] sm:$0xff] }
 0x178   :  { %9800 = vst [vmem:[%s14346_s1 + $0x9f0] sm:$0xff] %v11125_v54  ;;  %v11189_v54 = vld [vmem:[%s14345_s0 + $0x678] sm:$0xff] }
 0x179   :  { %9806 = vst [vmem:[%s14346_s1 + $0xdf0] sm:$0xff] %v11126_v55  ;;  %v11190_v55 = vld [vmem:[%s14345_s0 + $0x278] sm:$0xff] }
 0x17a   :  { %9812 = vst [vmem:[%s14346_s1 + $0x2f0] sm:$0xff] %v11127_v56  ;;  %v11191_v56 = vld [vmem:[%s14345_s0 + $0xd78] sm:$0xff] }
 0x17b   :  { %9818 = vst [vmem:[%s14346_s1 + $0x6f0] sm:$0xff] %v11128_v57  ;;  %v11192_v57 = vld [vmem:[%s14345_s0 + $0x978] sm:$0xff] }
 0x17c   :  { %9824 = vst [vmem:[%s14346_s1 + $0xaf0] sm:$0xff] %v11129_v58  ;;  %v11193_v58 = vld [vmem:[%s14345_s0 + $0x578] sm:$0xff] }
 0x17d   :  { %9830 = vst [vmem:[%s14346_s1 + $0xef0] sm:$0xff] %v11130_v59  ;;  %v11194_v59 = vld [vmem:[%s14345_s0 + $0x178] sm:$0xff] }
 0x17e   :  { %9836 = vst [vmem:[%s14346_s1 + $0x3f0] sm:$0xff] %v11131_v60  ;;  %v11195_v60 = vld [vmem:[%s14345_s0 + $0xc78] sm:$0xff] }
 0x17f   :  { %9842 = vst [vmem:[%s14346_s1 + $0x7f0] sm:$0xff] %v11132_v61  ;;  %v11196_v61 = vld [vmem:[%s14345_s0 + $0x878] sm:$0xff] }
 0x180   :  { %9848 = vst [vmem:[%s14346_s1 + $0xbf0] sm:$0xff] %v11133_v62  ;;  %v11197_v62 = vld [vmem:[%s14345_s0 + $0x478] sm:$0xff] }
 0x181   :  { %9854 = vst [vmem:[%s14346_s1 + $0xff0] sm:$0xff] %v11134_v63  ;;  %v11198_v63 = vld [vmem:[%s14345_s0 + $0x78] sm:$0xff] }
 0x182   :  { %9988 = vst [vmem:[%s14346_s1 + $0x18] sm:$0xff] %v11135_v0  ;;  %v11199_v0 = vld [vmem:[%s14345_s0 + $0xf98] sm:$0xff] }
 0x183   :  { %9994 = vst [vmem:[%s14346_s1 + $0x418] sm:$0xff] %v11136_v1  ;;  %v11200_v1 = vld [vmem:[%s14345_s0 + $0xb98] sm:$0xff] }
 0x184   :  { %10000 = vst [vmem:[%s14346_s1 + $0x818] sm:$0xff] %v11137_v2  ;;  %v11201_v2 = vld [vmem:[%s14345_s0 + $0x798] sm:$0xff] }
 0x185   :  { %10006 = vst [vmem:[%s14346_s1 + $0xc18] sm:$0xff] %v11138_v3  ;;  %v11202_v3 = vld [vmem:[%s14345_s0 + $0x398] sm:$0xff] }
 0x186   :  { %10012 = vst [vmem:[%s14346_s1 + $0x118] sm:$0xff] %v11139_v4  ;;  %v11203_v4 = vld [vmem:[%s14345_s0 + $0xe98] sm:$0xff] }
 0x187   :  { %10018 = vst [vmem:[%s14346_s1 + $0x518] sm:$0xff] %v11140_v5  ;;  %v11204_v5 = vld [vmem:[%s14345_s0 + $0xa98] sm:$0xff] }
 0x188   :  { %10024 = vst [vmem:[%s14346_s1 + $0x918] sm:$0xff] %v11141_v6  ;;  %v11205_v6 = vld [vmem:[%s14345_s0 + $0x698] sm:$0xff] }
 0x189   :  { %10030 = vst [vmem:[%s14346_s1 + $0xd18] sm:$0xff] %v11142_v7  ;;  %v11206_v7 = vld [vmem:[%s14345_s0 + $0x298] sm:$0xff] }
 0x18a   :  { %10036 = vst [vmem:[%s14346_s1 + $0x218] sm:$0xff] %v11143_v8  ;;  %v11207_v8 = vld [vmem:[%s14345_s0 + $0xd98] sm:$0xff] }
 0x18b   :  { %10042 = vst [vmem:[%s14346_s1 + $0x618] sm:$0xff] %v11144_v9  ;;  %v11208_v9 = vld [vmem:[%s14345_s0 + $0x998] sm:$0xff] }
 0x18c   :  { %10048 = vst [vmem:[%s14346_s1 + $0xa18] sm:$0xff] %v11145_v10  ;;  %v11209_v10 = vld [vmem:[%s14345_s0 + $0x598] sm:$0xff] }
 0x18d   :  { %10054 = vst [vmem:[%s14346_s1 + $0xe18] sm:$0xff] %v11146_v11  ;;  %v11210_v11 = vld [vmem:[%s14345_s0 + $0x198] sm:$0xff] }
 0x18e   :  { %10060 = vst [vmem:[%s14346_s1 + $0x318] sm:$0xff] %v11147_v12  ;;  %v11211_v12 = vld [vmem:[%s14345_s0 + $0xc98] sm:$0xff] }
 0x18f   :  { %10066 = vst [vmem:[%s14346_s1 + $0x718] sm:$0xff] %v11148_v13  ;;  %v11212_v13 = vld [vmem:[%s14345_s0 + $0x898] sm:$0xff] }
 0x190   :  { %10072 = vst [vmem:[%s14346_s1 + $0xb18] sm:$0xff] %v11149_v14  ;;  %v11213_v14 = vld [vmem:[%s14345_s0 + $0x498] sm:$0xff] }
 0x191   :  { %10078 = vst [vmem:[%s14346_s1 + $0xf18] sm:$0xff] %v11150_v15  ;;  %v11214_v15 = vld [vmem:[%s14345_s0 + $0x98] sm:$0xff] }
 0x192   :  { %10084 = vst [vmem:[%s14346_s1 + $0x38] sm:$0xff] %v11151_v16  ;;  %v11215_v16 = vld [vmem:[%s14345_s0 + $0xfb8] sm:$0xff] }
 0x193   :  { %10090 = vst [vmem:[%s14346_s1 + $0x438] sm:$0xff] %v11152_v17  ;;  %v11216_v17 = vld [vmem:[%s14345_s0 + $0xbb8] sm:$0xff] }
 0x194   :  { %10096 = vst [vmem:[%s14346_s1 + $0x838] sm:$0xff] %v11153_v18  ;;  %v11217_v18 = vld [vmem:[%s14345_s0 + $0x7b8] sm:$0xff] }
 0x195   :  { %10102 = vst [vmem:[%s14346_s1 + $0xc38] sm:$0xff] %v11154_v19  ;;  %v11218_v19 = vld [vmem:[%s14345_s0 + $0x3b8] sm:$0xff] }
 0x196   :  { %10108 = vst [vmem:[%s14346_s1 + $0x138] sm:$0xff] %v11155_v20  ;;  %v11219_v20 = vld [vmem:[%s14345_s0 + $0xeb8] sm:$0xff] }
 0x197   :  { %10114 = vst [vmem:[%s14346_s1 + $0x538] sm:$0xff] %v11156_v21  ;;  %v11220_v21 = vld [vmem:[%s14345_s0 + $0xab8] sm:$0xff] }
 0x198   :  { %10120 = vst [vmem:[%s14346_s1 + $0x938] sm:$0xff] %v11157_v22  ;;  %v11221_v22 = vld [vmem:[%s14345_s0 + $0x6b8] sm:$0xff] }
 0x199   :  { %10126 = vst [vmem:[%s14346_s1 + $0xd38] sm:$0xff] %v11158_v23  ;;  %v11222_v23 = vld [vmem:[%s14345_s0 + $0x2b8] sm:$0xff] }
 0x19a   :  { %10132 = vst [vmem:[%s14346_s1 + $0x238] sm:$0xff] %v11159_v24  ;;  %v11223_v24 = vld [vmem:[%s14345_s0 + $0xdb8] sm:$0xff] }
 0x19b   :  { %10138 = vst [vmem:[%s14346_s1 + $0x638] sm:$0xff] %v11160_v25  ;;  %v11224_v25 = vld [vmem:[%s14345_s0 + $0x9b8] sm:$0xff] }
 0x19c   :  { %10144 = vst [vmem:[%s14346_s1 + $0xa38] sm:$0xff] %v11161_v26  ;;  %v11225_v26 = vld [vmem:[%s14345_s0 + $0x5b8] sm:$0xff] }
 0x19d   :  { %10150 = vst [vmem:[%s14346_s1 + $0xe38] sm:$0xff] %v11162_v27  ;;  %v11226_v27 = vld [vmem:[%s14345_s0 + $0x1b8] sm:$0xff] }
 0x19e   :  { %10156 = vst [vmem:[%s14346_s1 + $0x338] sm:$0xff] %v11163_v28  ;;  %v11227_v28 = vld [vmem:[%s14345_s0 + $0xcb8] sm:$0xff] }
 0x19f   :  { %10162 = vst [vmem:[%s14346_s1 + $0x738] sm:$0xff] %v11164_v29  ;;  %v11228_v29 = vld [vmem:[%s14345_s0 + $0x8b8] sm:$0xff] }
 0x1a0   :  { %10168 = vst [vmem:[%s14346_s1 + $0xb38] sm:$0xff] %v11165_v30  ;;  %v11229_v30 = vld [vmem:[%s14345_s0 + $0x4b8] sm:$0xff] }
 0x1a1   :  { %10174 = vst [vmem:[%s14346_s1 + $0xf38] sm:$0xff] %v11166_v31  ;;  %v11230_v31 = vld [vmem:[%s14345_s0 + $0xb8] sm:$0xff] }
 0x1a2   :  { %10180 = vst [vmem:[%s14346_s1 + $0x58] sm:$0xff] %v11167_v32  ;;  %v11231_v32 = vld [vmem:[%s14345_s0 + $0xfd8] sm:$0xff] }
 0x1a3   :  { %10186 = vst [vmem:[%s14346_s1 + $0x458] sm:$0xff] %v11168_v33  ;;  %v11232_v33 = vld [vmem:[%s14345_s0 + $0xbd8] sm:$0xff] }
 0x1a4   :  { %10192 = vst [vmem:[%s14346_s1 + $0x858] sm:$0xff] %v11169_v34  ;;  %v11233_v34 = vld [vmem:[%s14345_s0 + $0x7d8] sm:$0xff] }
 0x1a5   :  { %10198 = vst [vmem:[%s14346_s1 + $0xc58] sm:$0xff] %v11170_v35  ;;  %v11234_v35 = vld [vmem:[%s14345_s0 + $0x3d8] sm:$0xff] }
 0x1a6   :  { %10204 = vst [vmem:[%s14346_s1 + $0x158] sm:$0xff] %v11171_v36  ;;  %v11235_v36 = vld [vmem:[%s14345_s0 + $0xed8] sm:$0xff] }
 0x1a7   :  { %10210 = vst [vmem:[%s14346_s1 + $0x558] sm:$0xff] %v11172_v37  ;;  %v11236_v37 = vld [vmem:[%s14345_s0 + $0xad8] sm:$0xff] }
 0x1a8   :  { %10216 = vst [vmem:[%s14346_s1 + $0x958] sm:$0xff] %v11173_v38  ;;  %v11237_v38 = vld [vmem:[%s14345_s0 + $0x6d8] sm:$0xff] }
 0x1a9   :  { %10222 = vst [vmem:[%s14346_s1 + $0xd58] sm:$0xff] %v11174_v39  ;;  %v11238_v39 = vld [vmem:[%s14345_s0 + $0x2d8] sm:$0xff] }
 0x1aa   :  { %10228 = vst [vmem:[%s14346_s1 + $0x258] sm:$0xff] %v11175_v40  ;;  %v11239_v40 = vld [vmem:[%s14345_s0 + $0xdd8] sm:$0xff] }
 0x1ab   :  { %10234 = vst [vmem:[%s14346_s1 + $0x658] sm:$0xff] %v11176_v41  ;;  %v11240_v41 = vld [vmem:[%s14345_s0 + $0x9d8] sm:$0xff] }
 0x1ac   :  { %10240 = vst [vmem:[%s14346_s1 + $0xa58] sm:$0xff] %v11177_v42  ;;  %v11241_v42 = vld [vmem:[%s14345_s0 + $0x5d8] sm:$0xff] }
 0x1ad   :  { %10246 = vst [vmem:[%s14346_s1 + $0xe58] sm:$0xff] %v11178_v43  ;;  %v11242_v43 = vld [vmem:[%s14345_s0 + $0x1d8] sm:$0xff] }
 0x1ae   :  { %10252 = vst [vmem:[%s14346_s1 + $0x358] sm:$0xff] %v11179_v44  ;;  %v11243_v44 = vld [vmem:[%s14345_s0 + $0xcd8] sm:$0xff] }
 0x1af   :  { %10258 = vst [vmem:[%s14346_s1 + $0x758] sm:$0xff] %v11180_v45  ;;  %v11244_v45 = vld [vmem:[%s14345_s0 + $0x8d8] sm:$0xff] }
 0x1b0   :  { %10264 = vst [vmem:[%s14346_s1 + $0xb58] sm:$0xff] %v11181_v46  ;;  %v11245_v46 = vld [vmem:[%s14345_s0 + $0x4d8] sm:$0xff] }
 0x1b1   :  { %10270 = vst [vmem:[%s14346_s1 + $0xf58] sm:$0xff] %v11182_v47  ;;  %v11246_v47 = vld [vmem:[%s14345_s0 + $0xd8] sm:$0xff] }
 0x1b2   :  { %10276 = vst [vmem:[%s14346_s1 + $0x78] sm:$0xff] %v11183_v48  ;;  %v11247_v48 = vld [vmem:[%s14345_s0 + $0xff8] sm:$0xff] }
 0x1b3   :  { %10282 = vst [vmem:[%s14346_s1 + $0x478] sm:$0xff] %v11184_v49  ;;  %v11248_v49 = vld [vmem:[%s14345_s0 + $0xbf8] sm:$0xff] }
 0x1b4   :  { %10288 = vst [vmem:[%s14346_s1 + $0x878] sm:$0xff] %v11185_v50  ;;  %v11249_v50 = vld [vmem:[%s14345_s0 + $0x7f8] sm:$0xff] }
 0x1b5   :  { %10294 = vst [vmem:[%s14346_s1 + $0xc78] sm:$0xff] %v11186_v51  ;;  %v11250_v51 = vld [vmem:[%s14345_s0 + $0x3f8] sm:$0xff] }
 0x1b6   :  { %10300 = vst [vmem:[%s14346_s1 + $0x178] sm:$0xff] %v11187_v52  ;;  %v11251_v52 = vld [vmem:[%s14345_s0 + $0xef8] sm:$0xff] }
 0x1b7   :  { %10306 = vst [vmem:[%s14346_s1 + $0x578] sm:$0xff] %v11188_v53  ;;  %v11252_v53 = vld [vmem:[%s14345_s0 + $0xaf8] sm:$0xff] }
 0x1b8   :  { %10312 = vst [vmem:[%s14346_s1 + $0x978] sm:$0xff] %v11189_v54  ;;  %v11253_v54 = vld [vmem:[%s14345_s0 + $0x6f8] sm:$0xff] }
 0x1b9   :  { %10318 = vst [vmem:[%s14346_s1 + $0xd78] sm:$0xff] %v11190_v55  ;;  %v11254_v55 = vld [vmem:[%s14345_s0 + $0x2f8] sm:$0xff] }
 0x1ba   :  { %10324 = vst [vmem:[%s14346_s1 + $0x278] sm:$0xff] %v11191_v56  ;;  %v11255_v56 = vld [vmem:[%s14345_s0 + $0xdf8] sm:$0xff] }
 0x1bb   :  { %10330 = vst [vmem:[%s14346_s1 + $0x678] sm:$0xff] %v11192_v57  ;;  %v11256_v57 = vld [vmem:[%s14345_s0 + $0x9f8] sm:$0xff] }
 0x1bc   :  { %10336 = vst [vmem:[%s14346_s1 + $0xa78] sm:$0xff] %v11193_v58  ;;  %v11257_v58 = vld [vmem:[%s14345_s0 + $0x5f8] sm:$0xff] }
 0x1bd   :  { %10342 = vst [vmem:[%s14346_s1 + $0xe78] sm:$0xff] %v11194_v59  ;;  %v11258_v59 = vld [vmem:[%s14345_s0 + $0x1f8] sm:$0xff] }
 0x1be   :  { %10348 = vst [vmem:[%s14346_s1 + $0x378] sm:$0xff] %v11195_v60  ;;  %v11259_v60 = vld [vmem:[%s14345_s0 + $0xcf8] sm:$0xff] }
 0x1bf   :  { %10354 = vst [vmem:[%s14346_s1 + $0x778] sm:$0xff] %v11196_v61  ;;  %v11260_v61 = vld [vmem:[%s14345_s0 + $0x8f8] sm:$0xff] }
 0x1c0   :  { %10360 = vst [vmem:[%s14346_s1 + $0xb78] sm:$0xff] %v11197_v62  ;;  %v11261_v62 = vld [vmem:[%s14345_s0 + $0x4f8] sm:$0xff] }
 0x1c1   :  { %10366 = vst [vmem:[%s14346_s1 + $0xf78] sm:$0xff] %v11198_v63  ;;  %v11262_v63 = vld [vmem:[%s14345_s0 + $0xf8] sm:$0xff] }
 0x1c2   :  { %10372 = vst [vmem:[%s14346_s1 + $0x98] sm:$0xff] %v11199_v0 }
 0x1c3   :  { %10378 = vst [vmem:[%s14346_s1 + $0x498] sm:$0xff] %v11200_v1 }
 0x1c4   :  { %10384 = vst [vmem:[%s14346_s1 + $0x898] sm:$0xff] %v11201_v2 }
 0x1c5   :  { %10390 = vst [vmem:[%s14346_s1 + $0xc98] sm:$0xff] %v11202_v3 }
 0x1c6   :  { %10396 = vst [vmem:[%s14346_s1 + $0x198] sm:$0xff] %v11203_v4 }
 0x1c7   :  { %10402 = vst [vmem:[%s14346_s1 + $0x598] sm:$0xff] %v11204_v5 }
 0x1c8   :  { %10408 = vst [vmem:[%s14346_s1 + $0x998] sm:$0xff] %v11205_v6 }
 0x1c9   :  { %10414 = vst [vmem:[%s14346_s1 + $0xd98] sm:$0xff] %v11206_v7 }
 0x1ca   :  { %10420 = vst [vmem:[%s14346_s1 + $0x298] sm:$0xff] %v11207_v8 }
 0x1cb   :  { %10426 = vst [vmem:[%s14346_s1 + $0x698] sm:$0xff] %v11208_v9 }
 0x1cc   :  { %10432 = vst [vmem:[%s14346_s1 + $0xa98] sm:$0xff] %v11209_v10 }
 0x1cd   :  { %10438 = vst [vmem:[%s14346_s1 + $0xe98] sm:$0xff] %v11210_v11 }
 0x1ce   :  { %10444 = vst [vmem:[%s14346_s1 + $0x398] sm:$0xff] %v11211_v12 }
 0x1cf   :  { %10450 = vst [vmem:[%s14346_s1 + $0x798] sm:$0xff] %v11212_v13 }
 0x1d0   :  { %10456 = vst [vmem:[%s14346_s1 + $0xb98] sm:$0xff] %v11213_v14 }
 0x1d1   :  { %10462 = vst [vmem:[%s14346_s1 + $0xf98] sm:$0xff] %v11214_v15 }
 0x1d2   :  { %10468 = vst [vmem:[%s14346_s1 + $0xb8] sm:$0xff] %v11215_v16 }
 0x1d3   :  { %10474 = vst [vmem:[%s14346_s1 + $0x4b8] sm:$0xff] %v11216_v17 }
 0x1d4   :  { %10480 = vst [vmem:[%s14346_s1 + $0x8b8] sm:$0xff] %v11217_v18 }
 0x1d5   :  { %10486 = vst [vmem:[%s14346_s1 + $0xcb8] sm:$0xff] %v11218_v19 }
 0x1d6   :  { %10492 = vst [vmem:[%s14346_s1 + $0x1b8] sm:$0xff] %v11219_v20 }
 0x1d7   :  { %10498 = vst [vmem:[%s14346_s1 + $0x5b8] sm:$0xff] %v11220_v21 }
 0x1d8   :  { %10504 = vst [vmem:[%s14346_s1 + $0x9b8] sm:$0xff] %v11221_v22 }
 0x1d9   :  { %10510 = vst [vmem:[%s14346_s1 + $0xdb8] sm:$0xff] %v11222_v23 }
 0x1da   :  { %10516 = vst [vmem:[%s14346_s1 + $0x2b8] sm:$0xff] %v11223_v24 }
 0x1db   :  { %10522 = vst [vmem:[%s14346_s1 + $0x6b8] sm:$0xff] %v11224_v25 }
 0x1dc   :  { %10528 = vst [vmem:[%s14346_s1 + $0xab8] sm:$0xff] %v11225_v26 }
 0x1dd   :  { %10534 = vst [vmem:[%s14346_s1 + $0xeb8] sm:$0xff] %v11226_v27 }
 0x1de   :  { %10540 = vst [vmem:[%s14346_s1 + $0x3b8] sm:$0xff] %v11227_v28 }
 0x1df   :  { %10546 = vst [vmem:[%s14346_s1 + $0x7b8] sm:$0xff] %v11228_v29 }
 0x1e0   :  { %10552 = vst [vmem:[%s14346_s1 + $0xbb8] sm:$0xff] %v11229_v30 }
 0x1e1   :  { %10558 = vst [vmem:[%s14346_s1 + $0xfb8] sm:$0xff] %v11230_v31 }
 0x1e2   :  { %10564 = vst [vmem:[%s14346_s1 + $0xd8] sm:$0xff] %v11231_v32 }
 0x1e3   :  { %10570 = vst [vmem:[%s14346_s1 + $0x4d8] sm:$0xff] %v11232_v33 }
 0x1e4   :  { %10576 = vst [vmem:[%s14346_s1 + $0x8d8] sm:$0xff] %v11233_v34 }
 0x1e5   :  { %10582 = vst [vmem:[%s14346_s1 + $0xcd8] sm:$0xff] %v11234_v35 }
 0x1e6   :  { %10588 = vst [vmem:[%s14346_s1 + $0x1d8] sm:$0xff] %v11235_v36 }
 0x1e7   :  { %10594 = vst [vmem:[%s14346_s1 + $0x5d8] sm:$0xff] %v11236_v37 }
 0x1e8   :  { %10600 = vst [vmem:[%s14346_s1 + $0x9d8] sm:$0xff] %v11237_v38 }
 0x1e9   :  { %10606 = vst [vmem:[%s14346_s1 + $0xdd8] sm:$0xff] %v11238_v39 }
 0x1ea   :  { %10612 = vst [vmem:[%s14346_s1 + $0x2d8] sm:$0xff] %v11239_v40 }
 0x1eb   :  { %10618 = vst [vmem:[%s14346_s1 + $0x6d8] sm:$0xff] %v11240_v41 }
 0x1ec   :  { %10624 = vst [vmem:[%s14346_s1 + $0xad8] sm:$0xff] %v11241_v42 }
 0x1ed   :  { %10630 = vst [vmem:[%s14346_s1 + $0xed8] sm:$0xff] %v11242_v43 }
 0x1ee   :  { %10636 = vst [vmem:[%s14346_s1 + $0x3d8] sm:$0xff] %v11243_v44 }
 0x1ef   :  { %10642 = vst [vmem:[%s14346_s1 + $0x7d8] sm:$0xff] %v11244_v45 }
 0x1f0   :  { %10648 = vst [vmem:[%s14346_s1 + $0xbd8] sm:$0xff] %v11245_v46 }
 0x1f1   :  { %10654 = vst [vmem:[%s14346_s1 + $0xfd8] sm:$0xff] %v11246_v47 }
 0x1f2   :  { %10660 = vst [vmem:[%s14346_s1 + $0xf8] sm:$0xff] %v11247_v48 }
 0x1f3   :  { %10666 = vst [vmem:[%s14346_s1 + $0x4f8] sm:$0xff] %v11248_v49 }
 0x1f4   :  { %10672 = vst [vmem:[%s14346_s1 + $0x8f8] sm:$0xff] %v11249_v50 }
 0x1f5   :  { %10678 = vst [vmem:[%s14346_s1 + $0xcf8] sm:$0xff] %v11250_v51 }
 0x1f6   :  { %10684 = vst [vmem:[%s14346_s1 + $0x1f8] sm:$0xff] %v11251_v52 }
 0x1f7   :  { %10690 = vst [vmem:[%s14346_s1 + $0x5f8] sm:$0xff] %v11252_v53 }
 0x1f8   :  { %10696 = vst [vmem:[%s14346_s1 + $0x9f8] sm:$0xff] %v11253_v54 }
 0x1f9   :  { %10702 = vst [vmem:[%s14346_s1 + $0xdf8] sm:$0xff] %v11254_v55 }
 0x1fa   :  { %10708 = vst [vmem:[%s14346_s1 + $0x2f8] sm:$0xff] %v11255_v56 }
 0x1fb   :  { %10714 = vst [vmem:[%s14346_s1 + $0x6f8] sm:$0xff] %v11256_v57 }
 0x1fc   :  { %10720 = vst [vmem:[%s14346_s1 + $0xaf8] sm:$0xff] %v11257_v58 }
 0x1fd   :  { %10726 = vst [vmem:[%s14346_s1 + $0xef8] sm:$0xff] %v11258_v59 }
 0x1fe   :  { %10732 = vst [vmem:[%s14346_s1 + $0x3f8] sm:$0xff] %v11259_v60 }
 0x1ff   :  { %10738 = vst [vmem:[%s14346_s1 + $0x7f8] sm:$0xff] %v11260_v61 }
 0x200   :  { %10744 = vst [vmem:[%s14346_s1 + $0xbf8] sm:$0xff] %v11261_v62 }
 0x201   :  { %10750 = vst [vmem:[%s14346_s1 + $0xff8] sm:$0xff] %v11262_v63 }

// kernel: _lambda_.8
= control target key start
LH: loop header
LB: loop body
LE: loop exit
PB: predicated region body
PF: predicated region fallthrough
CT: control target
= control target key end

     0   :  { %s1552_s1 = inlined_call_operand.vmem [shape: bf16[128,128], index: 1, kind: input, shape index: {}]   ;;  %s1553_s2 = inlined_call_operand.vmem [shape: f32[1,128], index: 2, kind: input, shape index: {}]   ;;  %s1554_s0 = inlined_call_operand.vmem [shape: bf16[512,128], index: 0, kind: input, shape index: {}]   ;;  %s1555_s3 = inlined_call_operand.vmem [shape: bf16[512,128], index: 3, kind: output, shape index: {}]  }
   0x1   :  { %v1030_v0 = vld [vmem:[%s1552_s1 + $0x38] sm:$0xff]  ;;  %v1029_v1 = vld [vmem:[%s1552_s1 + $0x30] sm:$0xff]  ;;  %v1028_v2 = vld [vmem:[%s1552_s1 + $0x28] sm:$0xff] }
   0x2   :  { %338 = vmatpush.bf16.msra.mxu0 %v1030_v0  ;;  %1222 = vmatpush.bf16.msra.mxu1 %v1030_v0  ;;  %v1027_v3 = vld [vmem:[%s1552_s1 + $0x20] sm:$0xff]  ;;  %v1026_v4 = vld [vmem:[%s1552_s1 + $0x18] sm:$0xff]  ;;  %v1025_v5 = vld [vmem:[%s1552_s1 + $0x10] sm:$0xff] }
   0x3   :  { %1223 = vmatpush.bf16.msra.mxu2 %v1030_v0  ;;  %1224 = vmatpush.bf16.msra.mxu3 %v1030_v0  ;;  %v1024_v6 = vld [vmem:[%s1552_s1 + $0x8] sm:$0xff]  ;;  %v1023_v7 = vld [vmem:[%s1552_s1] sm:$0xff]  ;;  %v993_v16 = vld [vmem:[%s1554_s0 + $0x10] sm:$0xff] }
   0x4   :  { %v991_v8 = vld [vmem:[%s1554_s0] sm:$0xff]  ;;  %v992_v12 = vld [vmem:[%s1554_s0 + $0x8] sm:$0xff]  ;;  %v1001_v17 = vld [vmem:[%s1554_s0 + $0x50] sm:$0xff] }
   0x5   :  { %v999_v9 = vld [vmem:[%s1554_s0 + $0x40] sm:$0xff]  ;;  %v1000_v13 = vld [vmem:[%s1554_s0 + $0x48] sm:$0xff]  ;;  %v1009_v18 = vld [vmem:[%s1554_s0 + $0x90] sm:$0xff] }
   0x6   :  { %339 = vmatpush.bf16.msra.mxu0 %v1029_v1  ;;  %1225 = vmatpush.bf16.msra.mxu1 %v1029_v1  ;;  %v1007_v10 = vld [vmem:[%s1554_s0 + $0x80] sm:$0xff]  ;;  %v1008_v14 = vld [vmem:[%s1554_s0 + $0x88] sm:$0xff]  ;;  %v1017_v19 = vld [vmem:[%s1554_s0 + $0xd0] sm:$0xff] }
   0x7   :  { %1226 = vmatpush.bf16.msra.mxu2 %v1029_v1  ;;  %1227 = vmatpush.bf16.msra.mxu3 %v1029_v1  ;;  %v1015_v11 = vld [vmem:[%s1554_s0 + $0xc0] sm:$0xff]  ;;  %v1016_v15 = vld [vmem:[%s1554_s0 + $0xc8] sm:$0xff]  ;;  %v994_v20 = vld [vmem:[%s1554_s0 + $0x18] sm:$0xff] }
   0x8   :  { %v1002_v21 = vld [vmem:[%s1554_s0 + $0x58] sm:$0xff]  ;;  %v995_v24 = vld [vmem:[%s1554_s0 + $0x20] sm:$0xff]  ;;  %v996_v28 = vld [vmem:[%s1554_s0 + $0x28] sm:$0xff] }
   0x9   :  { %v1010_v22 = vld [vmem:[%s1554_s0 + $0x98] sm:$0xff]  ;;  %v1003_v25 = vld [vmem:[%s1554_s0 + $0x60] sm:$0xff]  ;;  %v1004_v29 = vld [vmem:[%s1554_s0 + $0x68] sm:$0xff] }
   0xa   :  { %340 = vmatpush.bf16.msra.mxu0 %v1028_v2  ;;  %1228 = vmatpush.bf16.msra.mxu1 %v1028_v2  ;;  %v1018_v23 = vld [vmem:[%s1554_s0 + $0xd8] sm:$0xff]  ;;  %v1011_v26 = vld [vmem:[%s1554_s0 + $0xa0] sm:$0xff]  ;;  %v1012_v30 = vld [vmem:[%s1554_s0 + $0xa8] sm:$0xff] }
   0xb   :  { %1229 = vmatpush.bf16.msra.mxu2 %v1028_v2  ;;  %1230 = vmatpush.bf16.msra.mxu3 %v1028_v2  ;;  %v1019_v27 = vld [vmem:[%s1554_s0 + $0xe0] sm:$0xff]  ;;  %v1020_v31 = vld [vmem:[%s1554_s0 + $0xe8] sm:$0xff]  ;;  %v997_v32 = vld [vmem:[%s1554_s0 + $0x30] sm:$0xff] }
   0xc   :  { %v1005_v33 = vld [vmem:[%s1554_s0 + $0x70] sm:$0xff]  ;;  %v998_v36 = vld [vmem:[%s1554_s0 + $0x38] sm:$0xff]  ;;  %v1390_v42 = vld [vmem:[%s1553_s2] ss:$0 sm:$0xff] }
   0xd   :  { %v1013_v34 = vld [vmem:[%s1554_s0 + $0xb0] sm:$0xff]  ;;  %v1006_v37 = vld [vmem:[%s1554_s0 + $0x78] sm:$0xff] }
   0xe   :  { %341 = vmatpush.bf16.msra.mxu0 %v1027_v3  ;;  %1231 = vmatpush.bf16.msra.mxu1 %v1027_v3  ;;  %v1021_v35 = vld [vmem:[%s1554_s0 + $0xf0] sm:$0xff]  ;;  %v1014_v38 = vld [vmem:[%s1554_s0 + $0xb8] sm:$0xff] }
   0xf   :  { %1232 = vmatpush.bf16.msra.mxu2 %v1027_v3  ;;  %1233 = vmatpush.bf16.msra.mxu3 %v1027_v3  ;;  %v1022_v39 = vld [vmem:[%s1554_s0 + $0xf8] sm:$0xff] }
  0x12   :  { %342 = vmatpush.bf16.msra.mxu0 %v1026_v4  ;;  %1234 = vmatpush.bf16.msra.mxu1 %v1026_v4 }
  0x13   :  { %1235 = vmatpush.bf16.msra.mxu2 %v1026_v4  ;;  %1236 = vmatpush.bf16.msra.mxu3 %v1026_v4 }
  0x16   :  { %343 = vmatpush.bf16.msra.mxu0 %v1025_v5  ;;  %1237 = vmatpush.bf16.msra.mxu1 %v1025_v5 }
  0x17   :  { %1238 = vmatpush.bf16.msra.mxu2 %v1025_v5  ;;  %1239 = vmatpush.bf16.msra.mxu3 %v1025_v5 }
  0x1a   :  { %344 = vmatpush.bf16.msra.mxu0 %v1024_v6  ;;  %1240 = vmatpush.bf16.msra.mxu1 %v1024_v6 }
  0x1b   :  { %1241 = vmatpush.bf16.msra.mxu2 %v1024_v6  ;;  %1242 = vmatpush.bf16.msra.mxu3 %v1024_v6 }
  0x1e   :  { %345 = vmatpush.bf16.msra.mxu0 %v1023_v7  ;;  %1243 = vmatpush.bf16.msra.mxu1 %v1023_v7 }
  0x1f   :  { %1244 = vmatpush.bf16.msra.mxu2 %v1023_v7  ;;  %1245 = vmatpush.bf16.msra.mxu3 %v1023_v7 }
  0x21   :  { %346 = vmatmul.bf16.vlgmr.msra.gmra.mxu0 %v991_v8  ;;  %386 = vmatmul.bf16.vlgmr.msra.gmra.mxu1 %v999_v9 }
  0x22   :  { %426 = vmatmul.bf16.vlgmr.msra.gmra.mxu2 %v1007_v10  ;;  %466 = vmatmul.bf16.vlgmr.msra.gmra.mxu3 %v1015_v11 }
  0x31   :  { %351 = vmatmul.bf16.gmra.mxu0 %v992_v12  ;;  %391 = vmatmul.bf16.gmra.mxu1 %v1000_v13 }
  0x32   :  { %431 = vmatmul.bf16.gmra.mxu2 %v1008_v14  ;;  %471 = vmatmul.bf16.gmra.mxu3 %v1016_v15 }
  0x41   :  { %356 = vmatmul.bf16.gmra.mxu0 %v993_v16  ;;  %396 = vmatmul.bf16.gmra.mxu1 %v1001_v17 }
  0x42   :  { %436 = vmatmul.bf16.gmra.mxu2 %v1009_v18  ;;  %476 = vmatmul.bf16.gmra.mxu3 %v1017_v19 }
  0x51   :  { %361 = vmatmul.bf16.gmra.mxu0 %v994_v20  ;;  %401 = vmatmul.bf16.gmra.mxu1 %v1002_v21 }
  0x52   :  { %441 = vmatmul.bf16.gmra.mxu2 %v1010_v22  ;;  %481 = vmatmul.bf16.gmra.mxu3 %v1018_v23 }
  0x61   :  { %366 = vmatmul.bf16.gmra.mxu0 %v995_v24  ;;  %406 = vmatmul.bf16.gmra.mxu1 %v1003_v25 }
  0x62   :  { %446 = vmatmul.bf16.gmra.mxu2 %v1011_v26  ;;  %486 = vmatmul.bf16.gmra.mxu3 %v1019_v27 }
  0x71   :  { %371 = vmatmul.bf16.gmra.mxu0 %v996_v28  ;;  %411 = vmatmul.bf16.gmra.mxu1 %v1004_v29 }
  0x72   :  { %451 = vmatmul.bf16.gmra.mxu2 %v1012_v30  ;;  %491 = vmatmul.bf16.gmra.mxu3 %v1020_v31 }
  0x81   :  { %376 = vmatmul.bf16.gmra.mxu0 %v997_v32  ;;  %416 = vmatmul.bf16.gmra.mxu1 %v1005_v33 }
  0x82   :  { %456 = vmatmul.bf16.gmra.mxu2 %v1013_v34  ;;  %496 = vmatmul.bf16.gmra.mxu3 %v1021_v35 }
  0x91   :  { %381 = vmatmul.bf16.gmra.mxu0 %v998_v36  ;;  %421 = vmatmul.bf16.gmra.mxu1 %v1006_v37 }
  0x92   :  { %461 = vmatmul.bf16.gmra.mxu2 %v1014_v38  ;;  %501 = vmatmul.bf16.gmra.mxu3 %v1022_v39 }
  0x9e   :  { %v347_v40 = vpop.f32.mrf.mxu0  ;;  %v387_v41 = vpop.f32.mrf.mxu1 }
  0x9f   :  { %v348_v43 = vadd.f32 %v1390_v42, %v347_v40  ;;  %v388_v44 = vadd.f32 %v1390_v42, %v387_v41 }
  0xa1   :  { %v571_v49 = vmul.f32 0.2, %v348_v43  ;;  %v587_v50 = vmul.f32 0.2, %v388_v44  ;;  %vm507_vm0 = vcmp.gt.f32.partialorder %v348_v43, 0.0  ;;  %vm523_vm1 = vcmp.gt.f32.partialorder %v388_v44, 0.0 }
  0xa3   :  { %v635_v57 = vsel %vm507_vm0, %v348_v43, %v571_v49  ;;  %v651_v58 = vsel %vm523_vm1, %v388_v44, %v587_v50 }
  0xa5   :  { %v427_v45 = vpop.f32.mrf.mxu2  ;;  %v467_v46 = vpop.f32.mrf.mxu3 }
  0xa6   :  { %v349_v47 = vpop.f32.mrf.mxu0  ;;  %v389_v48 = vpop.f32.mrf.mxu1  ;;  %v428_v55 = vadd.f32 %v1390_v42, %v427_v45  ;;  %v468_v56 = vadd.f32 %v1390_v42, %v467_v46 }
  0xa7   :  { %v350_v51 = vadd.f32 %v1390_v42, %v349_v47  ;;  %v390_v52 = vadd.f32 %v1390_v42, %v389_v48 }
  0xa8   :  { %v603_v1 = vmul.f32 0.2, %v428_v55  ;;  %v619_v2 = vmul.f32 0.2, %v468_v56  ;;  %vm539_vm4 = vcmp.gt.f32.partialorder %v428_v55, 0.0  ;;  %vm555_vm5 = vcmp.gt.f32.partialorder %v468_v56, 0.0 }
  0xa9   :  { %vm508_vm2 = vcmp.gt.f32.partialorder %v350_v51, 0.0  ;;  %v572_v53 = vmul.f32 0.2, %v350_v51  ;;  %vm524_vm3 = vcmp.gt.f32.partialorder %v390_v52, 0.0  ;;  %v588_v54 = vmul.f32 0.2, %v390_v52 }
  0xaa   :  { %v667_v9 = vsel %vm539_vm4, %v428_v55, %v603_v1  ;;  %v683_v10 = vsel %vm555_vm5, %v468_v56, %v619_v2 }
  0xab   :  { %v636_v59 = vsel %vm508_vm2, %v350_v51, %v572_v53  ;;  %v652_v60 = vsel %vm524_vm3, %v390_v52, %v588_v54 }
  0xac   :  { %v1034_v61 = vpack.c.bf16 %v636_v59, %v635_v57  ;;  %v1074_v62 = vpack.c.bf16 %v652_v60, %v651_v58 }
  0xad   :  { %v429_v63 = vpop.f32.mrf.mxu2  ;;  %v469_v0 = vpop.f32.mrf.mxu3 }
  0xae   :  { %1035 = vst [vmem:[%s1555_s3] sm:$0xff] %v1034_v61   ;;  %v430_v3 = vadd.f32 %v1390_v42, %v429_v63  ;;  %v470_v4 = vadd.f32 %v1390_v42, %v469_v0  ;;  %v352_v5 = vpop.f32.mrf.mxu0  ;;  %v392_v6 = vpop.f32.mrf.mxu1 }
  0xaf   :  { %1198 = vst [vmem:[%s1555_s3 + $0x40] sm:$0xff] %v1074_v62   ;;  %v353_v15 = vadd.f32 %v1390_v42, %v352_v5  ;;  %v393_v16 = vadd.f32 %v1390_v42, %v392_v6 }
  0xb0   :  { %vm540_vm6 = vcmp.gt.f32.partialorder %v430_v3, 0.0  ;;  %v604_v7 = vmul.f32 0.2, %v430_v3  ;;  %vm556_vm7 = vcmp.gt.f32.partialorder %v470_v4, 0.0  ;;  %v620_v8 = vmul.f32 0.2, %v470_v4 }
  0xb1   :  { %v573_v21 = vmul.f32 0.2, %v353_v15  ;;  %v589_v22 = vmul.f32 0.2, %v393_v16  ;;  %vm509_vm8 = vcmp.gt.f32.partialorder %v353_v15, 0.0  ;;  %vm525_vm9 = vcmp.gt.f32.partialorder %v393_v16, 0.0 }
  0xb2   :  { %v668_v11 = vsel %vm540_vm6, %v430_v3, %v604_v7  ;;  %v684_v12 = vsel %vm556_vm7, %v470_v4, %v620_v8 }
  0xb3   :  { %v1114_v13 = vpack.c.bf16 %v668_v11, %v667_v9  ;;  %v1154_v14 = vpack.c.bf16 %v684_v12, %v683_v10  ;;  %v637_v29 = vsel %vm509_vm8, %v353_v15, %v573_v21  ;;  %v653_v30 = vsel %vm525_vm9, %v393_v16, %v589_v22 }
  0xb5   :  { %1206 = vst [vmem:[%s1555_s3 + $0x80] sm:$0xff] %v1114_v13   ;;  %v432_v17 = vpop.f32.mrf.mxu2  ;;  %v472_v18 = vpop.f32.mrf.mxu3 }
  0xb6   :  { %1214 = vst [vmem:[%s1555_s3 + $0xc0] sm:$0xff] %v1154_v14   ;;  %v354_v19 = vpop.f32.mrf.mxu0  ;;  %v394_v20 = vpop.f32.mrf.mxu1  ;;  %v433_v27 = vadd.f32 %v1390_v42, %v432_v17  ;;  %v473_v28 = vadd.f32 %v1390_v42, %v472_v18 }
  0xb7   :  { %v355_v23 = vadd.f32 %v1390_v42, %v354_v19  ;;  %v395_v24 = vadd.f32 %v1390_v42, %v394_v20 }
  0xb8   :  { %v605_v37 = vmul.f32 0.2, %v433_v27  ;;  %v621_v38 = vmul.f32 0.2, %v473_v28  ;;  %vm541_vm12 = vcmp.gt.f32.partialorder %v433_v27, 0.0  ;;  %vm557_vm13 = vcmp.gt.f32.partialorder %v473_v28, 0.0 }
  0xb9   :  { %vm510_vm10 = vcmp.gt.f32.partialorder %v355_v23, 0.0  ;;  %v574_v25 = vmul.f32 0.2, %v355_v23  ;;  %vm526_vm11 = vcmp.gt.f32.partialorder %v395_v24, 0.0  ;;  %v590_v26 = vmul.f32 0.2, %v395_v24 }
  0xba   :  { %v669_v46 = vsel %vm541_vm12, %v433_v27, %v605_v37  ;;  %v685_v47 = vsel %vm557_vm13, %v473_v28, %v621_v38 }
  0xbb   :  { %v638_v31 = vsel %vm510_vm10, %v355_v23, %v574_v25  ;;  %v654_v32 = vsel %vm526_vm11, %v395_v24, %v590_v26 }
  0xbc   :  { %v1039_v33 = vpack.c.bf16 %v638_v31, %v637_v29  ;;  %v1079_v34 = vpack.c.bf16 %v654_v32, %v653_v30 }
  0xbd   :  { %v434_v35 = vpop.f32.mrf.mxu2  ;;  %v474_v36 = vpop.f32.mrf.mxu3 }
  0xbe   :  { %1191 = vst [vmem:[%s1555_s3 + $0x8] sm:$0xff] %v1039_v33   ;;  %v435_v39 = vadd.f32 %v1390_v42, %v434_v35  ;;  %v475_v40 = vadd.f32 %v1390_v42, %v474_v36  ;;  %v357_v41 = vpop.f32.mrf.mxu0  ;;  %v397_v43 = vpop.f32.mrf.mxu1 }
  0xbf   :  { %1199 = vst [vmem:[%s1555_s3 + $0x48] sm:$0xff] %v1079_v34   ;;  %v358_v52 = vadd.f32 %v1390_v42, %v357_v41  ;;  %v398_v53 = vadd.f32 %v1390_v42, %v397_v43 }
  0xc0   :  { %vm542_vm14 = vcmp.gt.f32.partialorder %v435_v39, 0.0  ;;  %v606_v44 = vmul.f32 0.2, %v435_v39  ;;  %vm558_vm15 = vcmp.gt.f32.partialorder %v475_v40, 0.0  ;;  %v622_v45 = vmul.f32 0.2, %v475_v40 }
  0xc1   :  { %v575_v58 = vmul.f32 0.2, %v358_v52  ;;  %v591_v59 = vmul.f32 0.2, %v398_v53  ;;  %vm511_vm0 = vcmp.gt.f32.partialorder %v358_v52, 0.0  ;;  %vm527_vm1 = vcmp.gt.f32.partialorder %v398_v53, 0.0 }
  0xc2   :  { %v670_v48 = vsel %vm542_vm14, %v435_v39, %v606_v44  ;;  %v686_v49 = vsel %vm558_vm15, %v475_v40, %v622_v45 }
  0xc3   :  { %v1119_v50 = vpack.c.bf16 %v670_v48, %v669_v46  ;;  %v1159_v51 = vpack.c.bf16 %v686_v49, %v685_v47  ;;  %v639_v2 = vsel %vm511_vm0, %v358_v52, %v575_v58  ;;  %v655_v3 = vsel %vm527_vm1, %v398_v53, %v591_v59 }
  0xc5   :  { %1207 = vst [vmem:[%s1555_s3 + $0x88] sm:$0xff] %v1119_v50   ;;  %v437_v54 = vpop.f32.mrf.mxu2  ;;  %v477_v55 = vpop.f32.mrf.mxu3 }
  0xc6   :  { %1215 = vst [vmem:[%s1555_s3 + $0xc8] sm:$0xff] %v1159_v51   ;;  %v359_v56 = vpop.f32.mrf.mxu0  ;;  %v399_v57 = vpop.f32.mrf.mxu1  ;;  %v438_v0 = vadd.f32 %v1390_v42, %v437_v54  ;;  %v478_v1 = vadd.f32 %v1390_v42, %v477_v55 }
  0xc7   :  { %v360_v60 = vadd.f32 %v1390_v42, %v359_v56  ;;  %v400_v61 = vadd.f32 %v1390_v42, %v399_v57 }
  0xc8   :  { %v607_v10 = vmul.f32 0.2, %v438_v0  ;;  %v623_v11 = vmul.f32 0.2, %v478_v1  ;;  %vm543_vm4 = vcmp.gt.f32.partialorder %v438_v0, 0.0  ;;  %vm559_vm5 = vcmp.gt.f32.partialorder %v478_v1, 0.0 }
  0xc9   :  { %vm512_vm2 = vcmp.gt.f32.partialorder %v360_v60, 0.0  ;;  %v576_v62 = vmul.f32 0.2, %v360_v60  ;;  %vm528_vm3 = vcmp.gt.f32.partialorder %v400_v61, 0.0  ;;  %v592_v63 = vmul.f32 0.2, %v400_v61 }
  0xca   :  { %v671_v18 = vsel %vm543_vm4, %v438_v0, %v607_v10  ;;  %v687_v19 = vsel %vm559_vm5, %v478_v1, %v623_v11 }
  0xcb   :  { %v640_v4 = vsel %vm512_vm2, %v360_v60, %v576_v62  ;;  %v656_v5 = vsel %vm528_vm3, %v400_v61, %v592_v63 }
  0xcc   :  { %v1044_v6 = vpack.c.bf16 %v640_v4, %v639_v2  ;;  %v1084_v7 = vpack.c.bf16 %v656_v5, %v655_v3 }
  0xcd   :  { %v439_v8 = vpop.f32.mrf.mxu2  ;;  %v479_v9 = vpop.f32.mrf.mxu3 }
  0xce   :  { %1192 = vst [vmem:[%s1555_s3 + $0x10] sm:$0xff] %v1044_v6   ;;  %v440_v12 = vadd.f32 %v1390_v42, %v439_v8  ;;  %v480_v13 = vadd.f32 %v1390_v42, %v479_v9  ;;  %v362_v14 = vpop.f32.mrf.mxu0  ;;  %v402_v15 = vpop.f32.mrf.mxu1 }
  0xcf   :  { %1200 = vst [vmem:[%s1555_s3 + $0x50] sm:$0xff] %v1084_v7   ;;  %v363_v24 = vadd.f32 %v1390_v42, %v362_v14  ;;  %v403_v25 = vadd.f32 %v1390_v42, %v402_v15 }
  0xd0   :  { %vm544_vm6 = vcmp.gt.f32.partialorder %v440_v12, 0.0  ;;  %v608_v16 = vmul.f32 0.2, %v440_v12  ;;  %vm560_vm7 = vcmp.gt.f32.partialorder %v480_v13, 0.0  ;;  %v624_v17 = vmul.f32 0.2, %v480_v13 }
  0xd1   :  { %v577_v30 = vmul.f32 0.2, %v363_v24  ;;  %v593_v31 = vmul.f32 0.2, %v403_v25  ;;  %vm513_vm8 = vcmp.gt.f32.partialorder %v363_v24, 0.0  ;;  %vm529_vm9 = vcmp.gt.f32.partialorder %v403_v25, 0.0 }
  0xd2   :  { %v672_v20 = vsel %vm544_vm6, %v440_v12, %v608_v16  ;;  %v688_v21 = vsel %vm560_vm7, %v480_v13, %v624_v17 }
  0xd3   :  { %v1124_v22 = vpack.c.bf16 %v672_v20, %v671_v18  ;;  %v1164_v23 = vpack.c.bf16 %v688_v21, %v687_v19  ;;  %v641_v38 = vsel %vm513_vm8, %v363_v24, %v577_v30  ;;  %v657_v39 = vsel %vm529_vm9, %v403_v25, %v593_v31 }
  0xd5   :  { %1208 = vst [vmem:[%s1555_s3 + $0x90] sm:$0xff] %v1124_v22   ;;  %v442_v26 = vpop.f32.mrf.mxu2  ;;  %v482_v27 = vpop.f32.mrf.mxu3 }
  0xd6   :  { %1216 = vst [vmem:[%s1555_s3 + $0xd0] sm:$0xff] %v1164_v23   ;;  %v364_v28 = vpop.f32.mrf.mxu0  ;;  %v404_v29 = vpop.f32.mrf.mxu1  ;;  %v443_v36 = vadd.f32 %v1390_v42, %v442_v26  ;;  %v483_v37 = vadd.f32 %v1390_v42, %v482_v27 }
  0xd7   :  { %v365_v32 = vadd.f32 %v1390_v42, %v364_v28  ;;  %v405_v33 = vadd.f32 %v1390_v42, %v404_v29 }
  0xd8   :  { %v609_v47 = vmul.f32 0.2, %v443_v36  ;;  %v625_v48 = vmul.f32 0.2, %v483_v37  ;;  %vm545_vm12 = vcmp.gt.f32.partialorder %v443_v36, 0.0  ;;  %vm561_vm13 = vcmp.gt.f32.partialorder %v483_v37, 0.0 }
  0xd9   :  { %vm514_vm10 = vcmp.gt.f32.partialorder %v365_v32, 0.0  ;;  %v578_v34 = vmul.f32 0.2, %v365_v32  ;;  %vm530_vm11 = vcmp.gt.f32.partialorder %v405_v33, 0.0  ;;  %v594_v35 = vmul.f32 0.2, %v405_v33 }
  0xda   :  { %v673_v55 = vsel %vm545_vm12, %v443_v36, %v609_v47  ;;  %v689_v56 = vsel %vm561_vm13, %v483_v37, %v625_v48 }
  0xdb   :  { %v642_v40 = vsel %vm514_vm10, %v365_v32, %v578_v34  ;;  %v658_v41 = vsel %vm530_vm11, %v405_v33, %v594_v35 }
  0xdc   :  { %v1049_v43 = vpack.c.bf16 %v642_v40, %v641_v38  ;;  %v1089_v44 = vpack.c.bf16 %v658_v41, %v657_v39 }
  0xdd   :  { %v444_v45 = vpop.f32.mrf.mxu2  ;;  %v484_v46 = vpop.f32.mrf.mxu3 }
  0xde   :  { %1193 = vst [vmem:[%s1555_s3 + $0x18] sm:$0xff] %v1049_v43   ;;  %v445_v49 = vadd.f32 %v1390_v42, %v444_v45  ;;  %v485_v50 = vadd.f32 %v1390_v42, %v484_v46  ;;  %v367_v51 = vpop.f32.mrf.mxu0  ;;  %v407_v52 = vpop.f32.mrf.mxu1 }
  0xdf   :  { %1201 = vst [vmem:[%s1555_s3 + $0x58] sm:$0xff] %v1089_v44   ;;  %v368_v61 = vadd.f32 %v1390_v42, %v367_v51  ;;  %v408_v62 = vadd.f32 %v1390_v42, %v407_v52 }
  0xe0   :  { %vm546_vm14 = vcmp.gt.f32.partialorder %v445_v49, 0.0  ;;  %v610_v53 = vmul.f32 0.2, %v445_v49  ;;  %vm562_vm15 = vcmp.gt.f32.partialorder %v485_v50, 0.0  ;;  %v626_v54 = vmul.f32 0.2, %v485_v50 }
  0xe1   :  { %v579_v3 = vmul.f32 0.2, %v368_v61  ;;  %v595_v4 = vmul.f32 0.2, %v408_v62  ;;  %vm515_vm0 = vcmp.gt.f32.partialorder %v368_v61, 0.0  ;;  %vm531_vm1 = vcmp.gt.f32.partialorder %v408_v62, 0.0 }
  0xe2   :  { %v674_v57 = vsel %vm546_vm14, %v445_v49, %v610_v53  ;;  %v690_v58 = vsel %vm562_vm15, %v485_v50, %v626_v54 }
  0xe3   :  { %v1129_v59 = vpack.c.bf16 %v674_v57, %v673_v55  ;;  %v1169_v60 = vpack.c.bf16 %v690_v58, %v689_v56  ;;  %v643_v11 = vsel %vm515_vm0, %v368_v61, %v579_v3  ;;  %v659_v12 = vsel %vm531_vm1, %v408_v62, %v595_v4 }
  0xe5   :  { %1209 = vst [vmem:[%s1555_s3 + $0x98] sm:$0xff] %v1129_v59   ;;  %v447_v63 = vpop.f32.mrf.mxu2  ;;  %v487_v0 = vpop.f32.mrf.mxu3 }
  0xe6   :  { %1217 = vst [vmem:[%s1555_s3 + $0xd8] sm:$0xff] %v1169_v60   ;;  %v369_v1 = vpop.f32.mrf.mxu0  ;;  %v409_v2 = vpop.f32.mrf.mxu1  ;;  %v448_v9 = vadd.f32 %v1390_v42, %v447_v63  ;;  %v488_v10 = vadd.f32 %v1390_v42, %v487_v0 }
  0xe7   :  { %v370_v5 = vadd.f32 %v1390_v42, %v369_v1  ;;  %v410_v6 = vadd.f32 %v1390_v42, %v409_v2 }
  0xe8   :  { %v611_v19 = vmul.f32 0.2, %v448_v9  ;;  %v627_v20 = vmul.f32 0.2, %v488_v10  ;;  %vm547_vm4 = vcmp.gt.f32.partialorder %v448_v9, 0.0  ;;  %vm563_vm5 = vcmp.gt.f32.partialorder %v488_v10, 0.0 }
  0xe9   :  { %vm516_vm2 = vcmp.gt.f32.partialorder %v370_v5, 0.0  ;;  %v580_v7 = vmul.f32 0.2, %v370_v5  ;;  %vm532_vm3 = vcmp.gt.f32.partialorder %v410_v6, 0.0  ;;  %v596_v8 = vmul.f32 0.2, %v410_v6 }
  0xea   :  { %v675_v27 = vsel %vm547_vm4, %v448_v9, %v611_v19  ;;  %v691_v28 = vsel %vm563_vm5, %v488_v10, %v627_v20 }
  0xeb   :  { %v644_v13 = vsel %vm516_vm2, %v370_v5, %v580_v7  ;;  %v660_v14 = vsel %vm532_vm3, %v410_v6, %v596_v8 }
  0xec   :  { %v1054_v15 = vpack.c.bf16 %v644_v13, %v643_v11  ;;  %v1094_v16 = vpack.c.bf16 %v660_v14, %v659_v12 }
  0xed   :  { %v449_v17 = vpop.f32.mrf.mxu2  ;;  %v489_v18 = vpop.f32.mrf.mxu3 }
  0xee   :  { %1194 = vst [vmem:[%s1555_s3 + $0x20] sm:$0xff] %v1054_v15   ;;  %v450_v21 = vadd.f32 %v1390_v42, %v449_v17  ;;  %v490_v22 = vadd.f32 %v1390_v42, %v489_v18  ;;  %v372_v23 = vpop.f32.mrf.mxu0  ;;  %v412_v24 = vpop.f32.mrf.mxu1 }
  0xef   :  { %1202 = vst [vmem:[%s1555_s3 + $0x60] sm:$0xff] %v1094_v16   ;;  %v373_v33 = vadd.f32 %v1390_v42, %v372_v23  ;;  %v413_v34 = vadd.f32 %v1390_v42, %v412_v24 }
  0xf0   :  { %vm548_vm6 = vcmp.gt.f32.partialorder %v450_v21, 0.0  ;;  %v612_v25 = vmul.f32 0.2, %v450_v21  ;;  %vm564_vm7 = vcmp.gt.f32.partialorder %v490_v22, 0.0  ;;  %v628_v26 = vmul.f32 0.2, %v490_v22 }
  0xf1   :  { %v581_v39 = vmul.f32 0.2, %v373_v33  ;;  %v597_v40 = vmul.f32 0.2, %v413_v34  ;;  %vm517_vm8 = vcmp.gt.f32.partialorder %v373_v33, 0.0  ;;  %vm533_vm9 = vcmp.gt.f32.partialorder %v413_v34, 0.0 }
  0xf2   :  { %v676_v29 = vsel %vm548_vm6, %v450_v21, %v612_v25  ;;  %v692_v30 = vsel %vm564_vm7, %v490_v22, %v628_v26 }
  0xf3   :  { %v1134_v31 = vpack.c.bf16 %v676_v29, %v675_v27  ;;  %v1174_v32 = vpack.c.bf16 %v692_v30, %v691_v28  ;;  %v645_v48 = vsel %vm517_vm8, %v373_v33, %v581_v39  ;;  %v661_v49 = vsel %vm533_vm9, %v413_v34, %v597_v40 }
  0xf5   :  { %1210 = vst [vmem:[%s1555_s3 + $0xa0] sm:$0xff] %v1134_v31   ;;  %v452_v35 = vpop.f32.mrf.mxu2  ;;  %v492_v36 = vpop.f32.mrf.mxu3 }
  0xf6   :  { %1218 = vst [vmem:[%s1555_s3 + $0xe0] sm:$0xff] %v1174_v32   ;;  %v374_v37 = vpop.f32.mrf.mxu0  ;;  %v414_v38 = vpop.f32.mrf.mxu1  ;;  %v453_v46 = vadd.f32 %v1390_v42, %v452_v35  ;;  %v493_v47 = vadd.f32 %v1390_v42, %v492_v36 }
  0xf7   :  { %v375_v41 = vadd.f32 %v1390_v42, %v374_v37  ;;  %v415_v43 = vadd.f32 %v1390_v42, %v414_v38 }
  0xf8   :  { %v613_v56 = vmul.f32 0.2, %v453_v46  ;;  %v629_v57 = vmul.f32 0.2, %v493_v47  ;;  %vm549_vm12 = vcmp.gt.f32.partialorder %v453_v46, 0.0  ;;  %vm565_vm13 = vcmp.gt.f32.partialorder %v493_v47, 0.0 }
  0xf9   :  { %vm518_vm10 = vcmp.gt.f32.partialorder %v375_v41, 0.0  ;;  %v582_v44 = vmul.f32 0.2, %v375_v41  ;;  %vm534_vm11 = vcmp.gt.f32.partialorder %v415_v43, 0.0  ;;  %v598_v45 = vmul.f32 0.2, %v415_v43 }
  0xfa   :  { %v677_v0 = vsel %vm549_vm12, %v453_v46, %v613_v56  ;;  %v693_v1 = vsel %vm565_vm13, %v493_v47, %v629_v57 }
  0xfb   :  { %v646_v50 = vsel %vm518_vm10, %v375_v41, %v582_v44  ;;  %v662_v51 = vsel %vm534_vm11, %v415_v43, %v598_v45 }
  0xfc   :  { %v1059_v52 = vpack.c.bf16 %v646_v50, %v645_v48  ;;  %v1099_v53 = vpack.c.bf16 %v662_v51, %v661_v49 }
  0xfd   :  { %v454_v54 = vpop.f32.mrf.mxu2  ;;  %v494_v55 = vpop.f32.mrf.mxu3 }
  0xfe   :  { %1195 = vst [vmem:[%s1555_s3 + $0x28] sm:$0xff] %v1059_v52   ;;  %v455_v58 = vadd.f32 %v1390_v42, %v454_v54  ;;  %v495_v59 = vadd.f32 %v1390_v42, %v494_v55  ;;  %v377_v60 = vpop.f32.mrf.mxu0  ;;  %v417_v61 = vpop.f32.mrf.mxu1 }
  0xff   :  { %1203 = vst [vmem:[%s1555_s3 + $0x68] sm:$0xff] %v1099_v53   ;;  %v378_v6 = vadd.f32 %v1390_v42, %v377_v60  ;;  %v418_v7 = vadd.f32 %v1390_v42, %v417_v61 }
 0x100   :  { %vm550_vm14 = vcmp.gt.f32.partialorder %v455_v58, 0.0  ;;  %v614_v62 = vmul.f32 0.2, %v455_v58  ;;  %vm566_vm15 = vcmp.gt.f32.partialorder %v495_v59, 0.0  ;;  %v630_v63 = vmul.f32 0.2, %v495_v59 }
 0x101   :  { %v583_v12 = vmul.f32 0.2, %v378_v6  ;;  %v599_v13 = vmul.f32 0.2, %v418_v7  ;;  %vm519_vm0 = vcmp.gt.f32.partialorder %v378_v6, 0.0  ;;  %vm535_vm1 = vcmp.gt.f32.partialorder %v418_v7, 0.0 }
 0x102   :  { %v678_v2 = vsel %vm550_vm14, %v455_v58, %v614_v62  ;;  %v694_v3 = vsel %vm566_vm15, %v495_v59, %v630_v63 }
 0x103   :  { %v1139_v4 = vpack.c.bf16 %v678_v2, %v677_v0  ;;  %v1179_v5 = vpack.c.bf16 %v694_v3, %v693_v1  ;;  %v647_v20 = vsel %vm519_vm0, %v378_v6, %v583_v12  ;;  %v663_v21 = vsel %vm535_vm1, %v418_v7, %v599_v13 }
 0x105   :  { %1211 = vst [vmem:[%s1555_s3 + $0xa8] sm:$0xff] %v1139_v4   ;;  %v457_v8 = vpop.f32.mrf.mxu2  ;;  %v497_v9 = vpop.f32.mrf.mxu3 }
 0x106   :  { %1219 = vst [vmem:[%s1555_s3 + $0xe8] sm:$0xff] %v1179_v5   ;;  %v379_v10 = vpop.f32.mrf.mxu0  ;;  %v419_v11 = vpop.f32.mrf.mxu1  ;;  %v458_v18 = vadd.f32 %v1390_v42, %v457_v8  ;;  %v498_v19 = vadd.f32 %v1390_v42, %v497_v9 }
 0x107   :  { %v380_v14 = vadd.f32 %v1390_v42, %v379_v10  ;;  %v420_v15 = vadd.f32 %v1390_v42, %v419_v11 }
 0x108   :  { %v615_v28 = vmul.f32 0.2, %v458_v18  ;;  %v631_v29 = vmul.f32 0.2, %v498_v19  ;;  %vm551_vm4 = vcmp.gt.f32.partialorder %v458_v18, 0.0  ;;  %vm567_vm5 = vcmp.gt.f32.partialorder %v498_v19, 0.0 }
 0x109   :  { %vm520_vm2 = vcmp.gt.f32.partialorder %v380_v14, 0.0  ;;  %v584_v16 = vmul.f32 0.2, %v380_v14  ;;  %vm536_vm3 = vcmp.gt.f32.partialorder %v420_v15, 0.0  ;;  %v600_v17 = vmul.f32 0.2, %v420_v15 }
 0x10a   :  { %v679_v36 = vsel %vm551_vm4, %v458_v18, %v615_v28  ;;  %v695_v37 = vsel %vm567_vm5, %v498_v19, %v631_v29 }
 0x10b   :  { %v648_v22 = vsel %vm520_vm2, %v380_v14, %v584_v16  ;;  %v664_v23 = vsel %vm536_vm3, %v420_v15, %v600_v17 }
 0x10c   :  { %v1064_v24 = vpack.c.bf16 %v648_v22, %v647_v20  ;;  %v1104_v25 = vpack.c.bf16 %v664_v23, %v663_v21 }
 0x10d   :  { %v459_v26 = vpop.f32.mrf.mxu2  ;;  %v499_v27 = vpop.f32.mrf.mxu3 }
 0x10e   :  { %1196 = vst [vmem:[%s1555_s3 + $0x30] sm:$0xff] %v1064_v24   ;;  %v460_v30 = vadd.f32 %v1390_v42, %v459_v26  ;;  %v500_v31 = vadd.f32 %v1390_v42, %v499_v27  ;;  %v382_v32 = vpop.f32.mrf.mxu0  ;;  %v422_v33 = vpop.f32.mrf.mxu1 }
 0x10f   :  { %1204 = vst [vmem:[%s1555_s3 + $0x70] sm:$0xff] %v1104_v25   ;;  %v383_v43 = vadd.f32 %v1390_v42, %v382_v32  ;;  %v423_v44 = vadd.f32 %v1390_v42, %v422_v33 }
 0x110   :  { %vm552_vm6 = vcmp.gt.f32.partialorder %v460_v30, 0.0  ;;  %v616_v34 = vmul.f32 0.2, %v460_v30  ;;  %vm568_vm7 = vcmp.gt.f32.partialorder %v500_v31, 0.0  ;;  %v632_v35 = vmul.f32 0.2, %v500_v31 }
 0x111   :  { %v585_v49 = vmul.f32 0.2, %v383_v43  ;;  %v601_v50 = vmul.f32 0.2, %v423_v44  ;;  %vm521_vm8 = vcmp.gt.f32.partialorder %v383_v43, 0.0  ;;  %vm537_vm9 = vcmp.gt.f32.partialorder %v423_v44, 0.0 }
 0x112   :  { %v680_v38 = vsel %vm552_vm6, %v460_v30, %v616_v34  ;;  %v696_v39 = vsel %vm568_vm7, %v500_v31, %v632_v35 }
 0x113   :  { %v1144_v40 = vpack.c.bf16 %v680_v38, %v679_v36  ;;  %v1184_v41 = vpack.c.bf16 %v696_v39, %v695_v37  ;;  %v649_v57 = vsel %vm521_vm8, %v383_v43, %v585_v49  ;;  %v665_v58 = vsel %vm537_vm9, %v423_v44, %v601_v50 }
 0x115   :  { %1212 = vst [vmem:[%s1555_s3 + $0xb0] sm:$0xff] %v1144_v40   ;;  %v462_v45 = vpop.f32.mrf.mxu2  ;;  %v502_v46 = vpop.f32.mrf.mxu3 }
 0x116   :  { %1220 = vst [vmem:[%s1555_s3 + $0xf0] sm:$0xff] %v1184_v41   ;;  %v384_v47 = vpop.f32.mrf.mxu0  ;;  %v424_v48 = vpop.f32.mrf.mxu1  ;;  %v463_v55 = vadd.f32 %v1390_v42, %v462_v45  ;;  %v503_v56 = vadd.f32 %v1390_v42, %v502_v46 }
 0x117   :  { %v385_v51 = vadd.f32 %v1390_v42, %v384_v47  ;;  %v425_v52 = vadd.f32 %v1390_v42, %v424_v48 }
 0x118   :  { %v617_v1 = vmul.f32 0.2, %v463_v55  ;;  %v633_v2 = vmul.f32 0.2, %v503_v56  ;;  %vm553_vm12 = vcmp.gt.f32.partialorder %v463_v55, 0.0  ;;  %vm569_vm13 = vcmp.gt.f32.partialorder %v503_v56, 0.0 }
 0x119   :  { %vm522_vm10 = vcmp.gt.f32.partialorder %v385_v51, 0.0  ;;  %v586_v53 = vmul.f32 0.2, %v385_v51  ;;  %vm538_vm11 = vcmp.gt.f32.partialorder %v425_v52, 0.0  ;;  %v602_v54 = vmul.f32 0.2, %v425_v52 }
 0x11a   :  { %v681_v7 = vsel %vm553_vm12, %v463_v55, %v617_v1  ;;  %v697_v8 = vsel %vm569_vm13, %v503_v56, %v633_v2 }
 0x11b   :  { %v650_v59 = vsel %vm522_vm10, %v385_v51, %v586_v53  ;;  %v666_v60 = vsel %vm538_vm11, %v425_v52, %v602_v54 }
 0x11c   :  { %v1069_v61 = vpack.c.bf16 %v650_v59, %v649_v57  ;;  %v1109_v62 = vpack.c.bf16 %v666_v60, %v665_v58 }
 0x11d   :  { %v464_v63 = vpop.f32.mrf.mxu2  ;;  %v504_v0 = vpop.f32.mrf.mxu3 }
 0x11e   :  { %1197 = vst [vmem:[%s1555_s3 + $0x38] sm:$0xff] %v1069_v61   ;;  %v465_v3 = vadd.f32 %v1390_v42, %v464_v63  ;;  %v505_v4 = vadd.f32 %v1390_v42, %v504_v0 }
 0x11f   :  { %1205 = vst [vmem:[%s1555_s3 + $0x78] sm:$0xff] %v1109_v62  }
 0x120   :  { %vm554_vm14 = vcmp.gt.f32.partialorder %v465_v3, 0.0  ;;  %v618_v5 = vmul.f32 0.2, %v465_v3  ;;  %vm570_vm15 = vcmp.gt.f32.partialorder %v505_v4, 0.0  ;;  %v634_v6 = vmul.f32 0.2, %v505_v4 }
 0x122   :  { %v682_v9 = vsel %vm554_vm14, %v465_v3, %v618_v5  ;;  %v698_v10 = vsel %vm570_vm15, %v505_v4, %v634_v6 }
 0x123   :  { %v1149_v11 = vpack.c.bf16 %v682_v9, %v681_v7  ;;  %v1189_v12 = vpack.c.bf16 %v698_v10, %v697_v8 }
 0x125   :  { %1213 = vst [vmem:[%s1555_s3 + $0xb8] sm:$0xff] %v1149_v11  }
 0x126   :  { %1221 = vst [vmem:[%s1555_s3 + $0xf8] sm:$0xff] %v1189_v12  }

// kernel: _lambda_.9
= control target key start
LH: loop header
LB: loop body
LE: loop exit
PB: predicated region body
PF: predicated region fallthrough
CT: control target
= control target key end

     0   :  { %vm255_vm0 = vcmask 1040384   ;;  %vm257_vm1 = vcmask 1041408   ;;  %s522_s1 = inlined_call_operand.vmem [shape: bf16[128,128], index: 1, kind: input, shape index: {}]   ;;  %s523_s2 = inlined_call_operand.vmem [shape: f32[1,128], index: 2, kind: input, shape index: {}]   ;;  %s524_s0 = inlined_call_operand.vmem [shape: bf16[128,128], index: 0, kind: input, shape index: {}]   ;;  %s525_s3 = inlined_call_operand.vmem [shape: f32[128,128], index: 3, kind: output, shape index: {0}]   ;;  %s526_s4 = inlined_call_operand.vmem [shape: f32[1,8,128], index: 4, kind: output, shape index: {1}]  }
   0x1   :  { %v363_v0 = vld [vmem:[%s522_s1 + $0x38] sm:$0xff]  ;;  %v362_v1 = vld [vmem:[%s522_s1 + $0x30] sm:$0xff]  ;;  %v361_v2 = vld [vmem:[%s522_s1 + $0x28] sm:$0xff] }
   0x2   :  { %148 = vmatpush.bf16.msra.mxu0 %v363_v0  ;;  %364 = vmatpush.bf16.msra.mxu1 %v363_v0  ;;  %v360_v3 = vld [vmem:[%s522_s1 + $0x20] sm:$0xff]  ;;  %v359_v4 = vld [vmem:[%s522_s1 + $0x18] sm:$0xff]  ;;  %v358_v5 = vld [vmem:[%s522_s1 + $0x10] sm:$0xff] }
   0x3   :  { %365 = vmatpush.bf16.msra.mxu2 %v363_v0  ;;  %366 = vmatpush.bf16.msra.mxu3 %v363_v0  ;;  %v357_v6 = vld [vmem:[%s522_s1 + $0x8] sm:$0xff]  ;;  %v356_v7 = vld [vmem:[%s522_s1] sm:$0xff]  ;;  %v350_v9 = vld [vmem:[%s524_s0 + $0x10] sm:$0xff] }
   0x4   :  { %v348_v8 = vld [vmem:[%s524_s0] sm:$0xff]  ;;  %v354_v11 = vld [vmem:[%s524_s0 + $0x30] sm:$0xff]  ;;  %v349_v12 = vld [vmem:[%s524_s0 + $0x8] sm:$0xff] }
   0x5   :  { %v352_v10 = vld [vmem:[%s524_s0 + $0x20] sm:$0xff]  ;;  %v351_v13 = vld [vmem:[%s524_s0 + $0x18] sm:$0xff]  ;;  %v353_v14 = vld [vmem:[%s524_s0 + $0x28] sm:$0xff] }
   0x6   :  { %149 = vmatpush.bf16.msra.mxu0 %v362_v1  ;;  %367 = vmatpush.bf16.msra.mxu1 %v362_v1  ;;  %v355_v15 = vld [vmem:[%s524_s0 + $0x38] sm:$0xff]  ;;  %v388_v16 = vld [vmem:[%s523_s2] ss:$0 sm:$0xff] }
   0x7   :  { %368 = vmatpush.bf16.msra.mxu2 %v362_v1  ;;  %369 = vmatpush.bf16.msra.mxu3 %v362_v1 }
   0xa   :  { %150 = vmatpush.bf16.msra.mxu0 %v361_v2  ;;  %370 = vmatpush.bf16.msra.mxu1 %v361_v2 }
   0xb   :  { %371 = vmatpush.bf16.msra.mxu2 %v361_v2  ;;  %372 = vmatpush.bf16.msra.mxu3 %v361_v2 }
   0xe   :  { %151 = vmatpush.bf16.msra.mxu0 %v360_v3  ;;  %373 = vmatpush.bf16.msra.mxu1 %v360_v3 }
   0xf   :  { %374 = vmatpush.bf16.msra.mxu2 %v360_v3  ;;  %375 = vmatpush.bf16.msra.mxu3 %v360_v3 }
  0x12   :  { %152 = vmatpush.bf16.msra.mxu0 %v359_v4  ;;  %376 = vmatpush.bf16.msra.mxu1 %v359_v4 }
  0x13   :  { %377 = vmatpush.bf16.msra.mxu2 %v359_v4  ;;  %378 = vmatpush.bf16.msra.mxu3 %v359_v4 }
  0x16   :  { %153 = vmatpush.bf16.msra.mxu0 %v358_v5  ;;  %379 = vmatpush.bf16.msra.mxu1 %v358_v5 }
  0x17   :  { %380 = vmatpush.bf16.msra.mxu2 %v358_v5  ;;  %381 = vmatpush.bf16.msra.mxu3 %v358_v5 }
  0x1a   :  { %154 = vmatpush.bf16.msra.mxu0 %v357_v6  ;;  %382 = vmatpush.bf16.msra.mxu1 %v357_v6 }
  0x1b   :  { %383 = vmatpush.bf16.msra.mxu2 %v357_v6  ;;  %384 = vmatpush.bf16.msra.mxu3 %v357_v6 }
  0x1e   :  { %155 = vmatpush.bf16.msra.mxu0 %v356_v7  ;;  %385 = vmatpush.bf16.msra.mxu1 %v356_v7 }
  0x1f   :  { %386 = vmatpush.bf16.msra.mxu2 %v356_v7  ;;  %387 = vmatpush.bf16.msra.mxu3 %v356_v7 }
  0x21   :  { %156 = vmatmul.bf16.vlgmr.msra.gmra.mxu0 %v348_v8  ;;  %166 = vmatmul.bf16.vlgmr.msra.gmra.mxu1 %v350_v9 }
  0x22   :  { %176 = vmatmul.bf16.vlgmr.msra.gmra.mxu2 %v352_v10  ;;  %186 = vmatmul.bf16.vlgmr.msra.gmra.mxu3 %v354_v11 }
  0x31   :  { %161 = vmatmul.bf16.gmra.mxu0 %v349_v12  ;;  %171 = vmatmul.bf16.gmra.mxu1 %v351_v13 }
  0x32   :  { %181 = vmatmul.bf16.gmra.mxu2 %v353_v14  ;;  %191 = vmatmul.bf16.gmra.mxu3 %v355_v15 }
  0x9e   :  { %v157_v17 = vpop.f32.mrf.mxu0  ;;  %v167_v18 = vpop.f32.mrf.mxu1 }
  0x9f   :  { %v158_v19 = vadd.f32 %v388_v16, %v157_v17  ;;  %v168_v20 = vadd.f32 %v388_v16, %v167_v18 }
  0xa1   :  { %260 = vst [vmem:[%s525_s3] sm:$0xff] %v158_v19  ;;  %v218_v38 = vmul.f32 %v158_v19, %v158_v19  ;;  %v222_v54 = vmul.f32 %v168_v20, %v168_v20 }
  0xa2   :  { %264 = vst [vmem:[%s525_s3 + $0x20] sm:$0xff] %v168_v20 }
  0xa5   :  { %v177_v21 = vpop.f32.mrf.mxu2  ;;  %v187_v22 = vpop.f32.mrf.mxu3 }
  0xa6   :  { %v159_v23 = vpop.f32.mrf.mxu0  ;;  %v169_v24 = vpop.f32.mrf.mxu1  ;;  %v178_v25 = vadd.f32 %v388_v16, %v177_v21  ;;  %v471_v28 = vadd.f32 %v388_v16, %v187_v22 }
  0xa7   :  { %v160_v26 = vadd.f32 %v388_v16, %v159_v23  ;;  %v170_v27 = vadd.f32 %v388_v16, %v169_v24 }
  0xa8   :  { %268 = vst [vmem:[%s525_s3 + $0x40] sm:$0xff] %v178_v25  ;;  %v226_v6 = vmul.f32 %v178_v25, %v178_v25  ;;  %v230_v18 = vmul.f32 %v471_v28, %v471_v28 }
  0xa9   :  { %261 = vst [vmem:[%s525_s3 + $0x8] sm:$0xff] %v160_v26  ;;  %v219_v37 = vmul.f32 %v160_v26, %v160_v26  ;;  %v197_v39 = vadd.f32 %v160_v26, %v158_v19  ;;  %v223_v57 = vmul.f32 %v170_v27, %v170_v27 }
  0xaa   :  { %265 = vst [vmem:[%s525_s3 + $0x28] sm:$0xff] %v170_v27 }
  0xab   :  { %272 = vst [vmem:[%s525_s3 + $0x60] sm:$0xff] %v471_v28  ;;  %v234_v43 = vadd.f32 %v219_v37, %v218_v38 }
  0xad   :  { %v179_v29 = vpop.f32.mrf.mxu2  ;;  %v189_v30 = vpop.f32.mrf.mxu3 }
  0xae   :  { %v162_v31 = vpop.f32.mrf.mxu0  ;;  %v172_v32 = vpop.f32.mrf.mxu1  ;;  %v180_v33 = vadd.f32 %v388_v16, %v179_v29  ;;  %v190_v36 = vadd.f32 %v388_v16, %v189_v30 }
  0xaf   :  { %v163_v34 = vadd.f32 %v388_v16, %v162_v31  ;;  %v173_v35 = vadd.f32 %v388_v16, %v172_v32 }
  0xb0   :  { %269 = vst [vmem:[%s525_s3 + $0x48] sm:$0xff] %v180_v33  ;;  %v227_v9 = vmul.f32 %v180_v33, %v180_v33  ;;  %v231_v21 = vmul.f32 %v190_v36, %v190_v36 }
  0xb1   :  { %262 = vst [vmem:[%s525_s3 + $0x10] sm:$0xff] %v163_v34  ;;  %v220_v40 = vmul.f32 %v163_v34, %v163_v34  ;;  %v198_v47 = vadd.f32 %v197_v39, %v163_v34  ;;  %v224_v0 = vmul.f32 %v173_v35, %v173_v35 }
  0xb2   :  { %266 = vst [vmem:[%s525_s3 + $0x30] sm:$0xff] %v173_v35 }
  0xb3   :  { %273 = vst [vmem:[%s525_s3 + $0x68] sm:$0xff] %v190_v36  ;;  %v235_v51 = vadd.f32 %v234_v43, %v220_v40 }
  0xb5   :  { %v182_v41 = vpop.f32.mrf.mxu2  ;;  %v192_v42 = vpop.f32.mrf.mxu3 }
  0xb6   :  { %v164_v44 = vpop.f32.mrf.mxu0  ;;  %v174_v45 = vpop.f32.mrf.mxu1  ;;  %v183_v46 = vadd.f32 %v388_v16, %v182_v41  ;;  %v193_v50 = vadd.f32 %v388_v16, %v192_v42 }
  0xb7   :  { %v165_v48 = vadd.f32 %v388_v16, %v164_v44  ;;  %v175_v49 = vadd.f32 %v388_v16, %v174_v45 }
  0xb8   :  { %270 = vst [vmem:[%s525_s3 + $0x50] sm:$0xff] %v183_v46  ;;  %v228_v13 = vmul.f32 %v183_v46, %v183_v46 }
  0xb9   :  { %v199_v52 = vadd.f32 %v198_v47, %v165_v48  ;;  %v221_v53 = vmul.f32 %v165_v48, %v165_v48  ;;  %263 = vst [vmem:[%s525_s3 + $0x18] sm:$0xff] %v165_v48  ;;  %v225_v4 = vmul.f32 %v175_v49, %v175_v49 }
  0xba   :  { %267 = vst [vmem:[%s525_s3 + $0x38] sm:$0xff] %v175_v49 }
  0xbb   :  { %v200_v55 = vadd.f32 %v199_v52, %v168_v20  ;;  %v236_v56 = vadd.f32 %v235_v51, %v221_v53  ;;  %274 = vst [vmem:[%s525_s3 + $0x70] sm:$0xff] %v193_v50 }
  0xbd   :  { %v237_v58 = vadd.f32 %v236_v56, %v222_v54  ;;  %v201_v59 = vadd.f32 %v200_v55, %v170_v27  ;;  %v184_v60 = vpop.f32.mrf.mxu2  ;;  %v194_v61 = vpop.f32.mrf.mxu3 }
  0xbe   :  { %v185_v62 = vadd.f32 %v388_v16, %v184_v60  ;;  %v195_v63 = vadd.f32 %v388_v16, %v194_v61 }
  0xbf   :  { %v202_v1 = vadd.f32 %v201_v59, %v173_v35  ;;  %v238_v2 = vadd.f32 %v237_v58, %v223_v57 }
  0xc0   :  { %271 = vst [vmem:[%s525_s3 + $0x58] sm:$0xff] %v185_v62  ;;  %v229_v17 = vmul.f32 %v185_v62, %v185_v62  ;;  %v233_v30 = vmul.f32 %v195_v63, %v195_v63 }
  0xc1   :  { %v203_v3 = vadd.f32 %v202_v1, %v175_v49  ;;  %v239_v5 = vadd.f32 %v238_v2, %v224_v0  ;;  %275 = vst [vmem:[%s525_s3 + $0x78] sm:$0xff] %v195_v63 }
  0xc3   :  { %v204_v7 = vadd.f32 %v203_v3, %v178_v25  ;;  %v240_v8 = vadd.f32 %v239_v5, %v225_v4  ;;  %v232_v25 = vmul.f32 %v193_v50, %v193_v50 }
  0xc5   :  { %v241_v10 = vadd.f32 %v240_v8, %v226_v6  ;;  %v205_v11 = vadd.f32 %v204_v7, %v180_v33 }
  0xc7   :  { %v206_v12 = vadd.f32 %v205_v11, %v183_v46  ;;  %v242_v14 = vadd.f32 %v241_v10, %v227_v9 }
  0xc9   :  { %v243_v15 = vadd.f32 %v242_v14, %v228_v13  ;;  %v207_v16 = vadd.f32 %v206_v12, %v185_v62 }
  0xcb   :  { %v208_v19 = vadd.f32 %v207_v16, %v471_v28  ;;  %v244_v20 = vadd.f32 %v243_v15, %v229_v17 }
  0xcd   :  { %v245_v22 = vadd.f32 %v244_v20, %v230_v18  ;;  %v209_v23 = vadd.f32 %v208_v19, %v190_v36 }
  0xcf   :  { %v210_v24 = vadd.f32 %v209_v23, %v193_v50  ;;  %v246_v26 = vadd.f32 %v245_v22, %v231_v21 }
  0xd1   :  { %v247_v27 = vadd.f32 %v246_v26, %v232_v25  ;;  %v211_v29 = vadd.f32 %v210_v24, %v195_v63 }
  0xd3   :  { %v212_v31 = vrot.slane %v211_v29, 4  ;;  %v248_v32 = vadd.f32 %v247_v27, %v233_v30 }
  0xd5   :  { %v213_v33 = vadd.f32 %v212_v31, %v211_v29  ;;  %v249_v34 = vrot.slane %v248_v32, 4 }
  0xd7   :  { %v214_v35 = vrot.slane %v213_v33, 2  ;;  %v250_v37 = vadd.f32 %v249_v34, %v248_v32 }
  0xd9   :  { %v215_v38 = vadd.f32 %v214_v35, %v213_v33  ;;  %v251_v39 = vrot.slane %v250_v37, 2 }
  0xdb   :  { %v216_v40 = vrot.slane %v215_v38, 1  ;;  %v252_v28 = vadd.f32 %v251_v39, %v250_v37 }
  0xdd   :  { %v253_v41 = vrot.slane %v252_v28, 1  ;;  %v217_v42 = vadd.f32 %v216_v40, %v215_v38 }
  0xdf   :  { %v254_v36 = vadd.f32 %v253_v41, %v252_v28 }
  0xe1   :  { %v256_v43 = vsel %vm255_vm0, %v217_v42, %v254_v36 }
  0xe2   :  { %v258_v44 = vsel %vm257_vm1, %v256_v43, 0.0 }
  0xe3   :  { %259 = vst [vmem:[%s526_s4] sm:$0xff] %v258_v44 }

// kernel: _lambda_.10
= control target key start
LH: loop header
LB: loop body
LE: loop exit
PB: predicated region body
PF: predicated region fallthrough
CT: control target
= control target key end

     0   :  { %s338_s0 = inlined_call_operand.vmem [shape: f32[128,128], index: 0, kind: input, shape index: {}]   ;;  %s339_s1 = inlined_call_operand.vmem [shape: f32[1,128], index: 1, kind: input, shape index: {}]   ;;  %s340_s2 = inlined_call_operand.vmem [shape: f32[1,128], index: 2, kind: input, shape index: {}]   ;;  %s341_s3 = inlined_call_operand.vmem [shape: bf16[128,128], index: 3, kind: output, shape index: {}]  }
   0x1   :  { %v14_v0 = vld [vmem:[%s338_s0] sm:$0xff]  ;;  %v15_v1 = vld [vmem:[%s338_s0 + $0x8] sm:$0xff]  ;;  %v16_v4 = vld [vmem:[%s338_s0 + $0x10] sm:$0xff] }
   0x2   :  { %v232_v2 = vld [vmem:[%s339_s1] ss:$0 sm:$0xff]  ;;  %v17_v5 = vld [vmem:[%s338_s0 + $0x18] sm:$0xff]  ;;  %v19_v11 = vld [vmem:[%s338_s0 + $0x28] sm:$0xff] }
   0x3   :  { %v237_v3 = vld [vmem:[%s340_s2] ss:$0 sm:$0xff]  ;;  %v34_v7 = vmul.f32 %v232_v2, %v14_v0  ;;  %v35_v8 = vmul.f32 %v232_v2, %v15_v1  ;;  %v36_v9 = vmul.f32 %v232_v2, %v16_v4  ;;  %v37_v10 = vmul.f32 %v232_v2, %v17_v5  ;;  %v20_v12 = vld [vmem:[%s338_s0 + $0x30] sm:$0xff]  ;;  %v21_v13 = vld [vmem:[%s338_s0 + $0x38] sm:$0xff] }
   0x4   :  { %v18_v6 = vld [vmem:[%s338_s0 + $0x20] sm:$0xff]  ;;  %v39_v15 = vmul.f32 %v232_v2, %v19_v11  ;;  %v40_v16 = vmul.f32 %v232_v2, %v20_v12  ;;  %v41_v17 = vmul.f32 %v232_v2, %v21_v13  ;;  %v23_v37 = vld [vmem:[%s338_s0 + $0x48] sm:$0xff]  ;;  %v24_v38 = vld [vmem:[%s338_s0 + $0x50] sm:$0xff] }
   0x5   :  { %v38_v14 = vmul.f32 %v232_v2, %v18_v6  ;;  %v54_v18 = vadd.f32 %v237_v3, %v34_v7  ;;  %v55_v19 = vadd.f32 %v237_v3, %v35_v8  ;;  %v56_v20 = vadd.f32 %v237_v3, %v36_v9  ;;  %v22_v32 = vld [vmem:[%s338_s0 + $0x40] sm:$0xff]  ;;  %v25_v39 = vld [vmem:[%s338_s0 + $0x58] sm:$0xff]  ;;  %v27_v51 = vld [vmem:[%s338_s0 + $0x68] sm:$0xff] }
   0x6   :  { %v57_v21 = vadd.f32 %v237_v3, %v37_v10  ;;  %v59_v23 = vadd.f32 %v237_v3, %v39_v15  ;;  %v60_v24 = vadd.f32 %v237_v3, %v40_v16  ;;  %v61_v25 = vadd.f32 %v237_v3, %v41_v17  ;;  %v26_v50 = vld [vmem:[%s338_s0 + $0x60] sm:$0xff]  ;;  %v28_v63 = vld [vmem:[%s338_s0 + $0x70] sm:$0xff]  ;;  %v29_v0 = vld [vmem:[%s338_s0 + $0x78] sm:$0xff] }
   0x7   :  { %v58_v22 = vadd.f32 %v237_v3, %v38_v14  ;;  %vm70_vm0 = vcmp.gt.f32.partialorder %v54_v18, 0.0  ;;  %vm71_vm1 = vcmp.gt.f32.partialorder %v55_v19, 0.0  ;;  %v86_v26 = vmul.f32 0.2, %v54_v18 }
   0x8   :  { %v87_v27 = vmul.f32 0.2, %v55_v19  ;;  %vm72_vm2 = vcmp.gt.f32.partialorder %v56_v20, 0.0  ;;  %vm73_vm3 = vcmp.gt.f32.partialorder %v57_v21, 0.0  ;;  %v88_v28 = vmul.f32 0.2, %v56_v20 }
   0x9   :  { %v89_v29 = vmul.f32 0.2, %v57_v21  ;;  %v102_v30 = vsel %vm70_vm0, %v54_v18, %v86_v26  ;;  %vm74_vm4 = vcmp.gt.f32.partialorder %v58_v22, 0.0  ;;  %vm75_vm5 = vcmp.gt.f32.partialorder %v59_v23, 0.0 }
   0xa   :  { %v103_v31 = vsel %vm71_vm1, %v55_v19, %v87_v27  ;;  %v104_v34 = vsel %vm72_vm2, %v56_v20, %v88_v28  ;;  %v90_v36 = vmul.f32 0.2, %v58_v22  ;;  %v91_v41 = vmul.f32 0.2, %v59_v23 }
   0xb   :  { %v157_v33 = vpack.c.bf16 %v103_v31, %v102_v30  ;;  %v105_v35 = vsel %vm73_vm3, %v57_v21, %v89_v29  ;;  %vm76_vm6 = vcmp.gt.f32.partialorder %v60_v24, 0.0  ;;  %vm77_vm7 = vcmp.gt.f32.partialorder %v61_v25, 0.0 }
   0xc   :  { %v162_v40 = vpack.c.bf16 %v105_v35, %v104_v34  ;;  %v106_v42 = vsel %vm74_vm4, %v58_v22, %v90_v36  ;;  %v92_v43 = vmul.f32 0.2, %v60_v24  ;;  %v93_v44 = vmul.f32 0.2, %v61_v25 }
   0xd   :  { %158 = vst [vmem:[%s341_s3] sm:$0xff] %v157_v33   ;;  %v42_v45 = vmul.f32 %v232_v2, %v22_v32  ;;  %v107_v46 = vsel %vm75_vm5, %v59_v23, %v91_v41  ;;  %v43_v47 = vmul.f32 %v232_v2, %v23_v37  ;;  %v44_v48 = vmul.f32 %v232_v2, %v24_v38 }
   0xe   :  { %194 = vst [vmem:[%s341_s3 + $0x8] sm:$0xff] %v162_v40   ;;  %v45_v49 = vmul.f32 %v232_v2, %v25_v39  ;;  %v167_v52 = vpack.c.bf16 %v107_v46, %v106_v42  ;;  %v108_v53 = vsel %vm76_vm6, %v60_v24, %v92_v43  ;;  %v109_v54 = vsel %vm77_vm7, %v61_v25, %v93_v44 }
   0xf   :  { %v62_v55 = vadd.f32 %v237_v3, %v42_v45  ;;  %v172_v56 = vpack.c.bf16 %v109_v54, %v108_v53  ;;  %v63_v57 = vadd.f32 %v237_v3, %v43_v47  ;;  %v64_v58 = vadd.f32 %v237_v3, %v44_v48 }
  0x10   :  { %v65_v59 = vadd.f32 %v237_v3, %v45_v49  ;;  %195 = vst [vmem:[%s341_s3 + $0x10] sm:$0xff] %v167_v52   ;;  %v46_v61 = vmul.f32 %v232_v2, %v26_v50  ;;  %v47_v62 = vmul.f32 %v232_v2, %v27_v51  ;;  %v48_v10 = vmul.f32 %v232_v2, %v28_v63 }
  0x11   :  { %vm78_vm8 = vcmp.gt.f32.partialorder %v62_v55, 0.0  ;;  %v94_v60 = vmul.f32 0.2, %v62_v55  ;;  %196 = vst [vmem:[%s341_s3 + $0x18] sm:$0xff] %v172_v56   ;;  %vm79_vm9 = vcmp.gt.f32.partialorder %v63_v57, 0.0  ;;  %vm80_vm10 = vcmp.gt.f32.partialorder %v64_v58, 0.0 }
  0x12   :  { %v95_v1 = vmul.f32 0.2, %v63_v57  ;;  %vm81_vm11 = vcmp.gt.f32.partialorder %v65_v59, 0.0  ;;  %v96_v5 = vmul.f32 0.2, %v64_v58  ;;  %v66_v7 = vadd.f32 %v237_v3, %v46_v61 }
  0x13   :  { %v110_v4 = vsel %vm78_vm8, %v62_v55, %v94_v60  ;;  %v97_v6 = vmul.f32 0.2, %v65_v59  ;;  %v67_v9 = vadd.f32 %v237_v3, %v47_v62  ;;  %v49_v11 = vmul.f32 %v232_v2, %v29_v0 }
  0x14   :  { %v111_v8 = vsel %vm79_vm9, %v63_v57, %v95_v1  ;;  %v112_v13 = vsel %vm80_vm10, %v64_v58, %v96_v5  ;;  %vm82_vm12 = vcmp.gt.f32.partialorder %v66_v7, 0.0  ;;  %v98_v16 = vmul.f32 0.2, %v66_v7 }
  0x15   :  { %v177_v12 = vpack.c.bf16 %v111_v8, %v110_v4  ;;  %v113_v14 = vsel %vm81_vm11, %v65_v59, %v97_v6  ;;  %vm83_vm13 = vcmp.gt.f32.partialorder %v67_v9, 0.0  ;;  %v99_v17 = vmul.f32 0.2, %v67_v9 }
  0x16   :  { %v182_v15 = vpack.c.bf16 %v113_v14, %v112_v13  ;;  %v68_v18 = vadd.f32 %v237_v3, %v48_v10  ;;  %v69_v19 = vadd.f32 %v237_v3, %v49_v11  ;;  %v114_v2 = vsel %vm82_vm12, %v66_v7, %v98_v16 }
  0x17   :  { %197 = vst [vmem:[%s341_s3 + $0x20] sm:$0xff] %v177_v12   ;;  %v115_v20 = vsel %vm83_vm13, %v67_v9, %v99_v17 }
  0x18   :  { %198 = vst [vmem:[%s341_s3 + $0x28] sm:$0xff] %v182_v15   ;;  %v187_v21 = vpack.c.bf16 %v115_v20, %v114_v2  ;;  %vm84_vm14 = vcmp.gt.f32.partialorder %v68_v18, 0.0  ;;  %vm85_vm15 = vcmp.gt.f32.partialorder %v69_v19, 0.0  ;;  %v100_v22 = vmul.f32 0.2, %v68_v18 }
  0x19   :  { %v101_v23 = vmul.f32 0.2, %v69_v19 }
  0x1a   :  { %199 = vst [vmem:[%s341_s3 + $0x30] sm:$0xff] %v187_v21   ;;  %v116_v24 = vsel %vm84_vm14, %v68_v18, %v100_v22 }
  0x1b   :  { %v117_v25 = vsel %vm85_vm15, %v69_v19, %v101_v23 }
  0x1c   :  { %v192_v26 = vpack.c.bf16 %v117_v25, %v116_v24 }
  0x1e   :  { %200 = vst [vmem:[%s341_s3 + $0x38] sm:$0xff] %v192_v26  }

// kernel: _lambda_.12
= control target key start
LH: loop header
LB: loop body
LE: loop exit
PB: predicated region body
PF: predicated region fallthrough
CT: control target
= control target key end

     0   :  { %s115_s0 = inlined_call_operand.vmem [shape: f32[32,128], index: 0, kind: input, shape index: {}]   ;;  %s116_s1 = inlined_call_operand.vmem [shape: f32[1,128], index: 1, kind: input, shape index: {}]   ;;  %s117_s2 = inlined_call_operand.vmem [shape: f32[1,128], index: 2, kind: input, shape index: {}]   ;;  %s118_s3 = inlined_call_operand.vmem [shape: bf16[32,128], index: 3, kind: output, shape index: {}]  }
   0x1   :  { %v14_v0 = vld [vmem:[%s115_s0] sm:$0xff]  ;;  %v15_v1 = vld [vmem:[%s115_s0 + $0x8] sm:$0xff]  ;;  %v16_v4 = vld [vmem:[%s115_s0 + $0x10] sm:$0xff] }
   0x2   :  { %v69_v2 = vld [vmem:[%s116_s1] ss:$0 sm:$0xff]  ;;  %v17_v5 = vld [vmem:[%s115_s0 + $0x18] sm:$0xff] }
   0x3   :  { %v70_v3 = vld [vmem:[%s117_s2] ss:$0 sm:$0xff]  ;;  %v22_v6 = vmul.f32 %v69_v2, %v14_v0  ;;  %v23_v7 = vmul.f32 %v69_v2, %v15_v1  ;;  %v24_v8 = vmul.f32 %v69_v2, %v16_v4  ;;  %v25_v9 = vmul.f32 %v69_v2, %v17_v5 }
   0x5   :  { %v30_v10 = vadd.f32 %v70_v3, %v22_v6  ;;  %v31_v11 = vadd.f32 %v70_v3, %v23_v7  ;;  %v32_v12 = vadd.f32 %v70_v3, %v24_v8  ;;  %v33_v13 = vadd.f32 %v70_v3, %v25_v9 }
   0x7   :  { %vm34_vm0 = vcmp.gt.f32.partialorder %v30_v10, 0.0  ;;  %vm35_vm1 = vcmp.gt.f32.partialorder %v31_v11, 0.0  ;;  %v38_v14 = vmul.f32 0.2, %v30_v10  ;;  %v39_v15 = vmul.f32 0.2, %v31_v11 }
   0x8   :  { %vm36_vm2 = vcmp.gt.f32.partialorder %v32_v12, 0.0  ;;  %vm37_vm3 = vcmp.gt.f32.partialorder %v33_v13, 0.0  ;;  %v40_v16 = vmul.f32 0.2, %v32_v12  ;;  %v41_v17 = vmul.f32 0.2, %v33_v13 }
   0x9   :  { %v42_v18 = vsel %vm34_vm0, %v30_v10, %v38_v14  ;;  %v43_v19 = vsel %vm35_vm1, %v31_v11, %v39_v15 }
   0xa   :  { %v61_v20 = vpack.c.bf16 %v43_v19, %v42_v18  ;;  %v44_v21 = vsel %vm36_vm2, %v32_v12, %v40_v16  ;;  %v45_v22 = vsel %vm37_vm3, %v33_v13, %v41_v17 }
   0xb   :  { %v66_v23 = vpack.c.bf16 %v45_v22, %v44_v21 }
   0xc   :  { %62 = vst [vmem:[%s118_s3] sm:$0xff] %v61_v20  }
   0xd   :  { %68 = vst [vmem:[%s118_s3 + $0x8] sm:$0xff] %v66_v23  }

// kernel: _lambda_.11
= control target key start
LH: loop header
LB: loop body
LE: loop exit
PB: predicated region body
PF: predicated region fallthrough
CT: control target
= control target key end

     0   :  { %vm232_vm0 = vcmask 1040384   ;;  %vm234_vm1 = vcmask 1041408   ;;  %s481_s1 = inlined_call_operand.vmem [shape: bf16[256,128], index: 1, kind: input, shape index: {}]   ;;  %s482_s2 = inlined_call_operand.vmem [shape: f32[1,128], index: 2, kind: input, shape index: {}]   ;;  %s483_s0 = inlined_call_operand.vmem [shape: bf16[32,256], index: 0, kind: input, shape index: {}]   ;;  %s484_s3 = inlined_call_operand.vmem [shape: f32[32,128], index: 3, kind: output, shape index: {0}]   ;;  %s485_s4 = inlined_call_operand.vmem [shape: f32[1,8,128], index: 4, kind: output, shape index: {1}]  }
   0x1   :  { %v340_v0 = vld [vmem:[%s481_s1 + $0x38] sm:$0xff]  ;;  %v339_v2 = vld [vmem:[%s481_s1 + $0x30] sm:$0xff]  ;;  %v338_v4 = vld [vmem:[%s481_s1 + $0x28] sm:$0xff] }
   0x2   :  { %v348_v1 = vld [vmem:[%s481_s1 + $0x78] sm:$0xff]  ;;  %172 = vmatpush.bf16.msra.mxu0 %v340_v0  ;;  %349 = vmatpush.bf16.msra.mxu2 %v340_v0  ;;  %v347_v3 = vld [vmem:[%s481_s1 + $0x70] sm:$0xff]  ;;  %v346_v5 = vld [vmem:[%s481_s1 + $0x68] sm:$0xff] }
   0x3   :  { %191 = vmatpush.bf16.msra.mxu1 %v348_v1  ;;  %357 = vmatpush.bf16.msra.mxu3 %v348_v1  ;;  %v337_v6 = vld [vmem:[%s481_s1 + $0x20] sm:$0xff]  ;;  %v336_v8 = vld [vmem:[%s481_s1 + $0x18] sm:$0xff]  ;;  %v335_v10 = vld [vmem:[%s481_s1 + $0x10] sm:$0xff] }
   0x4   :  { %v345_v7 = vld [vmem:[%s481_s1 + $0x60] sm:$0xff]  ;;  %v344_v9 = vld [vmem:[%s481_s1 + $0x58] sm:$0xff]  ;;  %v343_v11 = vld [vmem:[%s481_s1 + $0x50] sm:$0xff] }
   0x5   :  { %v334_v12 = vld [vmem:[%s481_s1 + $0x8] sm:$0xff]  ;;  %v333_v14 = vld [vmem:[%s481_s1] sm:$0xff]  ;;  %v259_v18 = vld [vmem:[%s483_s0 + $0x10] sm:$0xf] }
   0x6   :  { %173 = vmatpush.bf16.msra.mxu0 %v339_v2  ;;  %350 = vmatpush.bf16.msra.mxu2 %v339_v2  ;;  %v342_v13 = vld [vmem:[%s481_s1 + $0x48] sm:$0xff]  ;;  %v341_v15 = vld [vmem:[%s481_s1 + $0x40] sm:$0xff]  ;;  %v332_v19 = vld [vmem:[%s483_s0 + $0x14] sm:$0xf0] }
   0x7   :  { %192 = vmatpush.bf16.msra.mxu1 %v347_v3  ;;  %358 = vmatpush.bf16.msra.mxu3 %v347_v3  ;;  %v251_v16 = vld [vmem:[%s483_s0] sm:$0xf]  ;;  %v330_v17 = vld [vmem:[%s483_s0 + $0x4] sm:$0xf0]  ;;  %v329_v20 = vld [vmem:[%s483_s0 + $0x4] sm:$0xf]  ;;  %v260_v25 = vor.u32 %v332_v19, %v259_v18 }
   0x8   :  { %v253_v21 = vld [vmem:[%s483_s0 + $0x8] sm:$0xf0]  ;;  %v331_v22 = vld [vmem:[%s483_s0 + $0x14] sm:$0xf]  ;;  %v261_v23 = vld [vmem:[%s483_s0 + $0x18] sm:$0xf0]  ;;  %v252_v24 = vor.u32 %v330_v17, %v251_v16 }
   0x9   :  { %v256_v26 = vor.u32 %v329_v20, %v253_v21  ;;  %v264_v27 = vor.u32 %v331_v22, %v261_v23  ;;  %v365_v28 = vld [vmem:[%s482_s2] ss:$0 sm:$0xff] }
   0xa   :  { %174 = vmatpush.bf16.msra.mxu0 %v338_v4  ;;  %351 = vmatpush.bf16.msra.mxu2 %v338_v4 }
   0xb   :  { %193 = vmatpush.bf16.msra.mxu1 %v346_v5  ;;  %359 = vmatpush.bf16.msra.mxu3 %v346_v5 }
   0xe   :  { %175 = vmatpush.bf16.msra.mxu0 %v337_v6  ;;  %352 = vmatpush.bf16.msra.mxu2 %v337_v6 }
   0xf   :  { %194 = vmatpush.bf16.msra.mxu1 %v345_v7  ;;  %360 = vmatpush.bf16.msra.mxu3 %v345_v7 }
  0x12   :  { %176 = vmatpush.bf16.msra.mxu0 %v336_v8  ;;  %353 = vmatpush.bf16.msra.mxu2 %v336_v8 }
  0x13   :  { %195 = vmatpush.bf16.msra.mxu1 %v344_v9  ;;  %361 = vmatpush.bf16.msra.mxu3 %v344_v9 }
  0x16   :  { %177 = vmatpush.bf16.msra.mxu0 %v335_v10  ;;  %354 = vmatpush.bf16.msra.mxu2 %v335_v10 }
  0x17   :  { %196 = vmatpush.bf16.msra.mxu1 %v343_v11  ;;  %362 = vmatpush.bf16.msra.mxu3 %v343_v11 }
  0x1a   :  { %178 = vmatpush.bf16.msra.mxu0 %v334_v12  ;;  %355 = vmatpush.bf16.msra.mxu2 %v334_v12 }
  0x1b   :  { %197 = vmatpush.bf16.msra.mxu1 %v342_v13  ;;  %363 = vmatpush.bf16.msra.mxu3 %v342_v13 }
  0x1e   :  { %179 = vmatpush.bf16.msra.mxu0 %v333_v14  ;;  %356 = vmatpush.bf16.msra.mxu2 %v333_v14 }
  0x1f   :  { %198 = vmatpush.bf16.msra.mxu1 %v341_v15  ;;  %364 = vmatpush.bf16.msra.mxu3 %v341_v15 }
  0x21   :  { %180 = vmatmul.bf16.vlgmr.msra.gmra.mxu0 %v252_v24  ;;  %185 = vmatmul.bf16.vlgmr.msra.gmra.mxu2 %v260_v25 }
  0x22   :  { %199 = vmatmul.bf16.vlgmr.msra.gmra.mxu1 %v256_v26  ;;  %204 = vmatmul.bf16.vlgmr.msra.gmra.mxu3 %v264_v27 }
  0x9e   :  { %v181_v29 = vpop.f32.mrf.mxu0 }
  0x9f   :  { %v182_v30 = vadd.f32 %v365_v28, %v181_v29  ;;  %v200_v31 = vpop.f32.mrf.mxu1 }
  0xa1   :  { %v201_v32 = vadd.f32 %v200_v31, %v182_v30 }
  0xa3   :  { %237 = vst [vmem:[%s484_s3] sm:$0xff] %v201_v32  ;;  %v219_v41 = vmul.f32 %v201_v32, %v201_v32 }
  0xa4   :  { %v186_v33 = vpop.f32.mrf.mxu2 }
  0xa5   :  { %v187_v34 = vadd.f32 %v365_v28, %v186_v33  ;;  %v205_v35 = vpop.f32.mrf.mxu3 }
  0xa6   :  { %v183_v36 = vpop.f32.mrf.mxu0 }
  0xa7   :  { %v206_v37 = vadd.f32 %v205_v35, %v187_v34  ;;  %v184_v38 = vadd.f32 %v365_v28, %v183_v36  ;;  %v202_v39 = vpop.f32.mrf.mxu1 }
  0xa9   :  { %239 = vst [vmem:[%s484_s3 + $0x10] sm:$0xff] %v206_v37  ;;  %v203_v40 = vadd.f32 %v202_v39, %v184_v38  ;;  %v221_v48 = vmul.f32 %v206_v37, %v206_v37 }
  0xab   :  { %v210_v42 = vadd.f32 %v203_v40, %v201_v32  ;;  %v220_v43 = vmul.f32 %v203_v40, %v203_v40  ;;  %238 = vst [vmem:[%s484_s3 + $0x8] sm:$0xff] %v203_v40 }
  0xac   :  { %v188_v44 = vpop.f32.mrf.mxu2 }
  0xad   :  { %v223_v45 = vadd.f32 %v220_v43, %v219_v41  ;;  %v189_v46 = vadd.f32 %v365_v28, %v188_v44  ;;  %v207_v47 = vpop.f32.mrf.mxu3  ;;  %v211_v50 = vadd.f32 %v210_v42, %v206_v37 }
  0xaf   :  { %v208_v49 = vadd.f32 %v207_v47, %v189_v46  ;;  %v224_v53 = vadd.f32 %v223_v45, %v221_v48 }
  0xb1   :  { %v212_v51 = vadd.f32 %v211_v50, %v208_v49  ;;  %v222_v52 = vmul.f32 %v208_v49, %v208_v49  ;;  %240 = vst [vmem:[%s484_s3 + $0x18] sm:$0xff] %v208_v49 }
  0xb3   :  { %v213_v54 = vrot.slane %v212_v51, 4  ;;  %v225_v55 = vadd.f32 %v224_v53, %v222_v52 }
  0xb5   :  { %v214_v56 = vadd.f32 %v213_v54, %v212_v51  ;;  %v226_v57 = vrot.slane %v225_v55, 4 }
  0xb7   :  { %v215_v58 = vrot.slane %v214_v56, 2  ;;  %v227_v59 = vadd.f32 %v226_v57, %v225_v55 }
  0xb9   :  { %v216_v60 = vadd.f32 %v215_v58, %v214_v56  ;;  %v228_v61 = vrot.slane %v227_v59, 2 }
  0xbb   :  { %v217_v62 = vrot.slane %v216_v60, 1  ;;  %v229_v63 = vadd.f32 %v228_v61, %v227_v59 }
  0xbd   :  { %v230_v0 = vrot.slane %v229_v63, 1  ;;  %v218_v1 = vadd.f32 %v217_v62, %v216_v60 }
  0xbf   :  { %v231_v2 = vadd.f32 %v230_v0, %v229_v63 }
  0xc1   :  { %v233_v3 = vsel %vm232_vm0, %v218_v1, %v231_v2 }
  0xc2   :  { %v235_v4 = vsel %vm234_vm1, %v233_v3, 0.0 }
  0xc3   :  { %236 = vst [vmem:[%s485_s4] sm:$0xff] %v235_v4 }

// kernel: _lambda_.14
= control target key start
LH: loop header
LB: loop body
LE: loop exit
PB: predicated region body
PF: predicated region fallthrough
CT: control target
= control target key end

     0   :  { %s98_s0 = inlined_call_operand.vmem [shape: f32[24,128], index: 0, kind: input, shape index: {}]   ;;  %s99_s1 = inlined_call_operand.vmem [shape: f32[1,128], index: 1, kind: input, shape index: {}]   ;;  %s100_s2 = inlined_call_operand.vmem [shape: f32[1,128], index: 2, kind: input, shape index: {}]   ;;  %s101_s3 = inlined_call_operand.vmem [shape: bf16[24,128], index: 3, kind: output, shape index: {}]  }
   0x1   :  { %v14_v0 = vld [vmem:[%s98_s0] sm:$0xff]  ;;  %v15_v1 = vld [vmem:[%s98_s0 + $0x8] sm:$0xff]  ;;  %v16_v4 = vld [vmem:[%s98_s0 + $0x10] sm:$0xff] }
   0x2   :  { %v55_v2 = vld [vmem:[%s99_s1] ss:$0 sm:$0xff] }
   0x3   :  { %v56_v3 = vld [vmem:[%s100_s2] ss:$0 sm:$0xff]  ;;  %v21_v5 = vmul.f32 %v55_v2, %v14_v0  ;;  %v22_v6 = vmul.f32 %v55_v2, %v15_v1  ;;  %v23_v7 = vmul.f32 %v55_v2, %v16_v4 }
   0x5   :  { %v28_v8 = vadd.f32 %v56_v3, %v21_v5  ;;  %v29_v9 = vadd.f32 %v56_v3, %v22_v6  ;;  %v30_v10 = vadd.f32 %v56_v3, %v23_v7 }
   0x7   :  { %vm31_vm0 = vcmp.gt.f32.partialorder %v28_v8, 0.0  ;;  %vm32_vm1 = vcmp.gt.f32.partialorder %v29_v9, 0.0  ;;  %v34_v11 = vmul.f32 0.2, %v28_v8  ;;  %v35_v12 = vmul.f32 0.2, %v29_v9 }
   0x8   :  { %vm33_vm2 = vcmp.gt.f32.partialorder %v30_v10, 0.0  ;;  %v36_v13 = vmul.f32 0.2, %v30_v10 }
   0x9   :  { %v37_v14 = vsel %vm31_vm0, %v28_v8, %v34_v11  ;;  %v38_v15 = vsel %vm32_vm1, %v29_v9, %v35_v12 }
   0xa   :  { %v53_v16 = vpack.c.bf16 %v38_v15, %v37_v14  ;;  %v39_v17 = vsel %vm33_vm2, %v30_v10, %v36_v13 }
   0xb   :  { %v42_v18 = vpack.c.bf16 %v39_v17, %v39_v17 }
   0xc   :  { %54 = vst [vmem:[%s101_s3] sm:$0xff] %v53_v16  }
   0xd   :  { %45 = vst [vmem:[%s101_s3 + $0x8] sm:$0xf] %v42_v18 }

// kernel: _lambda_.13
= control target key start
LH: loop header
LB: loop body
LE: loop exit
PB: predicated region body
PF: predicated region fallthrough
CT: control target
= control target key end

     0   :  { %vm407_vm0 = vcmask 1040384   ;;  %vm409_vm1 = vcmask 1041408   ;;  %s770_s1 = inlined_call_operand.vmem [shape: bf16[512,128], index: 1, kind: input, shape index: {}]   ;;  %s771_s2 = inlined_call_operand.vmem [shape: f32[1,128], index: 2, kind: input, shape index: {}]   ;;  %s772_s0 = inlined_call_operand.vmem [shape: bf16[24,512], index: 0, kind: input, shape index: {}]   ;;  %s773_s3 = inlined_call_operand.vmem [shape: f32[24,128], index: 3, kind: output, shape index: {0}]   ;;  %s774_s4 = inlined_call_operand.vmem [shape: f32[1,8,128], index: 4, kind: output, shape index: {1}]  }
   0x1   :  { %v578_v0 = vld [vmem:[%s770_s1 + $0x38] sm:$0xff]  ;;  %v577_v4 = vld [vmem:[%s770_s1 + $0x30] sm:$0xff]  ;;  %v576_v8 = vld [vmem:[%s770_s1 + $0x28] sm:$0xff] }
   0x2   :  { %v586_v1 = vld [vmem:[%s770_s1 + $0x78] sm:$0xff]  ;;  %316 = vmatpush.bf16.msra.mxu0 %v578_v0  ;;  %v585_v5 = vld [vmem:[%s770_s1 + $0x70] sm:$0xff]  ;;  %v584_v9 = vld [vmem:[%s770_s1 + $0x68] sm:$0xff] }
   0x3   :  { %v594_v2 = vld [vmem:[%s770_s1 + $0xb8] sm:$0xff]  ;;  %334 = vmatpush.bf16.msra.mxu1 %v586_v1  ;;  %v593_v6 = vld [vmem:[%s770_s1 + $0xb0] sm:$0xff]  ;;  %v592_v10 = vld [vmem:[%s770_s1 + $0xa8] sm:$0xff] }
   0x4   :  { %v602_v3 = vld [vmem:[%s770_s1 + $0xf8] sm:$0xff]  ;;  %352 = vmatpush.bf16.msra.mxu2 %v594_v2  ;;  %v601_v7 = vld [vmem:[%s770_s1 + $0xf0] sm:$0xff]  ;;  %v600_v11 = vld [vmem:[%s770_s1 + $0xe8] sm:$0xff] }
   0x5   :  { %370 = vmatpush.bf16.msra.mxu3 %v602_v3  ;;  %v575_v12 = vld [vmem:[%s770_s1 + $0x20] sm:$0xff]  ;;  %v574_v16 = vld [vmem:[%s770_s1 + $0x18] sm:$0xff]  ;;  %v573_v20 = vld [vmem:[%s770_s1 + $0x10] sm:$0xff] }
   0x6   :  { %317 = vmatpush.bf16.msra.mxu0 %v577_v4  ;;  %v583_v13 = vld [vmem:[%s770_s1 + $0x60] sm:$0xff]  ;;  %v582_v17 = vld [vmem:[%s770_s1 + $0x58] sm:$0xff]  ;;  %v581_v21 = vld [vmem:[%s770_s1 + $0x50] sm:$0xff] }
   0x7   :  { %335 = vmatpush.bf16.msra.mxu1 %v585_v5  ;;  %v591_v14 = vld [vmem:[%s770_s1 + $0xa0] sm:$0xff]  ;;  %v590_v18 = vld [vmem:[%s770_s1 + $0x98] sm:$0xff]  ;;  %v589_v22 = vld [vmem:[%s770_s1 + $0x90] sm:$0xff] }
   0x8   :  { %353 = vmatpush.bf16.msra.mxu2 %v593_v6  ;;  %v599_v15 = vld [vmem:[%s770_s1 + $0xe0] sm:$0xff]  ;;  %v598_v19 = vld [vmem:[%s770_s1 + $0xd8] sm:$0xff]  ;;  %v597_v23 = vld [vmem:[%s770_s1 + $0xd0] sm:$0xff] }
   0x9   :  { %371 = vmatpush.bf16.msra.mxu3 %v601_v7  ;;  %v572_v24 = vld [vmem:[%s770_s1 + $0x8] sm:$0xff]  ;;  %v571_v28 = vld [vmem:[%s770_s1] sm:$0xff]  ;;  %v569_v33 = vld [vmem:[%s772_s0 + $0xc] sm:$0xf0] }
   0xa   :  { %318 = vmatpush.bf16.msra.mxu0 %v576_v8  ;;  %v580_v25 = vld [vmem:[%s770_s1 + $0x48] sm:$0xff]  ;;  %v579_v29 = vld [vmem:[%s770_s1 + $0x40] sm:$0xff]  ;;  %v427_v35 = vld [vmem:[%s772_s0 + $0x10] sm:$0xf0] }
   0xb   :  { %336 = vmatpush.bf16.msra.mxu1 %v584_v9  ;;  %v588_v26 = vld [vmem:[%s770_s1 + $0x88] sm:$0xff]  ;;  %v587_v30 = vld [vmem:[%s770_s1 + $0x80] sm:$0xff]  ;;  %v570_v37 = vld [vmem:[%s772_s0 + $0x14] sm:$0xf0] }
   0xc   :  { %354 = vmatpush.bf16.msra.mxu2 %v592_v10  ;;  %v596_v27 = vld [vmem:[%s770_s1 + $0xc8] sm:$0xff]  ;;  %v595_v31 = vld [vmem:[%s770_s1 + $0xc0] sm:$0xff]  ;;  %v435_v39 = vld [vmem:[%s772_s0 + $0x18] sm:$0xf0] }
   0xd   :  { %372 = vmatpush.bf16.msra.mxu3 %v600_v11  ;;  %v425_v32 = vld [vmem:[%s772_s0] sm:$0xf]  ;;  %v567_v34 = vld [vmem:[%s772_s0 + $0x4] sm:$0xf]  ;;  %v433_v36 = vld [vmem:[%s772_s0 + $0x8] sm:$0xf] }
   0xe   :  { %319 = vmatpush.bf16.msra.mxu0 %v575_v12  ;;  %v568_v38 = vld [vmem:[%s772_s0 + $0xc] sm:$0xf]  ;;  %v426_v40 = vor.u32 %v569_v33, %v425_v32  ;;  %v430_v41 = vor.u32 %v567_v34, %v427_v35  ;;  %v434_v42 = vor.u32 %v570_v37, %v433_v36  ;;  %v20_v44 = vld [vmem:[%s772_s0 + $0x20] sm:$0xff] }
   0xf   :  { %337 = vmatpush.bf16.msra.mxu1 %v583_v13  ;;  %v438_v43 = vor.u32 %v568_v38, %v435_v39  ;;  %v21_v45 = vld [vmem:[%s772_s0 + $0x28] sm:$0xff]  ;;  %v104_v46 = vunpack.c.l.b16 %v20_v44  ;;  %v105_v47 = vunpack.c.h.b16 %v20_v44  ;;  %v603_v54 = vld [vmem:[%s771_s2] ss:$0 sm:$0xff] }
  0x10   :  { %355 = vmatpush.bf16.msra.mxu2 %v591_v14  ;;  %v106_v48 = vunpack.c.l.b16 %v21_v45  ;;  %v107_v49 = vunpack.c.h.b16 %v21_v45 }
  0x11   :  { %373 = vmatpush.bf16.msra.mxu3 %v599_v15  ;;  %v112_v50 = vpack.c.b16 %v104_v46, %v104_v46  ;;  %v113_v51 = vpack.c.b16 %v105_v47, %v105_v47 }
  0x12   :  { %320 = vmatpush.bf16.msra.mxu0 %v574_v16  ;;  %v114_v52 = vpack.c.b16 %v106_v48, %v106_v48  ;;  %v115_v53 = vpack.c.b16 %v107_v49, %v107_v49 }
  0x13   :  { %338 = vmatpush.bf16.msra.mxu1 %v582_v17 }
  0x14   :  { %356 = vmatpush.bf16.msra.mxu2 %v590_v18 }
  0x15   :  { %374 = vmatpush.bf16.msra.mxu3 %v598_v19 }
  0x16   :  { %321 = vmatpush.bf16.msra.mxu0 %v573_v20 }
  0x17   :  { %339 = vmatpush.bf16.msra.mxu1 %v581_v21 }
  0x18   :  { %357 = vmatpush.bf16.msra.mxu2 %v589_v22 }
  0x19   :  { %375 = vmatpush.bf16.msra.mxu3 %v597_v23 }
  0x1a   :  { %322 = vmatpush.bf16.msra.mxu0 %v572_v24 }
  0x1b   :  { %340 = vmatpush.bf16.msra.mxu1 %v580_v25 }
  0x1c   :  { %358 = vmatpush.bf16.msra.mxu2 %v588_v26 }
  0x1d   :  { %376 = vmatpush.bf16.msra.mxu3 %v596_v27 }
  0x1e   :  { %323 = vmatpush.bf16.msra.mxu0 %v571_v28 }
  0x1f   :  { %341 = vmatpush.bf16.msra.mxu1 %v579_v29 }
  0x20   :  { %359 = vmatpush.bf16.msra.mxu2 %v587_v30 }
  0x21   :  { %377 = vmatpush.bf16.msra.mxu3 %v595_v31  ;;  %324 = vmatmul.bf16.vlgmr.msra.gmra.mxu0 %v426_v40 }
  0x22   :  { %342 = vmatmul.bf16.vlgmr.msra.gmra.mxu1 %v430_v41 }
  0x23   :  { %360 = vmatmul.bf16.vlgmr.msra.gmra.mxu2 %v434_v42 }
  0x24   :  { %378 = vmatmul.bf16.vlgmr.msra.gmra.mxu3 %v438_v43 }
  0x31   :  { %329 = vmatmul.bf16.gmra.mxu0 %v112_v50 }
  0x32   :  { %347 = vmatmul.bf16.gmra.mxu1 %v113_v51 }
  0x33   :  { %365 = vmatmul.bf16.gmra.mxu2 %v114_v52 }
  0x34   :  { %383 = vmatmul.bf16.gmra.mxu3 %v115_v53 }
  0x9e   :  { %v325_v55 = vpop.f32.mrf.mxu0 }
  0x9f   :  { %v343_v56 = vpop.f32.mrf.mxu1  ;;  %v326_v57 = vadd.f32 %v603_v54, %v325_v55 }
  0xa1   :  { %v344_v58 = vadd.f32 %v343_v56, %v326_v57 }
  0xa6   :  { %v361_v59 = vpop.f32.mrf.mxu2  ;;  %v327_v62 = vpop.f32.mrf.mxu0 }
  0xa7   :  { %v379_v60 = vpop.f32.mrf.mxu3  ;;  %v362_v61 = vadd.f32 %v361_v59, %v344_v58  ;;  %v345_v63 = vpop.f32.mrf.mxu1  ;;  %v328_v1 = vadd.f32 %v603_v54, %v327_v62 }
  0xa9   :  { %v380_v0 = vadd.f32 %v379_v60, %v362_v61  ;;  %v346_v2 = vadd.f32 %v345_v63, %v328_v1 }
  0xab   :  { %412 = vst [vmem:[%s773_s3] sm:$0xff] %v380_v0  ;;  %v396_v17 = vmul.f32 %v380_v0, %v380_v0 }
  0xae   :  { %v363_v3 = vpop.f32.mrf.mxu2  ;;  %v330_v6 = vpop.f32.mrf.mxu0 }
  0xaf   :  { %v381_v4 = vpop.f32.mrf.mxu3  ;;  %v364_v5 = vadd.f32 %v363_v3, %v346_v2  ;;  %v348_v7 = vpop.f32.mrf.mxu1  ;;  %v331_v8 = vadd.f32 %v603_v54, %v330_v6 }
  0xb1   :  { %v382_v9 = vadd.f32 %v381_v4, %v364_v5  ;;  %v349_v10 = vadd.f32 %v348_v7, %v331_v8 }
  0xb3   :  { %413 = vst [vmem:[%s773_s3 + $0x8] sm:$0xff] %v382_v9  ;;  %v397_v13 = vmul.f32 %v382_v9, %v382_v9  ;;  %v388_v18 = vadd.f32 %v382_v9, %v380_v0 }
  0xb5   :  { %v399_v20 = vadd.f32 %v397_v13, %v396_v17 }
  0xb6   :  { %v366_v11 = vpop.f32.mrf.mxu2  ;;  %v332_v15 = vpop.f32.mrf.mxu0 }
  0xb7   :  { %v384_v12 = vpop.f32.mrf.mxu3  ;;  %v367_v14 = vadd.f32 %v366_v11, %v349_v10  ;;  %v350_v16 = vpop.f32.mrf.mxu1 }
  0xb9   :  { %v385_v19 = vadd.f32 %v384_v12, %v367_v14 }
  0xbb   :  { %v389_v21 = vadd.f32 %v388_v18, %v385_v19  ;;  %v398_v22 = vmul.f32 %v385_v19, %v385_v19  ;;  %414 = vst [vmem:[%s773_s3 + $0x10] sm:$0xff] %v385_v19 }
  0xbd   :  { %v390_v23 = vrot.slane %v389_v21, 4  ;;  %v400_v24 = vadd.f32 %v399_v20, %v398_v22 }
  0xbe   :  { %v368_v25 = vpop.f32.mrf.mxu2 }
  0xbf   :  { %v386_v26 = vpop.f32.mrf.mxu3  ;;  %v391_v27 = vadd.f32 %v390_v23, %v389_v21  ;;  %v401_v28 = vrot.slane %v400_v24, 4 }
  0xc1   :  { %v392_v29 = vrot.slane %v391_v27, 2  ;;  %v402_v30 = vadd.f32 %v401_v28, %v400_v24 }
  0xc3   :  { %v393_v31 = vadd.f32 %v392_v29, %v391_v27  ;;  %v403_v32 = vrot.slane %v402_v30, 2 }
  0xc5   :  { %v394_v33 = vrot.slane %v393_v31, 1  ;;  %v404_v34 = vadd.f32 %v403_v32, %v402_v30 }
  0xc7   :  { %v405_v35 = vrot.slane %v404_v34, 1  ;;  %v395_v36 = vadd.f32 %v394_v33, %v393_v31 }
  0xc9   :  { %v406_v37 = vadd.f32 %v405_v35, %v404_v34 }
  0xcb   :  { %v408_v38 = vsel %vm407_vm0, %v395_v36, %v406_v37 }
  0xcc   :  { %v410_v39 = vsel %vm409_vm1, %v408_v38, 0.0 }
  0xcd   :  { %411 = vst [vmem:[%s774_s4] sm:$0xff] %v410_v39 }

// kernel: _lambda_.15
= control target key start
LH: loop header
LB: loop body
LE: loop exit
PB: predicated region body
PF: predicated region fallthrough
CT: control target
= control target key end

     0   :  { %s1222_s1 = inlined_call_operand.vmem [shape: bf16[1024,128], index: 1, kind: input, shape index: {}]   ;;  %s1223_s2 = inlined_call_operand.vmem [shape: f32[1,128], index: 2, kind: input, shape index: {}]   ;;  %s1224_s0 = inlined_call_operand.vmem [shape: bf16[8,1024], index: 0, kind: input, shape index: {}]   ;;  %s1225_s3 = inlined_call_operand.vmem [shape: f32[8,128], index: 3, kind: output, shape index: {}]  }
   0x1   :  { %v934_v0 = vld [vmem:[%s1222_s1 + $0x38] sm:$0xff]  ;;  %v933_v4 = vld [vmem:[%s1222_s1 + $0x30] sm:$0xff]  ;;  %v932_v8 = vld [vmem:[%s1222_s1 + $0x28] sm:$0xff] }
   0x2   :  { %v942_v1 = vld [vmem:[%s1222_s1 + $0x78] sm:$0xff]  ;;  %562 = vmatpush.bf16.msra.mxu0 %v934_v0  ;;  %v941_v5 = vld [vmem:[%s1222_s1 + $0x70] sm:$0xff]  ;;  %v940_v9 = vld [vmem:[%s1222_s1 + $0x68] sm:$0xff] }
   0x3   :  { %v950_v2 = vld [vmem:[%s1222_s1 + $0xb8] sm:$0xff]  ;;  %575 = vmatpush.bf16.msra.mxu1 %v942_v1  ;;  %v949_v6 = vld [vmem:[%s1222_s1 + $0xb0] sm:$0xff]  ;;  %v948_v10 = vld [vmem:[%s1222_s1 + $0xa8] sm:$0xff] }
   0x4   :  { %v958_v3 = vld [vmem:[%s1222_s1 + $0xf8] sm:$0xff]  ;;  %588 = vmatpush.bf16.msra.mxu2 %v950_v2  ;;  %v957_v7 = vld [vmem:[%s1222_s1 + $0xf0] sm:$0xff]  ;;  %v956_v11 = vld [vmem:[%s1222_s1 + $0xe8] sm:$0xff] }
   0x5   :  { %601 = vmatpush.bf16.msra.mxu3 %v958_v3  ;;  %v931_v12 = vld [vmem:[%s1222_s1 + $0x20] sm:$0xff]  ;;  %v930_v16 = vld [vmem:[%s1222_s1 + $0x18] sm:$0xff]  ;;  %v929_v20 = vld [vmem:[%s1222_s1 + $0x10] sm:$0xff] }
   0x6   :  { %563 = vmatpush.bf16.msra.mxu0 %v933_v4  ;;  %v939_v13 = vld [vmem:[%s1222_s1 + $0x60] sm:$0xff]  ;;  %v938_v17 = vld [vmem:[%s1222_s1 + $0x58] sm:$0xff]  ;;  %v937_v21 = vld [vmem:[%s1222_s1 + $0x50] sm:$0xff] }
   0x7   :  { %576 = vmatpush.bf16.msra.mxu1 %v941_v5  ;;  %v947_v14 = vld [vmem:[%s1222_s1 + $0xa0] sm:$0xff]  ;;  %v946_v18 = vld [vmem:[%s1222_s1 + $0x98] sm:$0xff]  ;;  %v945_v22 = vld [vmem:[%s1222_s1 + $0x90] sm:$0xff] }
   0x8   :  { %589 = vmatpush.bf16.msra.mxu2 %v949_v6  ;;  %v955_v15 = vld [vmem:[%s1222_s1 + $0xe0] sm:$0xff]  ;;  %v954_v19 = vld [vmem:[%s1222_s1 + $0xd8] sm:$0xff]  ;;  %v953_v23 = vld [vmem:[%s1222_s1 + $0xd0] sm:$0xff] }
   0x9   :  { %602 = vmatpush.bf16.msra.mxu3 %v957_v7  ;;  %v928_v24 = vld [vmem:[%s1222_s1 + $0x8] sm:$0xff]  ;;  %v14_v29 = vld [vmem:[%s1224_s0] sm:$0xff]  ;;  %v966_v38 = vld [vmem:[%s1222_s1 + $0x138] sm:$0xff] }
   0xa   :  { %564 = vmatpush.bf16.msra.mxu0 %v932_v8  ;;  %v936_v25 = vld [vmem:[%s1222_s1 + $0x48] sm:$0xff]  ;;  %v927_v30 = vld [vmem:[%s1222_s1] sm:$0xff]  ;;  %v154_v36 = vunpack.c.l.b16 %v14_v29  ;;  %v155_v37 = vunpack.c.h.b16 %v14_v29  ;;  %v974_v39 = vld [vmem:[%s1222_s1 + $0x178] sm:$0xff] }
   0xb   :  { %577 = vmatpush.bf16.msra.mxu1 %v940_v9  ;;  %v944_v26 = vld [vmem:[%s1222_s1 + $0x88] sm:$0xff]  ;;  %v935_v31 = vld [vmem:[%s1222_s1 + $0x40] sm:$0xff]  ;;  %v982_v40 = vld [vmem:[%s1222_s1 + $0x1b8] sm:$0xff] }
   0xc   :  { %590 = vmatpush.bf16.msra.mxu2 %v948_v10  ;;  %v952_v27 = vld [vmem:[%s1222_s1 + $0xc8] sm:$0xff]  ;;  %v943_v34 = vld [vmem:[%s1222_s1 + $0x80] sm:$0xff]  ;;  %v990_v41 = vld [vmem:[%s1222_s1 + $0x1f8] sm:$0xff]  ;;  %v162_v44 = vpack.c.b16 %v154_v36, %v154_v36  ;;  %v163_v45 = vpack.c.b16 %v155_v37, %v155_v37 }
   0xd   :  { %603 = vmatpush.bf16.msra.mxu3 %v956_v11  ;;  %v15_v28 = vld [vmem:[%s1224_s0 + $0x8] sm:$0xff]  ;;  %v951_v35 = vld [vmem:[%s1222_s1 + $0xc0] sm:$0xff]  ;;  %v965_v46 = vld [vmem:[%s1222_s1 + $0x130] sm:$0xff] }
   0xe   :  { %565 = vmatpush.bf16.msra.mxu0 %v931_v12  ;;  %v156_v32 = vunpack.c.l.b16 %v15_v28  ;;  %v157_v33 = vunpack.c.h.b16 %v15_v28  ;;  %v973_v47 = vld [vmem:[%s1222_s1 + $0x170] sm:$0xff]  ;;  %v964_v50 = vld [vmem:[%s1222_s1 + $0x128] sm:$0xff]  ;;  %v963_v54 = vld [vmem:[%s1222_s1 + $0x120] sm:$0xff] }
   0xf   :  { %578 = vmatpush.bf16.msra.mxu1 %v939_v13  ;;  %v981_v48 = vld [vmem:[%s1222_s1 + $0x1b0] sm:$0xff]  ;;  %v972_v51 = vld [vmem:[%s1222_s1 + $0x168] sm:$0xff]  ;;  %v971_v55 = vld [vmem:[%s1222_s1 + $0x160] sm:$0xff] }
  0x10   :  { %591 = vmatpush.bf16.msra.mxu2 %v947_v14  ;;  %v164_v42 = vpack.c.b16 %v156_v32, %v156_v32  ;;  %v165_v43 = vpack.c.b16 %v157_v33, %v157_v33  ;;  %v989_v49 = vld [vmem:[%s1222_s1 + $0x1f0] sm:$0xff]  ;;  %v980_v52 = vld [vmem:[%s1222_s1 + $0x1a8] sm:$0xff]  ;;  %v979_v56 = vld [vmem:[%s1222_s1 + $0x1a0] sm:$0xff] }
  0x11   :  { %604 = vmatpush.bf16.msra.mxu3 %v955_v15  ;;  %v988_v53 = vld [vmem:[%s1222_s1 + $0x1e8] sm:$0xff]  ;;  %v987_v57 = vld [vmem:[%s1222_s1 + $0x1e0] sm:$0xff]  ;;  %v962_v58 = vld [vmem:[%s1222_s1 + $0x118] sm:$0xff] }
  0x12   :  { %566 = vmatpush.bf16.msra.mxu0 %v930_v16  ;;  %v970_v59 = vld [vmem:[%s1222_s1 + $0x158] sm:$0xff]  ;;  %v961_v62 = vld [vmem:[%s1222_s1 + $0x110] sm:$0xff]  ;;  %v960_v2 = vld [vmem:[%s1222_s1 + $0x108] sm:$0xff] }
  0x13   :  { %579 = vmatpush.bf16.msra.mxu1 %v938_v17  ;;  %v978_v60 = vld [vmem:[%s1222_s1 + $0x198] sm:$0xff]  ;;  %v969_v63 = vld [vmem:[%s1222_s1 + $0x150] sm:$0xff]  ;;  %v968_v3 = vld [vmem:[%s1222_s1 + $0x148] sm:$0xff] }
  0x14   :  { %592 = vmatpush.bf16.msra.mxu2 %v946_v18  ;;  %v986_v61 = vld [vmem:[%s1222_s1 + $0x1d8] sm:$0xff]  ;;  %v977_v0 = vld [vmem:[%s1222_s1 + $0x190] sm:$0xff]  ;;  %v976_v5 = vld [vmem:[%s1222_s1 + $0x188] sm:$0xff] }
  0x15   :  { %605 = vmatpush.bf16.msra.mxu3 %v954_v19  ;;  %v985_v1 = vld [vmem:[%s1222_s1 + $0x1d0] sm:$0xff]  ;;  %v984_v6 = vld [vmem:[%s1222_s1 + $0x1c8] sm:$0xff]  ;;  %v17_v7 = vld [vmem:[%s1224_s0 + $0x18] sm:$0xff] }
  0x16   :  { %567 = vmatpush.bf16.msra.mxu0 %v929_v20  ;;  %v16_v4 = vld [vmem:[%s1224_s0 + $0x10] sm:$0xff]  ;;  %v959_v10 = vld [vmem:[%s1222_s1 + $0x100] sm:$0xff]  ;;  %v160_v12 = vunpack.c.l.b16 %v17_v7  ;;  %v161_v13 = vunpack.c.h.b16 %v17_v7 }
  0x17   :  { %580 = vmatpush.bf16.msra.mxu1 %v937_v21  ;;  %v158_v8 = vunpack.c.l.b16 %v16_v4  ;;  %v159_v9 = vunpack.c.h.b16 %v16_v4  ;;  %v967_v11 = vld [vmem:[%s1222_s1 + $0x140] sm:$0xff] }
  0x18   :  { %593 = vmatpush.bf16.msra.mxu2 %v945_v22  ;;  %v975_v14 = vld [vmem:[%s1222_s1 + $0x180] sm:$0xff]  ;;  %v168_v18 = vpack.c.b16 %v160_v12, %v160_v12  ;;  %v169_v19 = vpack.c.b16 %v161_v13, %v161_v13 }
  0x19   :  { %606 = vmatpush.bf16.msra.mxu3 %v953_v23  ;;  %v983_v15 = vld [vmem:[%s1222_s1 + $0x1c0] sm:$0xff]  ;;  %v166_v16 = vpack.c.b16 %v158_v8, %v158_v8  ;;  %v167_v17 = vpack.c.b16 %v159_v9, %v159_v9 }
  0x1a   :  { %568 = vmatpush.bf16.msra.mxu0 %v928_v24 }
  0x1b   :  { %581 = vmatpush.bf16.msra.mxu1 %v936_v25 }
  0x1c   :  { %594 = vmatpush.bf16.msra.mxu2 %v944_v26  ;;  %v991_v26 = vld [vmem:[%s1223_s2] ss:$0 sm:$0xff] }
  0x1d   :  { %607 = vmatpush.bf16.msra.mxu3 %v952_v27 }
  0x1e   :  { %569 = vmatpush.bf16.msra.mxu0 %v927_v30 }
  0x1f   :  { %582 = vmatpush.bf16.msra.mxu1 %v935_v31 }
  0x20   :  { %595 = vmatpush.bf16.msra.mxu2 %v943_v34 }
  0x21   :  { %608 = vmatpush.bf16.msra.mxu3 %v951_v35  ;;  %570 = vmatmul.bf16.vlgmr.msra.gmra.mxu0 %v162_v44 }
  0x22   :  { %614 = vmatpush.bf16.msrb.mxu0 %v966_v38  ;;  %583 = vmatmul.bf16.vlgmr.msra.gmra.mxu1 %v163_v45 }
  0x23   :  { %627 = vmatpush.bf16.msrb.mxu1 %v974_v39  ;;  %596 = vmatmul.bf16.vlgmr.msra.gmra.mxu2 %v164_v42 }
  0x24   :  { %640 = vmatpush.bf16.msrb.mxu2 %v982_v40  ;;  %609 = vmatmul.bf16.vlgmr.msra.gmra.mxu3 %v165_v43 }
  0x25   :  { %653 = vmatpush.bf16.msrb.mxu3 %v990_v41 }
  0x26   :  { %615 = vmatpush.bf16.msrb.mxu0 %v965_v46 }
  0x27   :  { %628 = vmatpush.bf16.msrb.mxu1 %v973_v47 }
  0x28   :  { %641 = vmatpush.bf16.msrb.mxu2 %v981_v48 }
  0x29   :  { %654 = vmatpush.bf16.msrb.mxu3 %v989_v49 }
  0x2a   :  { %616 = vmatpush.bf16.msrb.mxu0 %v964_v50 }
  0x2b   :  { %629 = vmatpush.bf16.msrb.mxu1 %v972_v51 }
  0x2c   :  { %642 = vmatpush.bf16.msrb.mxu2 %v980_v52 }
  0x2d   :  { %655 = vmatpush.bf16.msrb.mxu3 %v988_v53 }
  0x2e   :  { %617 = vmatpush.bf16.msrb.mxu0 %v963_v54 }
  0x2f   :  { %630 = vmatpush.bf16.msrb.mxu1 %v971_v55 }
  0x30   :  { %643 = vmatpush.bf16.msrb.mxu2 %v979_v56 }
  0x31   :  { %656 = vmatpush.bf16.msrb.mxu3 %v987_v57 }
  0x32   :  { %618 = vmatpush.bf16.msrb.mxu0 %v962_v58 }
  0x33   :  { %631 = vmatpush.bf16.msrb.mxu1 %v970_v59 }
  0x34   :  { %644 = vmatpush.bf16.msrb.mxu2 %v978_v60 }
  0x35   :  { %657 = vmatpush.bf16.msrb.mxu3 %v986_v61 }
  0x36   :  { %619 = vmatpush.bf16.msrb.mxu0 %v961_v62 }
  0x37   :  { %632 = vmatpush.bf16.msrb.mxu1 %v969_v63 }
  0x38   :  { %645 = vmatpush.bf16.msrb.mxu2 %v977_v0 }
  0x39   :  { %658 = vmatpush.bf16.msrb.mxu3 %v985_v1 }
  0x3a   :  { %620 = vmatpush.bf16.msrb.mxu0 %v960_v2 }
  0x3b   :  { %633 = vmatpush.bf16.msrb.mxu1 %v968_v3 }
  0x3c   :  { %646 = vmatpush.bf16.msrb.mxu2 %v976_v5 }
  0x3d   :  { %659 = vmatpush.bf16.msrb.mxu3 %v984_v6 }
  0x3e   :  { %621 = vmatpush.bf16.msrb.mxu0 %v959_v10 }
  0x3f   :  { %634 = vmatpush.bf16.msrb.mxu1 %v967_v11 }
  0x40   :  { %647 = vmatpush.bf16.msrb.mxu2 %v975_v14 }
  0x41   :  { %660 = vmatpush.bf16.msrb.mxu3 %v983_v15  ;;  %622 = vmatmul.bf16.vlgmr.msrb.gmra.mxu0 %v166_v16 }
  0x42   :  { %635 = vmatmul.bf16.vlgmr.msrb.gmra.mxu1 %v167_v17 }
  0x43   :  { %648 = vmatmul.bf16.vlgmr.msrb.gmra.mxu2 %v168_v18 }
  0x44   :  { %661 = vmatmul.bf16.vlgmr.msrb.gmra.mxu3 %v169_v19 }
  0x9e   :  { %v571_v20 = vpop.f32.mrf.mxu0 }
  0x9f   :  { %v584_v21 = vpop.f32.mrf.mxu1  ;;  %v572_v29 = vadd.f32 %v991_v26, %v571_v20 }
  0xa1   :  { %v585_v30 = vadd.f32 %v584_v21, %v572_v29 }
  0xa6   :  { %v597_v22 = vpop.f32.mrf.mxu2  ;;  %v573_v24 = vpop.f32.mrf.mxu0 }
  0xa7   :  { %v610_v23 = vpop.f32.mrf.mxu3  ;;  %v586_v25 = vpop.f32.mrf.mxu1  ;;  %v598_v31 = vadd.f32 %v597_v22, %v585_v30 }
  0xa9   :  { %v611_v32 = vadd.f32 %v610_v23, %v598_v31 }
  0xae   :  { %v599_v27 = vpop.f32.mrf.mxu2 }
  0xaf   :  { %v612_v28 = vpop.f32.mrf.mxu3 }
  0xbe   :  { %v623_v33 = vpop.f32.mrf.mxu0 }
  0xbf   :  { %v636_v34 = vpop.f32.mrf.mxu1  ;;  %v624_v35 = vadd.f32 %v623_v33, %v611_v32 }
  0xc1   :  { %v637_v36 = vadd.f32 %v636_v34, %v624_v35 }
  0xc6   :  { %v649_v37 = vpop.f32.mrf.mxu2  ;;  %v625_v40 = vpop.f32.mrf.mxu0 }
  0xc7   :  { %v662_v38 = vpop.f32.mrf.mxu3  ;;  %v650_v39 = vadd.f32 %v649_v37, %v637_v36  ;;  %v638_v41 = vpop.f32.mrf.mxu1 }
  0xc9   :  { %v663_v42 = vadd.f32 %v662_v38, %v650_v39 }
  0xcb   :  { %666 = vst [vmem:[%s1225_s3] sm:$0xff] %v663_v42 }
  0xce   :  { %v651_v43 = vpop.f32.mrf.mxu2 }
  0xcf   :  { %v664_v44 = vpop.f32.mrf.mxu3 }

</bundles_post_ra>
